<compile_context>
chip_gen: v5e
topology: v5e:2x2
jax: 0.10.0
libtpu: 0.0.40
codegen_flags: <defaults>
</compile_context>

<pallas_src>
import numpy as np
import jax
import jax.numpy as jnp
from jax.experimental import pallas as pl
from jax.experimental.pallas import tpu as pltpu

# Tap order shared by the host-built masks and the in-kernel shifts.
_OFFSETS = ((-1, -1), (-1, 0), (-1, 1),
            (0, -1), (0, 0), (0, 1),
            (1, -1), (1, 0), (1, 1))


def _vmem_spec():
    return pl.BlockSpec(memory_space=pltpu.MemorySpace.VMEM)


def _tap_mask(n, h, w):
    """(n*h*w, 9) 0/1 validity mask for 3x3 / pad-1 taps at resolution (h, w)."""
    m = np.zeros((n * h * w, 9), np.float32)
    for ni in range(n):
        for y in range(h):
            for x in range(w):
                r = (ni * h + y) * w + x
                for t, (dy, dx) in enumerate(_OFFSETS):
                    if 0 <= y + dy < h and 0 <= x + dx < w:
                        m[r, t] = 1.0
    return m


def _stem_patches(x_nchw, kh=7, kw=7, stride=2, pad=3):
    """Host-side im2col for the 7x7/s2/p3 stem conv only (acts on the raw input)."""
    x = jnp.transpose(x_nchw.astype(jnp.float32), (0, 2, 3, 1))      # NCHW -> NHWC
    nb, hh, ww, cc = x.shape
    xp = jnp.pad(x, ((0, 0), (pad, pad), (pad, pad), (0, 0)))
    ho = (hh + 2 * pad - kh) // stride + 1
    wo = (ww + 2 * pad - kw) // stride + 1
    cols = [xp[:, i:i + stride * ho:stride, j:j + stride * wo:stride, :]
            for i in range(kh) for j in range(kw)]
    return jnp.stack(cols, axis=3).reshape(nb * ho * wo, kh * kw * cc)


# ---------------------------------------------------------------------------
# Fused-forward Pallas kernel
# ---------------------------------------------------------------------------
def _make_kernel(ops, n_tensors):
    """Kernel body executing the whole network on VMEM/vreg-resident 2-D
    activations (rows = N*H*W, cols = C, f32 between ops)."""

    def kernel(*refs):
        patches_ref = refs[0]
        tref = refs[1:1 + n_tensors]
        out_ref = refs[1 + n_tensors]
        pool_buf = refs[2 + n_tensors]            # reused by every pool

        def mm(a, b):                             # bf16 MXU matmul, f32 accum
            return jnp.dot(a.astype(jnp.bfloat16), b.astype(jnp.bfloat16),
                           preferred_element_type=jnp.float32)

        def bn(v, relu):                          # fused single-pass batch stats
            r = v.shape[0]
            s1 = jnp.sum(v, axis=0, keepdims=True)
            s2 = jnp.sum(v * v, axis=0, keepdims=True)
            mu = s1 * (1.0 / r)
            var = jnp.maximum(s2 * (1.0 / r) - mu * mu, 0.0)
            y = (v - mu) * jax.lax.rsqrt(var + 1e-5)
            return jnp.maximum(y, 0.0) if relu else y

        def taps(v, mask, w):
            """9 (shifted copy, validity column) pairs for 3x3 / pad-1 windows."""
            rows, ch = v.shape
            padr = w + 1
            z = jnp.zeros((padr, ch), v.dtype)
            xp = jnp.concatenate([z, v, z], axis=0)
            out = []
            for t, (dy, dx) in enumerate(_OFFSETS):
                d = dy * w + dx
                out.append((xp[padr + d:padr + d + rows, :], mask[:, t:t + 1]))
            return out

        x = patches_ref[...]                      # stem im2col patches (R, 49)
        saved = []
        for op in ops:
            kind = op[0]
            if kind == "matmul":                  # 1x1 conv / stem conv / fc body
                x = mm(x, tref[op[1]][...])
            elif kind == "bn":
                x = bn(x, op[1])
            elif kind == "conv3x3":               # 3x3/s1/p1 -> ONE MXU matmul
                _, midx, widx, w = op
                mask = tref[midx][...]
                cols = [s * m for s, m in taps(x, mask, w)]
                x = mm(jnp.concatenate(cols, axis=1), tref[widx][...])
            elif kind in ("maxpool", "avgpool"):  # 3x3/s2/p1, VPU combine
                _, midx, n, h, w, nonneg = op
                mask = tref[midx][...]
                rows, ch = x.shape
                acc = None
                for s, m in taps(x, mask, w):
                    if kind == "avgpool":         # count_include_pad=True
                        v = s * m
                        acc = v if acc is None else acc + v
                    else:
                        if nonneg:                # padded taps -> 0 is harmless
                            v = s * m
                        else:                     # pool after a DenseNet unit
                            v = jnp.where(m > 0.5, s, -1e30)
                        acc = v if acc is None else jnp.maximum(acc, v)
                if kind == "avgpool":
                    acc = acc * (1.0 / 9.0)
                # stride-2 spatial downsample via strided reads from scratch
                pool_buf[0:rows, 0:ch] = acc
                ho = (h - 1) // 2 + 1
                wo = (w - 1) // 2 + 1
                pieces = []
                for ni in range(n):
                    for yo in range(ho):
                        base = (ni * h + 2 * yo) * w
                        pieces.append(pool_buf[pl.ds(base, wo, 2), 0:ch])
                x = jnp.concatenate(pieces, axis=0)
            elif kind == "push":                  # stash residual / dense input
                saved.append(x)
            elif kind == "residual_id":
                x = jnp.maximum(x + saved.pop(), 0.0)
            elif kind == "residual_conv":
                sc = bn(mm(saved.pop(), tref[op[1]][...]), False)
                x = jnp.maximum(x + sc, 0.0)
            elif kind == "dense_concat":          # torch.cat((x, out), 1)
                x = jnp.concatenate([saved.pop(), x], axis=1)
            elif kind == "gap":                   # adaptive avg pool to 1x1
                _, n, hw = op
                pieces = [jnp.mean(x[i * hw:(i + 1) * hw, :], axis=0, keepdims=True)
                          for i in range(n)]
                x = jnp.concatenate(pieces, axis=0)
            elif kind == "linear":
                x = mm(x, tref[op[1]][...]) + tref[op[2]][...]
        out_ref[...] = x

    return kernel


# ---------------------------------------------------------------------------
# Model builder: packs weights / masks and emits the fused kernel
# ---------------------------------------------------------------------------
def build_model(individual, num_classes, input_shape, key):
    n, cin0, h, w = input_shape
    assert cin0 == 1, "EvoCNNModel stem expects a single input channel"
    keys = iter(jax.random.split(key, 512))

    tensors, ops, pool_dims = [], [], []
    mask_cache = {}

    def add_tensor(arr):
        tensors.append(arr)
        return len(tensors) - 1

    def conv_w(cout, cin, kh, kw):
        return 0.1 * jax.random.normal(next(keys), (cout, cin, kh, kw), jnp.float32)

    def w1x1(cin, cout):                       # (cout,cin,1,1) -> (cin,cout) bf16
        return add_tensor(conv_w(cout, cin, 1, 1)[:, :, 0, 0].T.astype(jnp.bfloat16))

    def w3x3(cin, cout):                       # (cout,cin,3,3) -> (9*cin,cout) bf16
        wr = conv_w(cout, cin, 3, 3)
        return add_tensor(jnp.transpose(wr, (2, 3, 1, 0))
                          .reshape(9 * cin, cout).astype(jnp.bfloat16))

    def mask_idx(hh, ww):                      # deduplicated per resolution
        if (hh, ww) not in mask_cache:
            mask_cache[(hh, ww)] = add_tensor(jnp.asarray(_tap_mask(n, hh, ww)))
        return mask_cache[(hh, ww)]

    # --- stem: 7x7/s2/p3 conv (one matmul on host-built patches) + BN/ReLU + maxpool
    stem_w = jnp.transpose(conv_w(3, 1, 7, 7), (2, 3, 1, 0)).reshape(49, 3)
    ops.append(("matmul", add_tensor(stem_w.astype(jnp.bfloat16))))
    h = (h + 2 * 3 - 7) // 2 + 1
    w = (w + 2 * 3 - 7) // 2 + 1
    c = 3
    ops.append(("bn", True))
    nonneg = True

    def emit_pool(kind):
        nonlocal h, w
        ops.append((kind, mask_idx(h, w), n, h, w, nonneg))
        pool_dims.append((n * h * w, c))
        h = (h - 1) // 2 + 1
        w = (w - 1) // 2 + 1

    emit_pool("maxpool")

    # --- evolved body
    for item in individual:
        if len(item) == 3:                                  # ResNetUnit
            amount, in_planes, planes = int(item[0]), item[1], item[2]
            for _ in range(amount):
                ops.append(("push",))
                ops.append(("matmul", w1x1(in_planes, planes)))
                ops.append(("bn", True))
                ops.append(("conv3x3", mask_idx(h, w), w3x3(planes, planes), w))
                ops.append(("bn", True))
                ops.append(("matmul", w1x1(planes, planes)))
                ops.append(("bn", False))
                if in_planes != planes:
                    ops.append(("residual_conv", w1x1(in_planes, planes)))
                else:
                    ops.append(("residual_id",))
                in_planes = planes
            c = planes
            nonneg = True
        elif len(item) == 1:                                # pooling layer
            emit_pool("avgpool" if item[0] == 0 else "maxpool")
        elif len(item) == 4:                                # DenseNetUnit
            k, amount, in_ch, max_in = item[0], int(item[1]), item[2], item[3]
            cur = in_ch
            if in_ch > max_in:
                ops.append(("bn", True))
                ops.append(("matmul", w1x1(in_ch, max_in)))
                cur = max_in
            for _ in range(amount):
                inter = 4 * k
                ops.append(("push",))
                ops.append(("bn", True))
                ops.append(("matmul", w1x1(cur, inter)))
                ops.append(("bn", True))
                ops.append(("conv3x3", mask_idx(h, w), w3x3(inter, k), w))
                ops.append(("dense_concat",))
                cur += k
            c = cur
            nonneg = False

    # --- adaptive average pool (per-image row mean) + FC
    ops.append(("gap", n, h * w))
    fc_w = 0.1 * jax.random.normal(next(keys), (num_classes, c), jnp.float32)
    ops.append(("linear", add_tensor(fc_w.T.astype(jnp.bfloat16)),
                add_tensor(jnp.zeros((1, num_classes), jnp.float32))))

    max_rows = max(r for r, _ in pool_dims)
    max_cols = max(cc for _, cc in pool_dims)

    n_tensors = len(tensors)
    fused = pl.pallas_call(
        _make_kernel(ops, n_tensors),
        out_shape=jax.ShapeDtypeStruct((n, num_classes), jnp.float32),
        in_specs=[_vmem_spec()] * (1 + n_tensors),
        out_specs=_vmem_spec(),
        scratch_shapes=[pltpu.VMEM((max_rows, max_cols), jnp.float32)],
        compiler_params=pltpu.CompilerParams(vmem_limit_bytes=48 * 1024 * 1024),
    )

    def apply(x_nchw):
        return fused(_stem_patches(x_nchw), *tensors)

    return jax.jit(apply)


# ---------------------------------------------------------------------------
if __name__ == "__main__":
    # individual grammar (same as the PyTorch module):
    #   [amount, in_ch, out_ch]        -> ResNetUnit
    #   [0] / [1]                      -> AvgPool2d / MaxPool2d (3x3, s2, p1)
    #   [k, amount, in_ch, max_in_ch]  -> DenseNetUnit
    individual = [[1, 3, 8], [1], [2, 2, 8, 8]]
    num_classes = 10
    input_shape = (2, 1, 16, 16)      # NCHW, like the PyTorch module

    key = jax.random.PRNGKey(0)
    k_params, k_x = jax.random.split(key)
    model = build_model(individual, num_classes, input_shape, k_params)

    x = jax.random.normal(k_x, input_shape, jnp.float32)
    logits = model(x)
    jax.block_until_ready(logits)
    assert logits.shape == (input_shape[0], num_classes), logits.shape
    assert bool(jnp.all(jnp.isfinite(logits))), "non-finite logits"
    print("KERNEL_OK")
</pallas_src>

<mosaic_0001>
module attributes {stable_mosaic.version = 11 : i64} {
  func.func @kernel(%arg0: memref<128x49xf32, #tpu.memory_space<vmem>>, %arg1: memref<49x3xbf16, #tpu.memory_space<vmem>>, %arg2: memref<128x9xf32, #tpu.memory_space<vmem>>, %arg3: memref<3x8xbf16, #tpu.memory_space<vmem>>, %arg4: memref<32x9xf32, #tpu.memory_space<vmem>>, %arg5: memref<72x8xbf16, #tpu.memory_space<vmem>>, %arg6: memref<8x8xbf16, #tpu.memory_space<vmem>>, %arg7: memref<3x8xbf16, #tpu.memory_space<vmem>>, %arg8: memref<8x8xbf16, #tpu.memory_space<vmem>>, %arg9: memref<8x9xf32, #tpu.memory_space<vmem>>, %arg10: memref<72x2xbf16, #tpu.memory_space<vmem>>, %arg11: memref<10x8xbf16, #tpu.memory_space<vmem>>, %arg12: memref<72x2xbf16, #tpu.memory_space<vmem>>, %arg13: memref<12x10xbf16, #tpu.memory_space<vmem>>, %arg14: memref<1x10xf32, #tpu.memory_space<vmem>>, %arg15: memref<2x10xf32, #tpu.memory_space<vmem>>, %arg16: memref<128x8xf32, #tpu.memory_space<vmem>>) attributes {dimension_semantics = [], scalar_prefetch = 0 : i64, scratch_operands = 1 : i64, tpu.core_type = #tpu.core_type<tc>} {
    %c0 = arith.constant 0 : index
    %c0_0 = arith.constant 0 : index
    %0 = vector.load %arg0[%c0, %c0_0] : memref<128x49xf32, #tpu.memory_space<vmem>>, vector<128x49xf32>
    %c0_1 = arith.constant 0 : index
    %c0_2 = arith.constant 0 : index
    %1 = vector.load %arg1[%c0_1, %c0_2] : memref<49x3xbf16, #tpu.memory_space<vmem>>, vector<49x3xbf16>
    %2 = arith.truncf %0 : vector<128x49xf32> to vector<128x49xbf16>
    %cst = arith.constant dense<0.000000e+00> : vector<128x3xf32>
    %3 = tpu.matmul %2, %1, %cst {dimension_numbers = #tpu.dot_dimension_numbers<[1], [0], [0], [1], [0, 0, 1, 1], [], []>} : vector<128x49xbf16>, vector<49x3xbf16>, vector<128x3xf32> -> vector<128x3xf32>
    %cst_3 = arith.constant dense<0.000000e+00> : vector<3xf32>
    %4 = vector.multi_reduction <add>, %3, %cst_3 [0] : vector<128x3xf32> to vector<3xf32>
    %5 = vector.shape_cast %4 : vector<3xf32> to vector<1x3xf32>
    %6 = arith.mulf %3, %3 : vector<128x3xf32>
    %cst_4 = arith.constant dense<0.000000e+00> : vector<3xf32>
    %7 = vector.multi_reduction <add>, %6, %cst_4 [0] : vector<128x3xf32> to vector<3xf32>
    %8 = vector.shape_cast %7 : vector<3xf32> to vector<1x3xf32>
    %cst_5 = arith.constant 7.812500e-03 : f32
    %9 = vector.broadcast %cst_5 : f32 to vector<1x3xf32>
    %10 = arith.mulf %5, %9 : vector<1x3xf32>
    %cst_6 = arith.constant 7.812500e-03 : f32
    %11 = vector.broadcast %cst_6 : f32 to vector<1x3xf32>
    %12 = arith.mulf %8, %11 : vector<1x3xf32>
    %13 = arith.mulf %10, %10 : vector<1x3xf32>
    %14 = arith.subf %12, %13 : vector<1x3xf32>
    %cst_7 = arith.constant 0.000000e+00 : f32
    %15 = vector.broadcast %cst_7 : f32 to vector<1x3xf32>
    %16 = arith.maximumf %14, %15 : vector<1x3xf32>
    %17 = vector.broadcast %10 : vector<1x3xf32> to vector<128x3xf32>
    %18 = arith.subf %3, %17 : vector<128x3xf32>
    %cst_8 = arith.constant 9.99999974E-6 : f32
    %19 = vector.broadcast %cst_8 : f32 to vector<1x3xf32>
    %20 = arith.addf %16, %19 : vector<1x3xf32>
    %21 = math.rsqrt %20 : vector<1x3xf32>
    %22 = vector.broadcast %21 : vector<1x3xf32> to vector<128x3xf32>
    %23 = arith.mulf %18, %22 : vector<128x3xf32>
    %cst_9 = arith.constant 0.000000e+00 : f32
    %24 = vector.broadcast %cst_9 : f32 to vector<128x3xf32>
    %25 = arith.maximumf %23, %24 : vector<128x3xf32>
    %c0_10 = arith.constant 0 : index
    %c0_11 = arith.constant 0 : index
    %26 = vector.load %arg2[%c0_10, %c0_11] : memref<128x9xf32, #tpu.memory_space<vmem>>, vector<128x9xf32>
    %cst_12 = arith.constant 0.000000e+00 : f32
    %27 = vector.broadcast %cst_12 : f32 to vector<9x3xf32>
    %28 = tpu.concatenate %27, %25, %27 in 0 : vector<9x3xf32>, vector<128x3xf32>, vector<9x3xf32> -> vector<146x3xf32>
    %29 = vector.extract_strided_slice %28 {offsets = [0, 0], sizes = [128, 3], strides = [1, 1]} : vector<146x3xf32> to vector<128x3xf32>
    %30 = vector.extract_strided_slice %26 {offsets = [0, 0], sizes = [128, 1], strides = [1, 1]} : vector<128x9xf32> to vector<128x1xf32>
    %31 = vector.extract_strided_slice %28 {offsets = [1, 0], sizes = [128, 3], strides = [1, 1]} : vector<146x3xf32> to vector<128x3xf32>
    %32 = vector.extract_strided_slice %26 {offsets = [0, 1], sizes = [128, 1], strides = [1, 1]} : vector<128x9xf32> to vector<128x1xf32>
    %33 = vector.extract_strided_slice %28 {offsets = [2, 0], sizes = [128, 3], strides = [1, 1]} : vector<146x3xf32> to vector<128x3xf32>
    %34 = vector.extract_strided_slice %26 {offsets = [0, 2], sizes = [128, 1], strides = [1, 1]} : vector<128x9xf32> to vector<128x1xf32>
    %35 = vector.extract_strided_slice %28 {offsets = [8, 0], sizes = [128, 3], strides = [1, 1]} : vector<146x3xf32> to vector<128x3xf32>
    %36 = vector.extract_strided_slice %26 {offsets = [0, 3], sizes = [128, 1], strides = [1, 1]} : vector<128x9xf32> to vector<128x1xf32>
    %37 = vector.extract_strided_slice %28 {offsets = [9, 0], sizes = [128, 3], strides = [1, 1]} : vector<146x3xf32> to vector<128x3xf32>
    %38 = vector.extract_strided_slice %26 {offsets = [0, 4], sizes = [128, 1], strides = [1, 1]} : vector<128x9xf32> to vector<128x1xf32>
    %39 = vector.extract_strided_slice %28 {offsets = [10, 0], sizes = [128, 3], strides = [1, 1]} : vector<146x3xf32> to vector<128x3xf32>
    %40 = vector.extract_strided_slice %26 {offsets = [0, 5], sizes = [128, 1], strides = [1, 1]} : vector<128x9xf32> to vector<128x1xf32>
    %41 = vector.extract_strided_slice %28 {offsets = [16, 0], sizes = [128, 3], strides = [1, 1]} : vector<146x3xf32> to vector<128x3xf32>
    %42 = vector.extract_strided_slice %26 {offsets = [0, 6], sizes = [128, 1], strides = [1, 1]} : vector<128x9xf32> to vector<128x1xf32>
    %43 = vector.extract_strided_slice %28 {offsets = [17, 0], sizes = [128, 3], strides = [1, 1]} : vector<146x3xf32> to vector<128x3xf32>
    %44 = vector.extract_strided_slice %26 {offsets = [0, 7], sizes = [128, 1], strides = [1, 1]} : vector<128x9xf32> to vector<128x1xf32>
    %45 = vector.extract_strided_slice %28 {offsets = [18, 0], sizes = [128, 3], strides = [1, 1]} : vector<146x3xf32> to vector<128x3xf32>
    %46 = vector.extract_strided_slice %26 {offsets = [0, 8], sizes = [128, 1], strides = [1, 1]} : vector<128x9xf32> to vector<128x1xf32>
    %47 = vector.broadcast %30 : vector<128x1xf32> to vector<128x3xf32>
    %48 = arith.mulf %29, %47 : vector<128x3xf32>
    %49 = vector.broadcast %32 : vector<128x1xf32> to vector<128x3xf32>
    %50 = arith.mulf %31, %49 : vector<128x3xf32>
    %51 = arith.maximumf %48, %50 : vector<128x3xf32>
    %52 = vector.broadcast %34 : vector<128x1xf32> to vector<128x3xf32>
    %53 = arith.mulf %33, %52 : vector<128x3xf32>
    %54 = arith.maximumf %51, %53 : vector<128x3xf32>
    %55 = vector.broadcast %36 : vector<128x1xf32> to vector<128x3xf32>
    %56 = arith.mulf %35, %55 : vector<128x3xf32>
    %57 = arith.maximumf %54, %56 : vector<128x3xf32>
    %58 = vector.broadcast %38 : vector<128x1xf32> to vector<128x3xf32>
    %59 = arith.mulf %37, %58 : vector<128x3xf32>
    %60 = arith.maximumf %57, %59 : vector<128x3xf32>
    %61 = vector.broadcast %40 : vector<128x1xf32> to vector<128x3xf32>
    %62 = arith.mulf %39, %61 : vector<128x3xf32>
    %63 = arith.maximumf %60, %62 : vector<128x3xf32>
    %64 = vector.broadcast %42 : vector<128x1xf32> to vector<128x3xf32>
    %65 = arith.mulf %41, %64 : vector<128x3xf32>
    %66 = arith.maximumf %63, %65 : vector<128x3xf32>
    %67 = vector.broadcast %44 : vector<128x1xf32> to vector<128x3xf32>
    %68 = arith.mulf %43, %67 : vector<128x3xf32>
    %69 = arith.maximumf %66, %68 : vector<128x3xf32>
    %70 = vector.broadcast %46 : vector<128x1xf32> to vector<128x3xf32>
    %71 = arith.mulf %45, %70 : vector<128x3xf32>
    %72 = arith.maximumf %69, %71 : vector<128x3xf32>
    %c0_13 = arith.constant 0 : index
    %c0_14 = arith.constant 0 : index
    %73 = vector.load %arg16[%c0_13, %c0_14] : memref<128x8xf32, #tpu.memory_space<vmem>>, vector<128x3xf32>
    tpu.vector_store %arg16[%c0_13, %c0_14], %72 {strides = array<i32>} : memref<128x8xf32, #tpu.memory_space<vmem>>, vector<128x3xf32>,
    %c0_15 = arith.constant 0 : index
    %c0_16 = arith.constant 0 : index
    %74 = tpu.strided_load %arg16[%c0_15, %c0_16] {strides = array<i32: 2, 1>} : memref<128x8xf32, #tpu.memory_space<vmem>>, vector<4x3xf32>
    %c16 = arith.constant 16 : index
    %c0_17 = arith.constant 0 : index
    %75 = tpu.strided_load %arg16[%c16, %c0_17] {strides = array<i32: 2, 1>} : memref<128x8xf32, #tpu.memory_space<vmem>>, vector<4x3xf32>
    %c32 = arith.constant 32 : index
    %c0_18 = arith.constant 0 : index
    %76 = tpu.strided_load %arg16[%c32, %c0_18] {strides = array<i32: 2, 1>} : memref<128x8xf32, #tpu.memory_space<vmem>>, vector<4x3xf32>
    %c48 = arith.constant 48 : index
    %c0_19 = arith.constant 0 : index
    %77 = tpu.strided_load %arg16[%c48, %c0_19] {strides = array<i32: 2, 1>} : memref<128x8xf32, #tpu.memory_space<vmem>>, vector<4x3xf32>
    %c64 = arith.constant 64 : index
    %c0_20 = arith.constant 0 : index
    %78 = tpu.strided_load %arg16[%c64, %c0_20] {strides = array<i32: 2, 1>} : memref<128x8xf32, #tpu.memory_space<vmem>>, vector<4x3xf32>
    %c80 = arith.constant 80 : index
    %c0_21 = arith.constant 0 : index
    %79 = tpu.strided_load %arg16[%c80, %c0_21] {strides = array<i32: 2, 1>} : memref<128x8xf32, #tpu.memory_space<vmem>>, vector<4x3xf32>
    %c96 = arith.constant 96 : index
    %c0_22 = arith.constant 0 : index
    %80 = tpu.strided_load %arg16[%c96, %c0_22] {strides = array<i32: 2, 1>} : memref<128x8xf32, #tpu.memory_space<vmem>>, vector<4x3xf32>
    %c112 = arith.constant 112 : index
    %c0_23 = arith.constant 0 : index
    %81 = tpu.strided_load %arg16[%c112, %c0_23] {strides = array<i32: 2, 1>} : memref<128x8xf32, #tpu.memory_space<vmem>>, vector<4x3xf32>
    %82 = tpu.concatenate %74, %75, %76, %77, %78, %79, %80, %81 in 0 : vector<4x3xf32>, vector<4x3xf32>, vector<4x3xf32>, vector<4x3xf32>, vector<4x3xf32>, vector<4x3xf32>, vector<4x3xf32>, vector<4x3xf32> -> vector<32x3xf32>
    %c0_24 = arith.constant 0 : index
    %c0_25 = arith.constant 0 : index
    %83 = vector.load %arg3[%c0_24, %c0_25] : memref<3x8xbf16, #tpu.memory_space<vmem>>, vector<3x8xbf16>
    %84 = arith.truncf %82 : vector<32x3xf32> to vector<32x3xbf16>
    %cst_26 = arith.constant dense<0.000000e+00> : vector<32x8xf32>
    %85 = tpu.matmul %84, %83, %cst_26 {dimension_numbers = #tpu.dot_dimension_numbers<[1], [0], [0], [1], [0, 0, 1, 1], [], []>} : vector<32x3xbf16>, vector<3x8xbf16>, vector<32x8xf32> -> vector<32x8xf32>
    %cst_27 = arith.constant dense<0.000000e+00> : vector<8xf32>
    %86 = vector.multi_reduction <add>, %85, %cst_27 [0] : vector<32x8xf32> to vector<8xf32>
    %87 = vector.shape_cast %86 : vector<8xf32> to vector<1x8xf32>
    %88 = arith.mulf %85, %85 : vector<32x8xf32>
    %cst_28 = arith.constant dense<0.000000e+00> : vector<8xf32>
    %89 = vector.multi_reduction <add>, %88, %cst_28 [0] : vector<32x8xf32> to vector<8xf32>
    %90 = vector.shape_cast %89 : vector<8xf32> to vector<1x8xf32>
    %cst_29 = arith.constant 3.125000e-02 : f32
    %91 = vector.broadcast %cst_29 : f32 to vector<1x8xf32>
    %92 = arith.mulf %87, %91 : vector<1x8xf32>
    %cst_30 = arith.constant 3.125000e-02 : f32
    %93 = vector.broadcast %cst_30 : f32 to vector<1x8xf32>
    %94 = arith.mulf %90, %93 : vector<1x8xf32>
    %95 = arith.mulf %92, %92 : vector<1x8xf32>
    %96 = arith.subf %94, %95 : vector<1x8xf32>
    %cst_31 = arith.constant 0.000000e+00 : f32
    %97 = vector.broadcast %cst_31 : f32 to vector<1x8xf32>
    %98 = arith.maximumf %96, %97 : vector<1x8xf32>
    %99 = vector.broadcast %92 : vector<1x8xf32> to vector<32x8xf32>
    %100 = arith.subf %85, %99 : vector<32x8xf32>
    %cst_32 = arith.constant 9.99999974E-6 : f32
    %101 = vector.broadcast %cst_32 : f32 to vector<1x8xf32>
    %102 = arith.addf %98, %101 : vector<1x8xf32>
    %103 = math.rsqrt %102 : vector<1x8xf32>
    %104 = vector.broadcast %103 : vector<1x8xf32> to vector<32x8xf32>
    %105 = arith.mulf %100, %104 : vector<32x8xf32>
    %cst_33 = arith.constant 0.000000e+00 : f32
    %106 = vector.broadcast %cst_33 : f32 to vector<32x8xf32>
    %107 = arith.maximumf %105, %106 : vector<32x8xf32>
    %c0_34 = arith.constant 0 : index
    %c0_35 = arith.constant 0 : index
    %108 = vector.load %arg4[%c0_34, %c0_35] : memref<32x9xf32, #tpu.memory_space<vmem>>, vector<32x9xf32>
    %cst_36 = arith.constant 0.000000e+00 : f32
    %109 = vector.broadcast %cst_36 : f32 to vector<5x8xf32>
    %110 = tpu.concatenate %109, %107, %109 in 0 : vector<5x8xf32>, vector<32x8xf32>, vector<5x8xf32> -> vector<42x8xf32>
    %111 = vector.extract_strided_slice %110 {offsets = [0, 0], sizes = [32, 8], strides = [1, 1]} : vector<42x8xf32> to vector<32x8xf32>
    %112 = vector.extract_strided_slice %108 {offsets = [0, 0], sizes = [32, 1], strides = [1, 1]} : vector<32x9xf32> to vector<32x1xf32>
    %113 = vector.extract_strided_slice %110 {offsets = [1, 0], sizes = [32, 8], strides = [1, 1]} : vector<42x8xf32> to vector<32x8xf32>
    %114 = vector.extract_strided_slice %108 {offsets = [0, 1], sizes = [32, 1], strides = [1, 1]} : vector<32x9xf32> to vector<32x1xf32>
    %115 = vector.extract_strided_slice %110 {offsets = [2, 0], sizes = [32, 8], strides = [1, 1]} : vector<42x8xf32> to vector<32x8xf32>
    %116 = vector.extract_strided_slice %108 {offsets = [0, 2], sizes = [32, 1], strides = [1, 1]} : vector<32x9xf32> to vector<32x1xf32>
    %117 = vector.extract_strided_slice %110 {offsets = [4, 0], sizes = [32, 8], strides = [1, 1]} : vector<42x8xf32> to vector<32x8xf32>
    %118 = vector.extract_strided_slice %108 {offsets = [0, 3], sizes = [32, 1], strides = [1, 1]} : vector<32x9xf32> to vector<32x1xf32>
    %119 = vector.extract_strided_slice %110 {offsets = [5, 0], sizes = [32, 8], strides = [1, 1]} : vector<42x8xf32> to vector<32x8xf32>
    %120 = vector.extract_strided_slice %108 {offsets = [0, 4], sizes = [32, 1], strides = [1, 1]} : vector<32x9xf32> to vector<32x1xf32>
    %121 = vector.extract_strided_slice %110 {offsets = [6, 0], sizes = [32, 8], strides = [1, 1]} : vector<42x8xf32> to vector<32x8xf32>
    %122 = vector.extract_strided_slice %108 {offsets = [0, 5], sizes = [32, 1], strides = [1, 1]} : vector<32x9xf32> to vector<32x1xf32>
    %123 = vector.extract_strided_slice %110 {offsets = [8, 0], sizes = [32, 8], strides = [1, 1]} : vector<42x8xf32> to vector<32x8xf32>
    %124 = vector.extract_strided_slice %108 {offsets = [0, 6], sizes = [32, 1], strides = [1, 1]} : vector<32x9xf32> to vector<32x1xf32>
    %125 = vector.extract_strided_slice %110 {offsets = [9, 0], sizes = [32, 8], strides = [1, 1]} : vector<42x8xf32> to vector<32x8xf32>
    %126 = vector.extract_strided_slice %108 {offsets = [0, 7], sizes = [32, 1], strides = [1, 1]} : vector<32x9xf32> to vector<32x1xf32>
    %127 = vector.extract_strided_slice %110 {offsets = [10, 0], sizes = [32, 8], strides = [1, 1]} : vector<42x8xf32> to vector<32x8xf32>
    %128 = vector.extract_strided_slice %108 {offsets = [0, 8], sizes = [32, 1], strides = [1, 1]} : vector<32x9xf32> to vector<32x1xf32>
    %129 = vector.broadcast %112 : vector<32x1xf32> to vector<32x8xf32>
    %130 = arith.mulf %111, %129 : vector<32x8xf32>
    %131 = vector.broadcast %114 : vector<32x1xf32> to vector<32x8xf32>
    %132 = arith.mulf %113, %131 : vector<32x8xf32>
    %133 = vector.broadcast %116 : vector<32x1xf32> to vector<32x8xf32>
    %134 = arith.mulf %115, %133 : vector<32x8xf32>
    %135 = vector.broadcast %118 : vector<32x1xf32> to vector<32x8xf32>
    %136 = arith.mulf %117, %135 : vector<32x8xf32>
    %137 = vector.broadcast %120 : vector<32x1xf32> to vector<32x8xf32>
    %138 = arith.mulf %119, %137 : vector<32x8xf32>
    %139 = vector.broadcast %122 : vector<32x1xf32> to vector<32x8xf32>
    %140 = arith.mulf %121, %139 : vector<32x8xf32>
    %141 = vector.broadcast %124 : vector<32x1xf32> to vector<32x8xf32>
    %142 = arith.mulf %123, %141 : vector<32x8xf32>
    %143 = vector.broadcast %126 : vector<32x1xf32> to vector<32x8xf32>
    %144 = arith.mulf %125, %143 : vector<32x8xf32>
    %145 = vector.broadcast %128 : vector<32x1xf32> to vector<32x8xf32>
    %146 = arith.mulf %127, %145 : vector<32x8xf32>
    %147 = tpu.concatenate %130, %132, %134, %136, %138, %140, %142, %144, %146 in 1 : vector<32x8xf32>, vector<32x8xf32>, vector<32x8xf32>, vector<32x8xf32>, vector<32x8xf32>, vector<32x8xf32>, vector<32x8xf32>, vector<32x8xf32>, vector<32x8xf32> -> vector<32x72xf32>
    %c0_37 = arith.constant 0 : index
    %c0_38 = arith.constant 0 : index
    %148 = vector.load %arg5[%c0_37, %c0_38] : memref<72x8xbf16, #tpu.memory_space<vmem>>, vector<72x8xbf16>
    %149 = arith.truncf %147 : vector<32x72xf32> to vector<32x72xbf16>
    %cst_39 = arith.constant dense<0.000000e+00> : vector<32x8xf32>
    %150 = tpu.matmul %149, %148, %cst_39 {dimension_numbers = #tpu.dot_dimension_numbers<[1], [0], [0], [1], [0, 0, 1, 1], [], []>} : vector<32x72xbf16>, vector<72x8xbf16>, vector<32x8xf32> -> vector<32x8xf32>
    %cst_40 = arith.constant dense<0.000000e+00> : vector<8xf32>
    %151 = vector.multi_reduction <add>, %150, %cst_40 [0] : vector<32x8xf32> to vector<8xf32>
    %152 = vector.shape_cast %151 : vector<8xf32> to vector<1x8xf32>
    %153 = arith.mulf %150, %150 : vector<32x8xf32>
    %cst_41 = arith.constant dense<0.000000e+00> : vector<8xf32>
    %154 = vector.multi_reduction <add>, %153, %cst_41 [0] : vector<32x8xf32> to vector<8xf32>
    %155 = vector.shape_cast %154 : vector<8xf32> to vector<1x8xf32>
    %cst_42 = arith.constant 3.125000e-02 : f32
    %156 = vector.broadcast %cst_42 : f32 to vector<1x8xf32>
    %157 = arith.mulf %152, %156 : vector<1x8xf32>
    %cst_43 = arith.constant 3.125000e-02 : f32
    %158 = vector.broadcast %cst_43 : f32 to vector<1x8xf32>
    %159 = arith.mulf %155, %158 : vector<1x8xf32>
    %160 = arith.mulf %157, %157 : vector<1x8xf32>
    %161 = arith.subf %159, %160 : vector<1x8xf32>
    %cst_44 = arith.constant 0.000000e+00 : f32
    %162 = vector.broadcast %cst_44 : f32 to vector<1x8xf32>
    %163 = arith.maximumf %161, %162 : vector<1x8xf32>
    %164 = vector.broadcast %157 : vector<1x8xf32> to vector<32x8xf32>
    %165 = arith.subf %150, %164 : vector<32x8xf32>
    %cst_45 = arith.constant 9.99999974E-6 : f32
    %166 = vector.broadcast %cst_45 : f32 to vector<1x8xf32>
    %167 = arith.addf %163, %166 : vector<1x8xf32>
    %168 = math.rsqrt %167 : vector<1x8xf32>
    %169 = vector.broadcast %168 : vector<1x8xf32> to vector<32x8xf32>
    %170 = arith.mulf %165, %169 : vector<32x8xf32>
    %cst_46 = arith.constant 0.000000e+00 : f32
    %171 = vector.broadcast %cst_46 : f32 to vector<32x8xf32>
    %172 = arith.maximumf %170, %171 : vector<32x8xf32>
    %c0_47 = arith.constant 0 : index
    %c0_48 = arith.constant 0 : index
    %173 = vector.load %arg6[%c0_47, %c0_48] : memref<8x8xbf16, #tpu.memory_space<vmem>>, vector<8x8xbf16>
    %174 = arith.truncf %172 : vector<32x8xf32> to vector<32x8xbf16>
    %cst_49 = arith.constant dense<0.000000e+00> : vector<32x8xf32>
    %175 = tpu.matmul %174, %173, %cst_49 {dimension_numbers = #tpu.dot_dimension_numbers<[1], [0], [0], [1], [0, 0, 1, 1], [], []>} : vector<32x8xbf16>, vector<8x8xbf16>, vector<32x8xf32> -> vector<32x8xf32>
    %cst_50 = arith.constant dense<0.000000e+00> : vector<8xf32>
    %176 = vector.multi_reduction <add>, %175, %cst_50 [0] : vector<32x8xf32> to vector<8xf32>
    %177 = vector.shape_cast %176 : vector<8xf32> to vector<1x8xf32>
    %178 = arith.mulf %175, %175 : vector<32x8xf32>
    %cst_51 = arith.constant dense<0.000000e+00> : vector<8xf32>
    %179 = vector.multi_reduction <add>, %178, %cst_51 [0] : vector<32x8xf32> to vector<8xf32>
    %180 = vector.shape_cast %179 : vector<8xf32> to vector<1x8xf32>
    %cst_52 = arith.constant 3.125000e-02 : f32
    %181 = vector.broadcast %cst_52 : f32 to vector<1x8xf32>
    %182 = arith.mulf %177, %181 : vector<1x8xf32>
    %cst_53 = arith.constant 3.125000e-02 : f32
    %183 = vector.broadcast %cst_53 : f32 to vector<1x8xf32>
    %184 = arith.mulf %180, %183 : vector<1x8xf32>
    %185 = arith.mulf %182, %182 : vector<1x8xf32>
    %186 = arith.subf %184, %185 : vector<1x8xf32>
    %cst_54 = arith.constant 0.000000e+00 : f32
    %187 = vector.broadcast %cst_54 : f32 to vector<1x8xf32>
    %188 = arith.maximumf %186, %187 : vector<1x8xf32>
    %189 = vector.broadcast %182 : vector<1x8xf32> to vector<32x8xf32>
    %190 = arith.subf %175, %189 : vector<32x8xf32>
    %cst_55 = arith.constant 9.99999974E-6 : f32
    %191 = vector.broadcast %cst_55 : f32 to vector<1x8xf32>
    %192 = arith.addf %188, %191 : vector<1x8xf32>
    %193 = math.rsqrt %192 : vector<1x8xf32>
    %194 = vector.broadcast %193 : vector<1x8xf32> to vector<32x8xf32>
    %195 = arith.mulf %190, %194 : vector<32x8xf32>
    %c0_56 = arith.constant 0 : index
    %c0_57 = arith.constant 0 : index
    %196 = vector.load %arg7[%c0_56, %c0_57] : memref<3x8xbf16, #tpu.memory_space<vmem>>, vector<3x8xbf16>
    %197 = arith.truncf %82 : vector<32x3xf32> to vector<32x3xbf16>
    %cst_58 = arith.constant dense<0.000000e+00> : vector<32x8xf32>
    %198 = tpu.matmul %197, %196, %cst_58 {dimension_numbers = #tpu.dot_dimension_numbers<[1], [0], [0], [1], [0, 0, 1, 1], [], []>} : vector<32x3xbf16>, vector<3x8xbf16>, vector<32x8xf32> -> vector<32x8xf32>
    %cst_59 = arith.constant dense<0.000000e+00> : vector<8xf32>
    %199 = vector.multi_reduction <add>, %198, %cst_59 [0] : vector<32x8xf32> to vector<8xf32>
    %200 = vector.shape_cast %199 : vector<8xf32> to vector<1x8xf32>
    %201 = arith.mulf %198, %198 : vector<32x8xf32>
    %cst_60 = arith.constant dense<0.000000e+00> : vector<8xf32>
    %202 = vector.multi_reduction <add>, %201, %cst_60 [0] : vector<32x8xf32> to vector<8xf32>
    %203 = vector.shape_cast %202 : vector<8xf32> to vector<1x8xf32>
    %cst_61 = arith.constant 3.125000e-02 : f32
    %204 = vector.broadcast %cst_61 : f32 to vector<1x8xf32>
    %205 = arith.mulf %200, %204 : vector<1x8xf32>
    %cst_62 = arith.constant 3.125000e-02 : f32
    %206 = vector.broadcast %cst_62 : f32 to vector<1x8xf32>
    %207 = arith.mulf %203, %206 : vector<1x8xf32>
    %208 = arith.mulf %205, %205 : vector<1x8xf32>
    %209 = arith.subf %207, %208 : vector<1x8xf32>
    %cst_63 = arith.constant 0.000000e+00 : f32
    %210 = vector.broadcast %cst_63 : f32 to vector<1x8xf32>
    %211 = arith.maximumf %209, %210 : vector<1x8xf32>
    %212 = vector.broadcast %205 : vector<1x8xf32> to vector<32x8xf32>
    %213 = arith.subf %198, %212 : vector<32x8xf32>
    %cst_64 = arith.constant 9.99999974E-6 : f32
    %214 = vector.broadcast %cst_64 : f32 to vector<1x8xf32>
    %215 = arith.addf %211, %214 : vector<1x8xf32>
    %216 = math.rsqrt %215 : vector<1x8xf32>
    %217 = vector.broadcast %216 : vector<1x8xf32> to vector<32x8xf32>
    %218 = arith.mulf %213, %217 : vector<32x8xf32>
    %219 = arith.addf %195, %218 : vector<32x8xf32>
    %cst_65 = arith.constant 0.000000e+00 : f32
    %220 = vector.broadcast %cst_65 : f32 to vector<32x8xf32>
    %221 = arith.maximumf %219, %220 : vector<32x8xf32>
    %c0_66 = arith.constant 0 : index
    %c0_67 = arith.constant 0 : index
    %222 = vector.load %arg4[%c0_66, %c0_67] : memref<32x9xf32, #tpu.memory_space<vmem>>, vector<32x9xf32>
    %cst_68 = arith.constant 0.000000e+00 : f32
    %223 = vector.broadcast %cst_68 : f32 to vector<5x8xf32>
    %224 = tpu.concatenate %223, %221, %223 in 0 : vector<5x8xf32>, vector<32x8xf32>, vector<5x8xf32> -> vector<42x8xf32>
    %225 = vector.extract_strided_slice %224 {offsets = [0, 0], sizes = [32, 8], strides = [1, 1]} : vector<42x8xf32> to vector<32x8xf32>
    %226 = vector.extract_strided_slice %222 {offsets = [0, 0], sizes = [32, 1], strides = [1, 1]} : vector<32x9xf32> to vector<32x1xf32>
    %227 = vector.extract_strided_slice %224 {offsets = [1, 0], sizes = [32, 8], strides = [1, 1]} : vector<42x8xf32> to vector<32x8xf32>
    %228 = vector.extract_strided_slice %222 {offsets = [0, 1], sizes = [32, 1], strides = [1, 1]} : vector<32x9xf32> to vector<32x1xf32>
    %229 = vector.extract_strided_slice %224 {offsets = [2, 0], sizes = [32, 8], strides = [1, 1]} : vector<42x8xf32> to vector<32x8xf32>
    %230 = vector.extract_strided_slice %222 {offsets = [0, 2], sizes = [32, 1], strides = [1, 1]} : vector<32x9xf32> to vector<32x1xf32>
    %231 = vector.extract_strided_slice %224 {offsets = [4, 0], sizes = [32, 8], strides = [1, 1]} : vector<42x8xf32> to vector<32x8xf32>
    %232 = vector.extract_strided_slice %222 {offsets = [0, 3], sizes = [32, 1], strides = [1, 1]} : vector<32x9xf32> to vector<32x1xf32>
    %233 = vector.extract_strided_slice %224 {offsets = [5, 0], sizes = [32, 8], strides = [1, 1]} : vector<42x8xf32> to vector<32x8xf32>
    %234 = vector.extract_strided_slice %222 {offsets = [0, 4], sizes = [32, 1], strides = [1, 1]} : vector<32x9xf32> to vector<32x1xf32>
    %235 = vector.extract_strided_slice %224 {offsets = [6, 0], sizes = [32, 8], strides = [1, 1]} : vector<42x8xf32> to vector<32x8xf32>
    %236 = vector.extract_strided_slice %222 {offsets = [0, 5], sizes = [32, 1], strides = [1, 1]} : vector<32x9xf32> to vector<32x1xf32>
    %237 = vector.extract_strided_slice %224 {offsets = [8, 0], sizes = [32, 8], strides = [1, 1]} : vector<42x8xf32> to vector<32x8xf32>
    %238 = vector.extract_strided_slice %222 {offsets = [0, 6], sizes = [32, 1], strides = [1, 1]} : vector<32x9xf32> to vector<32x1xf32>
    %239 = vector.extract_strided_slice %224 {offsets = [9, 0], sizes = [32, 8], strides = [1, 1]} : vector<42x8xf32> to vector<32x8xf32>
    %240 = vector.extract_strided_slice %222 {offsets = [0, 7], sizes = [32, 1], strides = [1, 1]} : vector<32x9xf32> to vector<32x1xf32>
    %241 = vector.extract_strided_slice %224 {offsets = [10, 0], sizes = [32, 8], strides = [1, 1]} : vector<42x8xf32> to vector<32x8xf32>
    %242 = vector.extract_strided_slice %222 {offsets = [0, 8], sizes = [32, 1], strides = [1, 1]} : vector<32x9xf32> to vector<32x1xf32>
    %243 = vector.broadcast %226 : vector<32x1xf32> to vector<32x8xf32>
    %244 = arith.mulf %225, %243 : vector<32x8xf32>
    %245 = vector.broadcast %228 : vector<32x1xf32> to vector<32x8xf32>
    %246 = arith.mulf %227, %245 : vector<32x8xf32>
    %247 = arith.maximumf %244, %246 : vector<32x8xf32>
    %248 = vector.broadcast %230 : vector<32x1xf32> to vector<32x8xf32>
    %249 = arith.mulf %229, %248 : vector<32x8xf32>
    %250 = arith.maximumf %247, %249 : vector<32x8xf32>
    %251 = vector.broadcast %232 : vector<32x1xf32> to vector<32x8xf32>
    %252 = arith.mulf %231, %251 : vector<32x8xf32>
    %253 = arith.maximumf %250, %252 : vector<32x8xf32>
    %254 = vector.broadcast %234 : vector<32x1xf32> to vector<32x8xf32>
    %255 = arith.mulf %233, %254 : vector<32x8xf32>
    %256 = arith.maximumf %253, %255 : vector<32x8xf32>
    %257 = vector.broadcast %236 : vector<32x1xf32> to vector<32x8xf32>
    %258 = arith.mulf %235, %257 : vector<32x8xf32>
    %259 = arith.maximumf %256, %258 : vector<32x8xf32>
    %260 = vector.broadcast %238 : vector<32x1xf32> to vector<32x8xf32>
    %261 = arith.mulf %237, %260 : vector<32x8xf32>
    %262 = arith.maximumf %259, %261 : vector<32x8xf32>
    %263 = vector.broadcast %240 : vector<32x1xf32> to vector<32x8xf32>
    %264 = arith.mulf %239, %263 : vector<32x8xf32>
    %265 = arith.maximumf %262, %264 : vector<32x8xf32>
    %266 = vector.broadcast %242 : vector<32x1xf32> to vector<32x8xf32>
    %267 = arith.mulf %241, %266 : vector<32x8xf32>
    %268 = arith.maximumf %265, %267 : vector<32x8xf32>
    %c0_69 = arith.constant 0 : index
    %c0_70 = arith.constant 0 : index
    %269 = vector.load %arg16[%c0_69, %c0_70] : memref<128x8xf32, #tpu.memory_space<vmem>>, vector<32x8xf32>
    tpu.vector_store %arg16[%c0_69, %c0_70], %268 {strides = array<i32>} : memref<128x8xf32, #tpu.memory_space<vmem>>, vector<32x8xf32>,
    %c0_71 = arith.constant 0 : index
    %c0_72 = arith.constant 0 : index
    %270 = tpu.strided_load %arg16[%c0_71, %c0_72] {strides = array<i32: 2, 1>} : memref<128x8xf32, #tpu.memory_space<vmem>>, vector<2x8xf32>
    %c8 = arith.constant 8 : index
    %c0_73 = arith.constant 0 : index
    %271 = tpu.strided_load %arg16[%c8, %c0_73] {strides = array<i32: 2, 1>} : memref<128x8xf32, #tpu.memory_space<vmem>>, vector<2x8xf32>
    %c16_74 = arith.constant 16 : index
    %c0_75 = arith.constant 0 : index
    %272 = tpu.strided_load %arg16[%c16_74, %c0_75] {strides = array<i32: 2, 1>} : memref<128x8xf32, #tpu.memory_space<vmem>>, vector<2x8xf32>
    %c24 = arith.constant 24 : index
    %c0_76 = arith.constant 0 : index
    %273 = tpu.strided_load %arg16[%c24, %c0_76] {strides = array<i32: 2, 1>} : memref<128x8xf32, #tpu.memory_space<vmem>>, vector<2x8xf32>
    %274 = tpu.concatenate %270, %271, %272, %273 in 0 : vector<2x8xf32>, vector<2x8xf32>, vector<2x8xf32>, vector<2x8xf32> -> vector<8x8xf32>
    %cst_77 = arith.constant dense<0.000000e+00> : vector<8xf32>
    %275 = vector.multi_reduction <add>, %274, %cst_77 [0] : vector<8x8xf32> to vector<8xf32>
    %276 = vector.shape_cast %275 : vector<8xf32> to vector<1x8xf32>
    %277 = arith.mulf %274, %274 : vector<8x8xf32>
    %cst_78 = arith.constant dense<0.000000e+00> : vector<8xf32>
    %278 = vector.multi_reduction <add>, %277, %cst_78 [0] : vector<8x8xf32> to vector<8xf32>
    %279 = vector.shape_cast %278 : vector<8xf32> to vector<1x8xf32>
    %cst_79 = arith.constant 1.250000e-01 : f32
    %280 = vector.broadcast %cst_79 : f32 to vector<1x8xf32>
    %281 = arith.mulf %276, %280 : vector<1x8xf32>
    %cst_80 = arith.constant 1.250000e-01 : f32
    %282 = vector.broadcast %cst_80 : f32 to vector<1x8xf32>
    %283 = arith.mulf %279, %282 : vector<1x8xf32>
    %284 = arith.mulf %281, %281 : vector<1x8xf32>
    %285 = arith.subf %283, %284 : vector<1x8xf32>
    %cst_81 = arith.constant 0.000000e+00 : f32
    %286 = vector.broadcast %cst_81 : f32 to vector<1x8xf32>
    %287 = arith.maximumf %285, %286 : vector<1x8xf32>
    %288 = vector.broadcast %281 : vector<1x8xf32> to vector<8x8xf32>
    %289 = arith.subf %274, %288 : vector<8x8xf32>
    %cst_82 = arith.constant 9.99999974E-6 : f32
    %290 = vector.broadcast %cst_82 : f32 to vector<1x8xf32>
    %291 = arith.addf %287, %290 : vector<1x8xf32>
    %292 = math.rsqrt %291 : vector<1x8xf32>
    %293 = vector.broadcast %292 : vector<1x8xf32> to vector<8x8xf32>
    %294 = arith.mulf %289, %293 : vector<8x8xf32>
    %cst_83 = arith.constant 0.000000e+00 : f32
    %295 = vector.broadcast %cst_83 : f32 to vector<8x8xf32>
    %296 = arith.maximumf %294, %295 : vector<8x8xf32>
    %c0_84 = arith.constant 0 : index
    %c0_85 = arith.constant 0 : index
    %297 = vector.load %arg8[%c0_84, %c0_85] : memref<8x8xbf16, #tpu.memory_space<vmem>>, vector<8x8xbf16>
    %298 = arith.truncf %296 : vector<8x8xf32> to vector<8x8xbf16>
    %cst_86 = arith.constant dense<0.000000e+00> : vector<8x8xf32>
    %299 = tpu.matmul %298, %297, %cst_86 {dimension_numbers = #tpu.dot_dimension_numbers<[1], [0], [0], [1], [0, 0, 1, 1], [], []>} : vector<8x8xbf16>, vector<8x8xbf16>, vector<8x8xf32> -> vector<8x8xf32>
    %cst_87 = arith.constant dense<0.000000e+00> : vector<8xf32>
    %300 = vector.multi_reduction <add>, %299, %cst_87 [0] : vector<8x8xf32> to vector<8xf32>
    %301 = vector.shape_cast %300 : vector<8xf32> to vector<1x8xf32>
    %302 = arith.mulf %299, %299 : vector<8x8xf32>
    %cst_88 = arith.constant dense<0.000000e+00> : vector<8xf32>
    %303 = vector.multi_reduction <add>, %302, %cst_88 [0] : vector<8x8xf32> to vector<8xf32>
    %304 = vector.shape_cast %303 : vector<8xf32> to vector<1x8xf32>
    %cst_89 = arith.constant 1.250000e-01 : f32
    %305 = vector.broadcast %cst_89 : f32 to vector<1x8xf32>
    %306 = arith.mulf %301, %305 : vector<1x8xf32>
    %cst_90 = arith.constant 1.250000e-01 : f32
    %307 = vector.broadcast %cst_90 : f32 to vector<1x8xf32>
    %308 = arith.mulf %304, %307 : vector<1x8xf32>
    %309 = arith.mulf %306, %306 : vector<1x8xf32>
    %310 = arith.subf %308, %309 : vector<1x8xf32>
    %cst_91 = arith.constant 0.000000e+00 : f32
    %311 = vector.broadcast %cst_91 : f32 to vector<1x8xf32>
    %312 = arith.maximumf %310, %311 : vector<1x8xf32>
    %313 = vector.broadcast %306 : vector<1x8xf32> to vector<8x8xf32>
    %314 = arith.subf %299, %313 : vector<8x8xf32>
    %cst_92 = arith.constant 9.99999974E-6 : f32
    %315 = vector.broadcast %cst_92 : f32 to vector<1x8xf32>
    %316 = arith.addf %312, %315 : vector<1x8xf32>
    %317 = math.rsqrt %316 : vector<1x8xf32>
    %318 = vector.broadcast %317 : vector<1x8xf32> to vector<8x8xf32>
    %319 = arith.mulf %314, %318 : vector<8x8xf32>
    %cst_93 = arith.constant 0.000000e+00 : f32
    %320 = vector.broadcast %cst_93 : f32 to vector<8x8xf32>
    %321 = arith.maximumf %319, %320 : vector<8x8xf32>
    %c0_94 = arith.constant 0 : index
    %c0_95 = arith.constant 0 : index
    %322 = vector.load %arg9[%c0_94, %c0_95] : memref<8x9xf32, #tpu.memory_space<vmem>>, vector<8x9xf32>
    %cst_96 = arith.constant 0.000000e+00 : f32
    %323 = vector.broadcast %cst_96 : f32 to vector<3x8xf32>
    %324 = tpu.concatenate %323, %321, %323 in 0 : vector<3x8xf32>, vector<8x8xf32>, vector<3x8xf32> -> vector<14x8xf32>
    %325 = vector.extract_strided_slice %324 {offsets = [0, 0], sizes = [8, 8], strides = [1, 1]} : vector<14x8xf32> to vector<8x8xf32>
    %326 = vector.extract_strided_slice %322 {offsets = [0, 0], sizes = [8, 1], strides = [1, 1]} : vector<8x9xf32> to vector<8x1xf32>
    %327 = vector.extract_strided_slice %324 {offsets = [1, 0], sizes = [8, 8], strides = [1, 1]} : vector<14x8xf32> to vector<8x8xf32>
    %328 = vector.extract_strided_slice %322 {offsets = [0, 1], sizes = [8, 1], strides = [1, 1]} : vector<8x9xf32> to vector<8x1xf32>
    %329 = vector.extract_strided_slice %324 {offsets = [2, 0], sizes = [8, 8], strides = [1, 1]} : vector<14x8xf32> to vector<8x8xf32>
    %330 = vector.extract_strided_slice %322 {offsets = [0, 2], sizes = [8, 1], strides = [1, 1]} : vector<8x9xf32> to vector<8x1xf32>
    %331 = vector.extract_strided_slice %324 {offsets = [2, 0], sizes = [8, 8], strides = [1, 1]} : vector<14x8xf32> to vector<8x8xf32>
    %332 = vector.extract_strided_slice %322 {offsets = [0, 3], sizes = [8, 1], strides = [1, 1]} : vector<8x9xf32> to vector<8x1xf32>
    %333 = vector.extract_strided_slice %324 {offsets = [3, 0], sizes = [8, 8], strides = [1, 1]} : vector<14x8xf32> to vector<8x8xf32>
    %334 = vector.extract_strided_slice %322 {offsets = [0, 4], sizes = [8, 1], strides = [1, 1]} : vector<8x9xf32> to vector<8x1xf32>
    %335 = vector.extract_strided_slice %324 {offsets = [4, 0], sizes = [8, 8], strides = [1, 1]} : vector<14x8xf32> to vector<8x8xf32>
    %336 = vector.extract_strided_slice %322 {offsets = [0, 5], sizes = [8, 1], strides = [1, 1]} : vector<8x9xf32> to vector<8x1xf32>
    %337 = vector.extract_strided_slice %324 {offsets = [4, 0], sizes = [8, 8], strides = [1, 1]} : vector<14x8xf32> to vector<8x8xf32>
    %338 = vector.extract_strided_slice %322 {offsets = [0, 6], sizes = [8, 1], strides = [1, 1]} : vector<8x9xf32> to vector<8x1xf32>
    %339 = vector.extract_strided_slice %324 {offsets = [5, 0], sizes = [8, 8], strides = [1, 1]} : vector<14x8xf32> to vector<8x8xf32>
    %340 = vector.extract_strided_slice %322 {offsets = [0, 7], sizes = [8, 1], strides = [1, 1]} : vector<8x9xf32> to vector<8x1xf32>
    %341 = vector.extract_strided_slice %324 {offsets = [6, 0], sizes = [8, 8], strides = [1, 1]} : vector<14x8xf32> to vector<8x8xf32>
    %342 = vector.extract_strided_slice %322 {offsets = [0, 8], sizes = [8, 1], strides = [1, 1]} : vector<8x9xf32> to vector<8x1xf32>
    %343 = vector.broadcast %326 : vector<8x1xf32> to vector<8x8xf32>
    %344 = arith.mulf %325, %343 : vector<8x8xf32>
    %345 = vector.broadcast %328 : vector<8x1xf32> to vector<8x8xf32>
    %346 = arith.mulf %327, %345 : vector<8x8xf32>
    %347 = vector.broadcast %330 : vector<8x1xf32> to vector<8x8xf32>
    %348 = arith.mulf %329, %347 : vector<8x8xf32>
    %349 = vector.broadcast %332 : vector<8x1xf32> to vector<8x8xf32>
    %350 = arith.mulf %331, %349 : vector<8x8xf32>
    %351 = vector.broadcast %334 : vector<8x1xf32> to vector<8x8xf32>
    %352 = arith.mulf %333, %351 : vector<8x8xf32>
    %353 = vector.broadcast %336 : vector<8x1xf32> to vector<8x8xf32>
    %354 = arith.mulf %335, %353 : vector<8x8xf32>
    %355 = vector.broadcast %338 : vector<8x1xf32> to vector<8x8xf32>
    %356 = arith.mulf %337, %355 : vector<8x8xf32>
    %357 = vector.broadcast %340 : vector<8x1xf32> to vector<8x8xf32>
    %358 = arith.mulf %339, %357 : vector<8x8xf32>
    %359 = vector.broadcast %342 : vector<8x1xf32> to vector<8x8xf32>
    %360 = arith.mulf %341, %359 : vector<8x8xf32>
    %361 = tpu.concatenate %344, %346, %348, %350, %352, %354, %356, %358, %360 in 1 : vector<8x8xf32>, vector<8x8xf32>, vector<8x8xf32>, vector<8x8xf32>, vector<8x8xf32>, vector<8x8xf32>, vector<8x8xf32>, vector<8x8xf32>, vector<8x8xf32> -> vector<8x72xf32>
    %c0_97 = arith.constant 0 : index
    %c0_98 = arith.constant 0 : index
    %362 = vector.load %arg10[%c0_97, %c0_98] : memref<72x2xbf16, #tpu.memory_space<vmem>>, vector<72x2xbf16>
    %363 = arith.truncf %361 : vector<8x72xf32> to vector<8x72xbf16>
    %cst_99 = arith.constant dense<0.000000e+00> : vector<8x2xf32>
    %364 = tpu.matmul %363, %362, %cst_99 {dimension_numbers = #tpu.dot_dimension_numbers<[1], [0], [0], [1], [0, 0, 1, 1], [], []>} : vector<8x72xbf16>, vector<72x2xbf16>, vector<8x2xf32> -> vector<8x2xf32>
    %365 = tpu.concatenate %274, %364 in 1 : vector<8x8xf32>, vector<8x2xf32> -> vector<8x10xf32>
    %cst_100 = arith.constant dense<0.000000e+00> : vector<10xf32>
    %366 = vector.multi_reduction <add>, %365, %cst_100 [0] : vector<8x10xf32> to vector<10xf32>
    %367 = vector.shape_cast %366 : vector<10xf32> to vector<1x10xf32>
    %368 = arith.mulf %365, %365 : vector<8x10xf32>
    %cst_101 = arith.constant dense<0.000000e+00> : vector<10xf32>
    %369 = vector.multi_reduction <add>, %368, %cst_101 [0] : vector<8x10xf32> to vector<10xf32>
    %370 = vector.shape_cast %369 : vector<10xf32> to vector<1x10xf32>
    %cst_102 = arith.constant 1.250000e-01 : f32
    %371 = vector.broadcast %cst_102 : f32 to vector<1x10xf32>
    %372 = arith.mulf %367, %371 : vector<1x10xf32>
    %cst_103 = arith.constant 1.250000e-01 : f32
    %373 = vector.broadcast %cst_103 : f32 to vector<1x10xf32>
    %374 = arith.mulf %370, %373 : vector<1x10xf32>
    %375 = arith.mulf %372, %372 : vector<1x10xf32>
    %376 = arith.subf %374, %375 : vector<1x10xf32>
    %cst_104 = arith.constant 0.000000e+00 : f32
    %377 = vector.broadcast %cst_104 : f32 to vector<1x10xf32>
    %378 = arith.maximumf %376, %377 : vector<1x10xf32>
    %379 = vector.broadcast %372 : vector<1x10xf32> to vector<8x10xf32>
    %380 = arith.subf %365, %379 : vector<8x10xf32>
    %cst_105 = arith.constant 9.99999974E-6 : f32
    %381 = vector.broadcast %cst_105 : f32 to vector<1x10xf32>
    %382 = arith.addf %378, %381 : vector<1x10xf32>
    %383 = math.rsqrt %382 : vector<1x10xf32>
    %384 = vector.broadcast %383 : vector<1x10xf32> to vector<8x10xf32>
    %385 = arith.mulf %380, %384 : vector<8x10xf32>
    %cst_106 = arith.constant 0.000000e+00 : f32
    %386 = vector.broadcast %cst_106 : f32 to vector<8x10xf32>
    %387 = arith.maximumf %385, %386 : vector<8x10xf32>
    %c0_107 = arith.constant 0 : index
    %c0_108 = arith.constant 0 : index
    %388 = vector.load %arg11[%c0_107, %c0_108] : memref<10x8xbf16, #tpu.memory_space<vmem>>, vector<10x8xbf16>
    %389 = arith.truncf %387 : vector<8x10xf32> to vector<8x10xbf16>
    %cst_109 = arith.constant dense<0.000000e+00> : vector<8x8xf32>
    %390 = tpu.matmul %389, %388, %cst_109 {dimension_numbers = #tpu.dot_dimension_numbers<[1], [0], [0], [1], [0, 0, 1, 1], [], []>} : vector<8x10xbf16>, vector<10x8xbf16>, vector<8x8xf32> -> vector<8x8xf32>
    %cst_110 = arith.constant dense<0.000000e+00> : vector<8xf32>
    %391 = vector.multi_reduction <add>, %390, %cst_110 [0] : vector<8x8xf32> to vector<8xf32>
    %392 = vector.shape_cast %391 : vector<8xf32> to vector<1x8xf32>
    %393 = arith.mulf %390, %390 : vector<8x8xf32>
    %cst_111 = arith.constant dense<0.000000e+00> : vector<8xf32>
    %394 = vector.multi_reduction <add>, %393, %cst_111 [0] : vector<8x8xf32> to vector<8xf32>
    %395 = vector.shape_cast %394 : vector<8xf32> to vector<1x8xf32>
    %cst_112 = arith.constant 1.250000e-01 : f32
    %396 = vector.broadcast %cst_112 : f32 to vector<1x8xf32>
    %397 = arith.mulf %392, %396 : vector<1x8xf32>
    %cst_113 = arith.constant 1.250000e-01 : f32
    %398 = vector.broadcast %cst_113 : f32 to vector<1x8xf32>
    %399 = arith.mulf %395, %398 : vector<1x8xf32>
    %400 = arith.mulf %397, %397 : vector<1x8xf32>
    %401 = arith.subf %399, %400 : vector<1x8xf32>
    %cst_114 = arith.constant 0.000000e+00 : f32
    %402 = vector.broadcast %cst_114 : f32 to vector<1x8xf32>
    %403 = arith.maximumf %401, %402 : vector<1x8xf32>
    %404 = vector.broadcast %397 : vector<1x8xf32> to vector<8x8xf32>
    %405 = arith.subf %390, %404 : vector<8x8xf32>
    %cst_115 = arith.constant 9.99999974E-6 : f32
    %406 = vector.broadcast %cst_115 : f32 to vector<1x8xf32>
    %407 = arith.addf %403, %406 : vector<1x8xf32>
    %408 = math.rsqrt %407 : vector<1x8xf32>
    %409 = vector.broadcast %408 : vector<1x8xf32> to vector<8x8xf32>
    %410 = arith.mulf %405, %409 : vector<8x8xf32>
    %cst_116 = arith.constant 0.000000e+00 : f32
    %411 = vector.broadcast %cst_116 : f32 to vector<8x8xf32>
    %412 = arith.maximumf %410, %411 : vector<8x8xf32>
    %c0_117 = arith.constant 0 : index
    %c0_118 = arith.constant 0 : index
    %413 = vector.load %arg9[%c0_117, %c0_118] : memref<8x9xf32, #tpu.memory_space<vmem>>, vector<8x9xf32>
    %cst_119 = arith.constant 0.000000e+00 : f32
    %414 = vector.broadcast %cst_119 : f32 to vector<3x8xf32>
    %415 = tpu.concatenate %414, %412, %414 in 0 : vector<3x8xf32>, vector<8x8xf32>, vector<3x8xf32> -> vector<14x8xf32>
    %416 = vector.extract_strided_slice %415 {offsets = [0, 0], sizes = [8, 8], strides = [1, 1]} : vector<14x8xf32> to vector<8x8xf32>
    %417 = vector.extract_strided_slice %413 {offsets = [0, 0], sizes = [8, 1], strides = [1, 1]} : vector<8x9xf32> to vector<8x1xf32>
    %418 = vector.extract_strided_slice %415 {offsets = [1, 0], sizes = [8, 8], strides = [1, 1]} : vector<14x8xf32> to vector<8x8xf32>
    %419 = vector.extract_strided_slice %413 {offsets = [0, 1], sizes = [8, 1], strides = [1, 1]} : vector<8x9xf32> to vector<8x1xf32>
    %420 = vector.extract_strided_slice %415 {offsets = [2, 0], sizes = [8, 8], strides = [1, 1]} : vector<14x8xf32> to vector<8x8xf32>
    %421 = vector.extract_strided_slice %413 {offsets = [0, 2], sizes = [8, 1], strides = [1, 1]} : vector<8x9xf32> to vector<8x1xf32>
    %422 = vector.extract_strided_slice %415 {offsets = [2, 0], sizes = [8, 8], strides = [1, 1]} : vector<14x8xf32> to vector<8x8xf32>
    %423 = vector.extract_strided_slice %413 {offsets = [0, 3], sizes = [8, 1], strides = [1, 1]} : vector<8x9xf32> to vector<8x1xf32>
    %424 = vector.extract_strided_slice %415 {offsets = [3, 0], sizes = [8, 8], strides = [1, 1]} : vector<14x8xf32> to vector<8x8xf32>
    %425 = vector.extract_strided_slice %413 {offsets = [0, 4], sizes = [8, 1], strides = [1, 1]} : vector<8x9xf32> to vector<8x1xf32>
    %426 = vector.extract_strided_slice %415 {offsets = [4, 0], sizes = [8, 8], strides = [1, 1]} : vector<14x8xf32> to vector<8x8xf32>
    %427 = vector.extract_strided_slice %413 {offsets = [0, 5], sizes = [8, 1], strides = [1, 1]} : vector<8x9xf32> to vector<8x1xf32>
    %428 = vector.extract_strided_slice %415 {offsets = [4, 0], sizes = [8, 8], strides = [1, 1]} : vector<14x8xf32> to vector<8x8xf32>
    %429 = vector.extract_strided_slice %413 {offsets = [0, 6], sizes = [8, 1], strides = [1, 1]} : vector<8x9xf32> to vector<8x1xf32>
    %430 = vector.extract_strided_slice %415 {offsets = [5, 0], sizes = [8, 8], strides = [1, 1]} : vector<14x8xf32> to vector<8x8xf32>
    %431 = vector.extract_strided_slice %413 {offsets = [0, 7], sizes = [8, 1], strides = [1, 1]} : vector<8x9xf32> to vector<8x1xf32>
    %432 = vector.extract_strided_slice %415 {offsets = [6, 0], sizes = [8, 8], strides = [1, 1]} : vector<14x8xf32> to vector<8x8xf32>
    %433 = vector.extract_strided_slice %413 {offsets = [0, 8], sizes = [8, 1], strides = [1, 1]} : vector<8x9xf32> to vector<8x1xf32>
    %434 = vector.broadcast %417 : vector<8x1xf32> to vector<8x8xf32>
    %435 = arith.mulf %416, %434 : vector<8x8xf32>
    %436 = vector.broadcast %419 : vector<8x1xf32> to vector<8x8xf32>
    %437 = arith.mulf %418, %436 : vector<8x8xf32>
    %438 = vector.broadcast %421 : vector<8x1xf32> to vector<8x8xf32>
    %439 = arith.mulf %420, %438 : vector<8x8xf32>
    %440 = vector.broadcast %423 : vector<8x1xf32> to vector<8x8xf32>
    %441 = arith.mulf %422, %440 : vector<8x8xf32>
    %442 = vector.broadcast %425 : vector<8x1xf32> to vector<8x8xf32>
    %443 = arith.mulf %424, %442 : vector<8x8xf32>
    %444 = vector.broadcast %427 : vector<8x1xf32> to vector<8x8xf32>
    %445 = arith.mulf %426, %444 : vector<8x8xf32>
    %446 = vector.broadcast %429 : vector<8x1xf32> to vector<8x8xf32>
    %447 = arith.mulf %428, %446 : vector<8x8xf32>
    %448 = vector.broadcast %431 : vector<8x1xf32> to vector<8x8xf32>
    %449 = arith.mulf %430, %448 : vector<8x8xf32>
    %450 = vector.broadcast %433 : vector<8x1xf32> to vector<8x8xf32>
    %451 = arith.mulf %432, %450 : vector<8x8xf32>
    %452 = tpu.concatenate %435, %437, %439, %441, %443, %445, %447, %449, %451 in 1 : vector<8x8xf32>, vector<8x8xf32>, vector<8x8xf32>, vector<8x8xf32>, vector<8x8xf32>, vector<8x8xf32>, vector<8x8xf32>, vector<8x8xf32>, vector<8x8xf32> -> vector<8x72xf32>
    %c0_120 = arith.constant 0 : index
    %c0_121 = arith.constant 0 : index
    %453 = vector.load %arg12[%c0_120, %c0_121] : memref<72x2xbf16, #tpu.memory_space<vmem>>, vector<72x2xbf16>
    %454 = arith.truncf %452 : vector<8x72xf32> to vector<8x72xbf16>
    %cst_122 = arith.constant dense<0.000000e+00> : vector<8x2xf32>
    %455 = tpu.matmul %454, %453, %cst_122 {dimension_numbers = #tpu.dot_dimension_numbers<[1], [0], [0], [1], [0, 0, 1, 1], [], []>} : vector<8x72xbf16>, vector<72x2xbf16>, vector<8x2xf32> -> vector<8x2xf32>
    %456 = tpu.concatenate %365, %455 in 1 : vector<8x10xf32>, vector<8x2xf32> -> vector<8x12xf32>
    %457 = vector.extract_strided_slice %456 {offsets = [0, 0], sizes = [4, 12], strides = [1, 1]} : vector<8x12xf32> to vector<4x12xf32>
    %cst_123 = arith.constant dense<0.000000e+00> : vector<12xf32>
    %458 = vector.multi_reduction <add>, %457, %cst_123 [0] : vector<4x12xf32> to vector<12xf32>
    %459 = vector.shape_cast %458 : vector<12xf32> to vector<1x12xf32>
    %cst_124 = arith.constant 4.000000e+00 : f32
    %460 = vector.broadcast %cst_124 : f32 to vector<1x12xf32>
    %461 = arith.divf %459, %460 : vector<1x12xf32>
    %462 = vector.extract_strided_slice %456 {offsets = [4, 0], sizes = [4, 12], strides = [1, 1]} : vector<8x12xf32> to vector<4x12xf32>
    %cst_125 = arith.constant dense<0.000000e+00> : vector<12xf32>
    %463 = vector.multi_reduction <add>, %462, %cst_125 [0] : vector<4x12xf32> to vector<12xf32>
    %464 = vector.shape_cast %463 : vector<12xf32> to vector<1x12xf32>
    %cst_126 = arith.constant 4.000000e+00 : f32
    %465 = vector.broadcast %cst_126 : f32 to vector<1x12xf32>
    %466 = arith.divf %464, %465 : vector<1x12xf32>
    %467 = tpu.concatenate %461, %466 in 0 : vector<1x12xf32>, vector<1x12xf32> -> vector<2x12xf32>
    %c0_127 = arith.constant 0 : index
    %c0_128 = arith.constant 0 : index
    %468 = vector.load %arg13[%c0_127, %c0_128] : memref<12x10xbf16, #tpu.memory_space<vmem>>, vector<12x10xbf16>
    %469 = arith.truncf %467 : vector<2x12xf32> to vector<2x12xbf16>
    %cst_129 = arith.constant dense<0.000000e+00> : vector<2x10xf32>
    %470 = tpu.matmul %469, %468, %cst_129 {dimension_numbers = #tpu.dot_dimension_numbers<[1], [0], [0], [1], [0, 0, 1, 1], [], []>} : vector<2x12xbf16>, vector<12x10xbf16>, vector<2x10xf32> -> vector<2x10xf32>
    %c0_130 = arith.constant 0 : index
    %c0_131 = arith.constant 0 : index
    %471 = vector.load %arg14[%c0_130, %c0_131] : memref<1x10xf32, #tpu.memory_space<vmem>>, vector<1x10xf32>
    %472 = vector.broadcast %471 : vector<1x10xf32> to vector<2x10xf32>
    %473 = arith.addf %470, %472 : vector<2x10xf32>
    %c0_132 = arith.constant 0 : index
    %c0_133 = arith.constant 0 : index
    %474 = vector.load %arg15[%c0_132, %c0_133] : memref<2x10xf32, #tpu.memory_space<vmem>>, vector<2x10xf32>
    tpu.vector_store %arg15[%c0_132, %c0_133], %473 {strides = array<i32>} : memref<2x10xf32, #tpu.memory_space<vmem>>, vector<2x10xf32>,
    return
  }
}

</mosaic_0001>

<bundles_post_ra>
// kernel: apply.1
= control target key start
LH: loop header
LB: loop body
LE: loop exit
PB: predicated region body
PF: predicated region fallthrough
CT: control target
= control target key end

     0   :  { %vm7140_vm0 = vcmask 1040384   ;;  %v7043_v3 = vmov 1   ;;  %v7036_v6 = vmov 0   ;;  %s7011_s0 = inlined_call_operand.vmem [shape: f32[128,49], index: 0, kind: input, shape index: {}]   ;;  %s7012_s1 = inlined_call_operand.vmem [shape: bf16[49,3], index: 1, kind: input, shape index: {}]   ;;  %s7013_s2 = inlined_call_operand.vmem [shape: f32[128,9], index: 2, kind: input, shape index: {}]   ;;  %s7014_s3 = inlined_call_operand.vmem [shape: bf16[3,8], index: 3, kind: input, shape index: {}]   ;;  %s7015_s4 = inlined_call_operand.vmem [shape: f32[32,9], index: 4, kind: input, shape index: {}]   ;;  %s7016_s5 = inlined_call_operand.vmem [shape: bf16[72,8], index: 5, kind: input, shape index: {}]   ;;  %s7017_s6 = inlined_call_operand.vmem [shape: bf16[8,8], index: 6, kind: input, shape index: {}]   ;;  %s7018_s7 = inlined_call_operand.vmem [shape: bf16[3,8], index: 7, kind: input, shape index: {}]   ;;  %s7019_s8 = inlined_call_operand.vmem [shape: bf16[8,8], index: 8, kind: input, shape index: {}]   ;;  %s7020_s9 = inlined_call_operand.vmem [shape: f32[8,9], index: 9, kind: input, shape index: {}]   ;;  %s7021_s10 = inlined_call_operand.vmem [shape: bf16[72,2], index: 10, kind: input, shape index: {}]   ;;  %s7022_s11 = inlined_call_operand.vmem [shape: bf16[10,8], index: 11, kind: input, shape index: {}]   ;;  %s7023_s12 = inlined_call_operand.vmem [shape: bf16[72,2], index: 12, kind: input, shape index: {}]   ;;  %s7024_s13 = inlined_call_operand.vmem [shape: bf16[12,10], index: 13, kind: input, shape index: {}]   ;;  %s7025_s14 = inlined_call_operand.vmem [shape: f32[1,10], index: 14, kind: input, shape index: {}]   ;;  %s7026_s15 = inlined_call_operand.hbm [shape: f32[2,10], index: 15, kind: output, shape index: {}]  }
   0x1   :  { %v4168_v0 = vld [vmem:[%s7013_s2 + $0x30] sm:$0xff]  ;;  %v4173_v1 = vld [vmem:[%s7013_s2 + $0x18] sm:$0xff]  ;;  %v4178_v2 = vld [vmem:[%s7013_s2 + $0x8] sm:$0xff]  ;;  %3812 = vset.pattern.permute.xlu2 %v7043_v3  ;;  %3811 = vset.pattern.permute.xlu1 %v7043_v3  ;;  %v131_v7 = vsel %vm7140_vm0, 65535, %v7036_v6 }
   0x2   :  { %v74_v4 = vld [vmem:[%s7012_s1 + $0x18] sm:$0x1]  ;;  %3810 = vset.pattern.permute.xlu0 %v7043_v3  ;;  %536 = vperm.xlu2 %3812, %v4168_v0  }
   0x3   :  { %v96_v5 = vunpack.c.l.b16 %v74_v4  ;;  %527 = vperm.xlu1 %3811, %v4173_v1   ;;  %521 = vperm.xlu0 %3810, %v4178_v2  }
   0x5   :  { %v100_v8 = vpack.c.b16 %v96_v5, %v96_v5 }
   0x7   :  { %v133_v9 = vand.u32 %v131_v7, %v100_v8 }
   0x8   :  { %20 = vsyncpa [#allocation4], 0  ;;  %v4194_v10 = vld [vmem:[%s7013_s2 + $0x38] sm:$0xff]  ;;  %v4199_v11 = vld [vmem:[%s7013_s2 + $0x28] sm:$0xff]  ;;  %v7041_v20 = vmov 2   ;;  %vm104_vm1 = vcmask 400384  }
   0x9   :  { %139 = vmatpush.bf16.msra.mxu0 %v133_v9  ;;  %v4204_v12 = vld [vmem:[%s7013_s2 + $0x10] sm:$0xff]  ;;  %3785 = vmatpush.bf16.msra.mxu3 %v133_v9  ;;  %v3769_v14 = vld [vmem:[%s7012_s1 + $0x8] sm:$0xff]  ;;  %v4218_v15 = vld [vmem:[%s7013_s2 + $0x20] sm:$0xff]  ;;  %v7039_v25 = vmov 6   ;;  %v7033_v30 = vmov 4   ;;  %v7031_v46 = vmov 5  }
   0xa   :  { %v3770_v13 = vld [vmem:[%s7012_s1 + $0x10] sm:$0xff]  ;;  %539 = vperm.xlu2 %3812, %v4194_v10   ;;  %v4223_v16 = vld [vmem:[%s7013_s2] sm:$0xff]  ;;  %v53_v19 = vld [vmem:[%s7011_s0 + $0x8] sm:$0xff]  ;;  %v7029_v53 = vmov 3   ;;  %v7027_v62 = vmov 7   ;;  %vm184_vm2 = vcmask 23552  }
   0xb   :  { %533 = vperm.xlu1 %3811, %v4199_v11   ;;  %524 = vperm.xlu0 %3810, %v4204_v12   ;;  %v3768_v17 = vld [vmem:[%s7012_s1] sm:$0xff]  ;;  %v4242_v22 = vld [vmem:[%s7013_s2 + $0x58] sm:$0xff]  ;;  %v54_v23 = vld [vmem:[%s7011_s0 + $0x10] sm:$0xff]  ;;  %vm761_vm3 = vcmask 1041408   ;;  %vm647_vm7 = vcmask 1046528   ;;  %vm844_vm8 = vcmask 1045504  }
   0xc   :  { %v52_v18 = vld [vmem:[%s7011_s0] sm:$0xff]  ;;  %v55_v24 = vld [vmem:[%s7011_s0 + $0x18] sm:$0xff]  ;;  %v57_v28 = vld [vmem:[%s7011_s0 + $0x28] sm:$0xff]  ;;  %vm1925_vm9 = vcmask 1043456   ;;  %vm1963_vm10 = vcmask 64512   ;;  %vm2030_vm14 = vcmask 1044480  }
   0xd   :  { %140 = vmatpush.bf16.msra.mxu0 %v3770_v13  ;;  %3786 = vmatpush.bf16.msra.mxu3 %v3770_v13  ;;  %v75_v21 = vpack.c.bf16 %v53_v19, %v52_v18  ;;  %v76_v26 = vpack.c.bf16 %v55_v24, %v54_v23  ;;  %v56_v27 = vld [vmem:[%s7011_s0 + $0x20] sm:$0xff]  ;;  %v65_v32 = vld [vmem:[%s7011_s0 + $0x68] sm:$0xff]  ;;  %v58_v35 = vld [vmem:[%s7011_s0 + $0x30] sm:$0xff]  ;;  %v7046_v19 = vmov 8   ;;  %s4075_s1 = smov 16   ;;  %s4076_s16 = smov 8  }
   0xe   :  { %v77_v29 = vpack.c.bf16 %v57_v28, %v56_v27  ;;  %v64_v31 = vld [vmem:[%s7011_s0 + $0x60] sm:$0xff]  ;;  %v4286_v34 = vld [vmem:[%s7013_s2 + $0x48] sm:$0xff]  ;;  %v59_v36 = vld [vmem:[%s7011_s0 + $0x38] sm:$0xff]  ;;  %vm2375_vm15 = vcmask 1042432   ;;  %s4077_s17 = smov 24   ;;  %s4078_s18 = smov 40  }
   0xf   :  { %v81_v33 = vpack.c.bf16 %v65_v32, %v64_v31  ;;  %v4300_v37 = vld [vmem:[%s7013_s2 + $0x78] sm:$0xff]  ;;  %v78_v38 = vpack.c.bf16 %v59_v36, %v58_v35  ;;  %v66_v39 = vld [vmem:[%s7011_s0 + $0x70] sm:$0xff]  ;;  %v4317_v42 = vld [vmem:[%s7013_s2 + $0x40] sm:$0xff]  ;;  %s4079_s19 = smov 32   ;;  %s4080_s20 = smov 64  }
  0x10   :  { %v67_v40 = vld [vmem:[%s7011_s0 + $0x78] sm:$0xff]  ;;  %v60_v43 = vld [vmem:[%s7011_s0 + $0x40] sm:$0xff]  ;;  %v61_v44 = vld [vmem:[%s7011_s0 + $0x48] sm:$0xff] }
  0x11   :  { %141 = vmatpush.bf16.msra.mxu0 %v3769_v14  ;;  %3787 = vmatpush.bf16.msra.mxu3 %v3769_v14  ;;  %v82_v41 = vpack.c.bf16 %v67_v40, %v66_v39  ;;  %v79_v45 = vpack.c.bf16 %v61_v44, %v60_v43  ;;  %v4340_v47 = vld [vmem:[%s7013_s2 + $0x70] sm:$0xff]  ;;  %v63_v50 = vld [vmem:[%s7011_s0 + $0x58] sm:$0xff]  ;;  %v4385_v60 = vld [vmem:[%s7013_s2 + $0x60] sm:$0xff] }
  0x12   :  { %3813 = vset.pattern.permute.xlu2 %v7041_v20  ;;  %v62_v49 = vld [vmem:[%s7011_s0 + $0x50] sm:$0xff]  ;;  %s4081_s0 = smov 56  }
  0x13   :  { %530 = vperm.xlu1 %3811, %v4218_v15   ;;  %518 = vperm.xlu0 %3810, %v4223_v16   ;;  %v80_v51 = vpack.c.bf16 %v63_v50, %v62_v49 }
  0x14   :  { %717 = vperm.xlu2 %3813, %v4178_v2  }
  0x15   :  { %142 = vmatpush.bf16.msra.mxu0 %v3768_v17  ;;  %3788 = vmatpush.bf16.msra.mxu3 %v3768_v17 }
  0x18   :  { %3691 = vmatmul.msk.bf16.vlgmr.msra.gmra.mxu0 %vm104_vm1, %v75_v21  ;;  %3697 = vmatmul.msk.bf16.vlgmr.msra.gmra.mxu3 %vm104_vm1, %v81_v33  ;;  %v4466_v33 = vld [vmem:[%s7013_s2 + $0x68] sm:$0xff] }
  0x1b   :  { %3814 = vset.pattern.permute.xlu1 %v7041_v20  ;;  %551 = vperm.xlu0 %3810, %v4242_v22  }
  0x1c   :  { %723 = vperm.xlu1 %3814, %v4173_v1   ;;  %729 = vperm.xlu2 %3813, %v4199_v11  }
  0x23   :  { %3834 = vset.pattern.permute.xlu0 %v7039_v25 }
  0x24   :  { %732 = vperm.xlu1 %3814, %v4168_v0   ;;  %735 = vperm.xlu2 %3813, %v4194_v10  }
  0x25   :  { %1421 = vperm.xlu0 %3834, %v4168_v0  }
  0x28   :  { %3692 = vmatmul.msk.bf16.gmra.mxu0 %vm104_vm1, %v76_v26  ;;  %3698 = vmatmul.msk.bf16.gmra.mxu3 %vm104_vm1, %v82_v41 }
  0x2c   :  { %726 = vperm.xlu1 %3814, %v4218_v15   ;;  %3815 = vset.pattern.permute.xlu2 %v7036_v6 }
  0x2d   :  { %3835 = vset.pattern.permute.xlu0 %v7041_v20  ;;  %433 = vperm.xlu2 %3815, %v4204_v12  }
  0x2e   :  { %720 = vperm.xlu0 %3835, %v4204_v12  }
  0x34   :  { %3816 = vset.pattern.permute.xlu1 %v7033_v30 }
  0x35   :  { %1010 = vperm.xlu1 %3816, %v4178_v2   ;;  %3817 = vset.pattern.permute.xlu2 %v7033_v30 }
  0x36   :  { %714 = vperm.xlu0 %3835, %v4223_v16   ;;  %1013 = vperm.xlu2 %3817, %v4204_v12  }
  0x38   :  { %3693 = vmatmul.msk.bf16.gmra.mxu0 %vm104_vm1, %v77_v29 }
  0x3d   :  { %1016 = vperm.xlu1 %3816, %v4173_v1  }
  0x3e   :  { %741 = vperm.xlu0 %3835, %v4286_v34   ;;  %1022 = vperm.xlu2 %3817, %v4199_v11  }
  0x45   :  { %1028 = vperm.xlu1 %3816, %v4194_v10  }
  0x46   :  { %759 = vperm.xlu0 %3835, %v4300_v37   ;;  %3818 = vset.pattern.permute.xlu2 %v7036_v6 }
  0x47   :  { %423 = vperm.xlu2 %3818, %v4223_v16  }
  0x48   :  { %3694 = vmatmul.msk.bf16.gmra.mxu0 %vm104_vm1, %v78_v38 }
  0x4d   :  { %3819 = vset.pattern.permute.xlu1 %v7036_v6 }
  0x4e   :  { %738 = vperm.xlu0 %3835, %v4317_v42   ;;  %443 = vperm.xlu1 %3819, %v4218_v15  }
  0x4f   :  { %3820 = vset.pattern.permute.xlu2 %v7033_v30 }
  0x50   :  { %1007 = vperm.xlu2 %3820, %v4223_v16  }
  0x56   :  { %3844 = vset.pattern.permute.xlu0 %v7036_v6  ;;  %3821 = vset.pattern.permute.xlu1 %v7031_v46 }
  0x57   :  { %453 = vperm.xlu0 %3844, %v4168_v0   ;;  %1205 = vperm.xlu1 %3821, %v4178_v2  }
  0x58   :  { %3695 = vmatmul.msk.bf16.gmra.mxu0 %vm104_vm1, %v79_v45  ;;  %3822 = vset.pattern.permute.xlu2 %v7031_v46 }
  0x59   :  { %1208 = vperm.xlu2 %3822, %v4204_v12  }
  0x5c   :  { %v4342_v48 = vpop.permute.xlu2 %536 }
  0x5f   :  { %493 = vperm.xlu0 %3844, %v4340_v47   ;;  %1217 = vperm.xlu1 %3821, %v4199_v11  }
  0x61   :  { %1220 = vperm.xlu2 %3822, %v4168_v0  }
  0x64   :  { %v4353_v52 = vpop.permute.xlu2 %539 }
  0x65   :  { %7151 = vst [vmem:[#allocation6_spill] sm:$0xff] %v4353_v52 }
  0x67   :  { %3847 = vset.pattern.permute.xlu0 %v7033_v30  ;;  %1223 = vperm.xlu1 %3821, %v4194_v10  }
  0x68   :  { %1025 = vperm.xlu0 %3847, %v4168_v0   ;;  %3696 = vmatmul.msk.bf16.gmra.mxu0 %vm104_vm1, %v80_v51  ;;  %vm2495_vm1 = vcmask 130048  }
  0x69   :  { %3823 = vset.pattern.permute.xlu2 %v7029_v53 }
  0x6a   :  { %919 = vperm.xlu2 %3823, %v4204_v12  }
  0x6e   :  { %v4361_v54 = vpop.permute.xlu2 %717 }
  0x6f   :  { %7152 = vst [vmem:[#allocation7_spill] sm:$0xff] %v4361_v54  ;;  %1202 = vperm.xlu1 %3821, %v4223_v16  }
  0x70   :  { %1019 = vperm.xlu0 %3847, %v4218_v15  }
  0x72   :  { %3824 = vset.pattern.permute.xlu2 %v7031_v46 }
  0x73   :  { %1214 = vperm.xlu2 %3824, %v4218_v15  }
  0x75   :  { %v4367_v55 = vpop.permute.xlu1 %527  ;;  %v4369_v56 = vpop.permute.xlu0 %521 }
  0x76   :  { %7153 = vst [vmem:[#allocation8_spill] sm:$0xff] %v4369_v56  ;;  %v4371_v57 = vpop.permute.xlu2 %729 }
  0x77   :  { %3825 = vset.pattern.permute.xlu1 %v7029_v53 }
  0x78   :  { %1049 = vperm.xlu0 %3847, %v4340_v47   ;;  %911 = vperm.xlu1 %3825, %v4223_v16  }
  0x7b   :  { %3826 = vset.pattern.permute.xlu2 %v7029_v53 }
  0x7c   :  { %927 = vperm.xlu2 %3826, %v4218_v15  }
  0x7d   :  { %v4378_v58 = vpop.permute.xlu1 %533  ;;  %v4380_v59 = vpop.permute.xlu0 %524 }
  0x7e   :  { %v4387_v61 = vpop.permute.xlu2 %735 }
  0x7f   :  { %v7035_v49 = vrot.slane %v4387_v61, 6 }
  0x80   :  { %1043 = vperm.xlu0 %3847, %v4385_v60   ;;  %3827 = vset.pattern.permute.xlu1 %v7027_v62 }
  0x81   :  { %1499 = vperm.xlu1 %3827, %v4204_v12  }
  0x84   :  { %3828 = vset.pattern.permute.xlu2 %v7027_v62 }
  0x85   :  { %v4393_v63 = vpop.permute.xlu1 %530  ;;  %1502 = vperm.xlu2 %3828, %v4173_v1   ;;  %v4396_v4 = vpop.permute.xlu0 %518 }
  0x86   :  { %7154 = vst [vmem:[#allocation9_spill] sm:$0xff] %v4396_v4 }
  0x87   :  { %v4398_v5 = vpop.permute.xlu2 %433 }
  0x88   :  { %7155 = vst [vmem:[#allocation10_spill] sm:$0xff] %v4398_v5  ;;  %3853 = vset.pattern.permute.xlu0 %v7031_v46 }
  0x89   :  { %1211 = vperm.xlu0 %3853, %v4173_v1   ;;  %1508 = vperm.xlu1 %3827, %v4199_v11  }
  0x8d   :  { %1511 = vperm.xlu2 %3828, %v4168_v0   ;;  %v4404_v7 = vpop.permute.xlu0 %551 }
  0x8e   :  { %7156 = vst [vmem:[#allocation11_spill] sm:$0xff] %v4404_v7  ;;  %v4406_v8 = vpop.permute.xlu1 %723 }
  0x90   :  { %v4408_v9 = vpop.permute.xlu2 %1013 }
  0x91   :  { %1235 = vperm.xlu0 %3853, %v4242_v22   ;;  %1493 = vperm.xlu1 %3827, %v4223_v16  }
  0x95   :  { %v4412_v13 = vpop.f32.mrf.mxu0  ;;  %1505 = vperm.xlu2 %3828, %v4218_v15  }
  0x96   :  { %v4415_v14 = vpop.permute.xlu1 %732  ;;  %v222_v51 = vmul.f32 %v4412_v13, %v4412_v13 }
  0x97   :  { %v4417_v17 = vpop.permute.xlu0 %1421 }
  0x98   :  { %7157 = vst [vmem:[#allocation12_spill] sm:$0xff] %v4417_v17  ;;  %v4419_v18 = vpop.permute.xlu2 %1022  ;;  %v238_v6 = vsel %vm184_vm2, %v222_v51, 0.0 }
  0x99   :  { %3856 = vset.pattern.permute.xlu0 %v7029_v53  ;;  %3829 = vset.pattern.permute.xlu1 %v7046_v19 }
  0x9a   :  { %935 = vperm.xlu0 %3856, %v4168_v0   ;;  %1694 = vperm.xlu1 %3829, %v4204_v12  }
  0x9b   :  { %v4546_v7 = vpop.f32.mrf.mxu3 }
  0x9c   :  { %7175 = vst [vmem:[#allocation29_spill] sm:$0xff] %v4546_v7 }
  0x9d   :  { %v4425_v21 = vpop.f32.mrf.mxu0  ;;  %3830 = vset.pattern.permute.xlu2 %v7046_v19 }
  0x9e   :  { %v4428_v23 = vpop.permute.xlu1 %726  ;;  %1697 = vperm.xlu2 %3830, %v4173_v1   ;;  %v186_v46 = vsel %vm184_vm2, %v4425_v21, 0.0 }
  0xa0   :  { %v4431_v24 = vpop.permute.xlu0 %720 }
  0xa1   :  { %v4433_v26 = vpop.permute.xlu2 %423 }
  0xa2   :  { %7158 = vst [vmem:[#allocation13_spill] sm:$0xff] %v4433_v26  ;;  %967 = vperm.xlu0 %3856, %v4340_v47   ;;  %1703 = vperm.xlu1 %3829, %v4199_v11  }
  0xa5   :  { %v4437_v27 = vpop.f32.mrf.mxu0 }
  0xa6   :  { %1706 = vperm.xlu2 %3830, %v4168_v0   ;;  %v4455_v0 = vld [vmem:[%s7013_s2 + $0x50] sm:$0xff]  ;;  %v188_v20 = vsel %vm184_vm2, %v4437_v27, 0.0 }
  0xa7   :  { %v4440_v28 = vpop.permute.xlu1 %1010 }
  0xa8   :  { %7159 = vst [vmem:[#allocation14_spill] sm:$0xff] %v4440_v28  ;;  %v4442_v29 = vpop.permute.xlu0 %714 }
  0xa9   :  { %7160 = vst [vmem:[#allocation15_spill] sm:$0xff] %v4442_v29 }
  0xaa   :  { %3858 = vset.pattern.permute.xlu0 %v7027_v62  ;;  %3831 = vset.pattern.permute.xlu1 %v7043_v3  ;;  %v4447_v1 = vpop.permute.xlu2 %1007  ;;  %v223_v62 = vmul.f32 %v4425_v21, %v4425_v21 }
  0xab   :  { %1496 = vperm.xlu0 %3858, %v4178_v2   ;;  %7161 = vst [vmem:[#allocation16_spill] sm:$0xff] %v4447_v1  ;;  %545 = vperm.xlu1 %3831, %v4286_v34  }
  0xad   :  { %v4450_v31 = vpop.f32.mrf.mxu0 }
  0xae   :  { %7162 = vst [vmem:[#allocation17_spill] sm:$0xff] %v4450_v31  ;;  %3832 = vset.pattern.permute.xlu2 %v7043_v3 }
  0xaf   :  { %v4458_v11 = vpop.permute.xlu1 %1016  ;;  %548 = vperm.xlu2 %3832, %v4455_v0  }
  0xb0   :  { %v4461_v32 = vpop.permute.xlu0 %741 }
  0xb1   :  { %7163 = vst [vmem:[#allocation18_spill] sm:$0xff] %v4461_v32  ;;  %v7038_v43 = vrot.slane %v4461_v32, 6 }
  0xb3   :  { %1514 = vperm.xlu0 %3858, %v4194_v10   ;;  %557 = vperm.xlu1 %3831, %v4466_v33   ;;  %v4470_v35 = vpop.permute.xlu2 %1208 }
  0xb5   :  { %v4472_v36 = vpop.f32.mrf.mxu0 }
  0xb7   :  { %v4474_v38 = vpop.permute.xlu1 %1028  ;;  %560 = vperm.xlu2 %3832, %v4340_v47  }
  0xb8   :  { %7164 = vst [vmem:[#allocation19_spill] sm:$0xff] %v4474_v38  ;;  %v4477_v39 = vpop.permute.xlu0 %759 }
  0xb9   :  { %7165 = vst [vmem:[#allocation20_spill] sm:$0xff] %v4477_v39 }
  0xbb   :  { %1520 = vperm.xlu0 %3858, %v4286_v34   ;;  %563 = vperm.xlu1 %3831, %v4300_v37   ;;  %v4481_v40 = vpop.permute.xlu2 %1220 }
  0xbd   :  { %v4483_v41 = vpop.f32.mrf.mxu0 }
  0xbf   :  { %3833 = vset.pattern.permute.xlu2 %v7039_v25 }
  0xc0   :  { %v739_v44 = vpop.permute.xlu0 %738  ;;  %v4487_v45 = vpop.permute.xlu1 %443  ;;  %1405 = vperm.xlu2 %3833, %v4204_v12  }
  0xc1   :  { %7166 = vst [vmem:[#allocation21_spill] sm:$0xff] %v4487_v45  ;;  %v777_v50 = vrot.slane %v739_v44, 6  ;;  %v185_v44 = vsel %vm184_vm2, %v4412_v13, 0.0 }
  0xc2   :  { %v187_v25 = vadd.f32 %v186_v46, %v185_v44  ;;  %v190_v46 = vsel %vm184_vm2, %v4450_v31, 0.0 }
  0xc3   :  { %v4498_v53 = vsel %vm761_vm3, %v7035_v49, %v777_v50  ;;  %v4503_v12 = vsel %vm761_vm3, %v777_v50, %v7038_v43  ;;  %1538 = vperm.xlu0 %3858, %v4300_v37   ;;  %3836 = vset.pattern.permute.xlu1 %v7046_v19  ;;  %v239_v50 = vsel %vm184_vm2, %v223_v62, 0.0  ;;  %v224_v43 = vmul.f32 %v4437_v27, %v4437_v27 }
  0xc4   :  { %7167 = vst [vmem:[#allocation22_spill] sm:$0xff] %v4498_v53  ;;  %1688 = vperm.xlu1 %3836, %v4223_v16   ;;  %v4514_v49 = vpop.permute.xlu2 %919  ;;  %v240_v3 = vadd.f32 %v239_v50, %v238_v6  ;;  %v225_v62 = vmul.f32 %v4450_v31, %v4450_v31  ;;  %v189_v53 = vadd.f32 %v188_v20, %v187_v25  ;;  %v7172_v6 = vmov 1  }
  0xc5   :  { %7168 = vst [vmem:[#allocation23_spill] sm:$0xff] %v4503_v12  ;;  %v4512_v30 = vpop.f32.mrf.mxu0  ;;  %v241_v51 = vsel %vm184_vm2, %v224_v43, 0.0  ;;  %v226_v20 = vmul.f32 %v4472_v36, %v4472_v36 }
  0xc6   :  { %7169 = vst [vmem:[#allocation24_spill] sm:$0xff] %v4514_v49  ;;  %v242_v50 = vadd.f32 %v241_v51, %v240_v3  ;;  %v243_v43 = vsel %vm184_vm2, %v225_v62, 0.0  ;;  %v191_v25 = vadd.f32 %v190_v46, %v189_v53  ;;  %v227_v51 = vmul.f32 %v4483_v41, %v4483_v41 }
  0xc7   :  { %v245_v3 = vsel %vm184_vm2, %v226_v20, 0.0  ;;  %v194_v62 = vsel %vm184_vm2, %v4483_v41, 0.0  ;;  %v228_v20 = vmul.f32 %v4512_v30, %v4512_v30 }
  0xc8   :  { %3837 = vset.pattern.permute.xlu2 %v7046_v19 }
  0xc9   :  { %v4523_v32 = vpop.permute.xlu0 %453  ;;  %v4525_v12 = vpop.permute.xlu1 %1205  ;;  %1700 = vperm.xlu2 %3837, %v4218_v15  }
  0xca   :  { %7170 = vst [vmem:[#allocation25_spill] sm:$0xff] %v4523_v32 }
  0xcb   :  { %7171 = vst [vmem:[#allocation26_spill] sm:$0xff] %v4525_v12  ;;  %3864 = vset.pattern.permute.xlu0 %v7046_v19  ;;  %v192_v19 = vsel %vm184_vm2, %v4472_v36, 0.0 }
  0xcc   :  { %1691 = vperm.xlu0 %3864, %v4178_v2   ;;  %3838 = vset.pattern.permute.xlu1 %v7172_v6  ;;  %v244_v2 = vadd.f32 %v243_v43, %v242_v50  ;;  %v193_v53 = vadd.f32 %v192_v19, %v191_v25  ;;  %v7178_v43 = vmov 2   ;;  %v196_v25 = vsel %vm184_vm2, %v4512_v30, 0.0 }
  0xcd   :  { %v4536_v44 = vpop.f32.mrf.mxu0  ;;  %542 = vperm.xlu1 %3838, %v4317_v42   ;;  %v4539_v39 = vpop.permute.xlu2 %1214 }
  0xce   :  { %7173 = vst [vmem:[#allocation27_spill] sm:$0xff] %v4536_v44  ;;  %v246_v46 = vadd.f32 %v245_v3, %v244_v2  ;;  %v195_v19 = vadd.f32 %v194_v62, %v193_v53  ;;  %v249_v2 = vsel %vm184_vm2, %v228_v20, 0.0  ;;  %v229_v3 = vmul.f32 %v4536_v44, %v4536_v44 }
  0xcf   :  { %7174 = vst [vmem:[#allocation28_spill] sm:$0xff] %v4539_v39  ;;  %v198_v53 = vsel %vm184_vm2, %v4536_v44, 0.0  ;;  %v7192_v39 = vmov 0  }
  0xd0   :  { %v197_v17 = vadd.f32 %v196_v25, %v195_v19 }
  0xd1   :  { %v4548_v26 = vpop.permute.xlu0 %493  ;;  %v4550_v1 = vpop.permute.xlu1 %1217  ;;  %3839 = vset.pattern.permute.xlu2 %v7172_v6 }
  0xd2   :  { %7176 = vst [vmem:[#allocation30_spill] sm:$0xff] %v4548_v26  ;;  %554 = vperm.xlu2 %3839, %v4385_v60   ;;  %v247_v26 = vsel %vm184_vm2, %v227_v51, 0.0  ;;  %v199_v19 = vadd.f32 %v198_v53, %v197_v17 }
  0xd3   :  { %v248_v45 = vadd.f32 %v247_v26, %v246_v46  ;;  %v251_v46 = vsel %vm184_vm2, %v229_v3, 0.0 }
  0xd4   :  { %1709 = vperm.xlu0 %3864, %v4194_v10  }
  0xd5   :  { %v4560_v50 = vpop.f32.mrf.mxu0  ;;  %3840 = vset.pattern.permute.xlu1 %v7178_v43  ;;  %v250_v26 = vadd.f32 %v249_v2, %v248_v45 }
  0xd6   :  { %7177 = vst [vmem:[#allocation31_spill] sm:$0xff] %v4560_v50  ;;  %744 = vperm.xlu1 %3840, %v4455_v0   ;;  %v4567_v6 = vpop.permute.xlu2 %927  ;;  %v230_v20 = vmul.f32 %v4560_v50, %v4560_v50  ;;  %v200_v49 = vsel %vm184_vm2, %v4560_v50, 0.0 }
  0xd7   :  { %7179 = vst [vmem:[#allocation32_spill] sm:$0xff] %v4567_v6  ;;  %v4580_v6 = vpop.f32.mrf.mxu3  ;;  %v252_v32 = vadd.f32 %v251_v46, %v250_v26 }
  0xd8   :  { %v253_v45 = vsel %vm184_vm2, %v230_v20, 0.0 }
  0xd9   :  { %v4571_v10 = vpop.permute.xlu1 %1223  ;;  %v254_v53 = vadd.f32 %v253_v45, %v252_v32 }
  0xda   :  { %7180 = vst [vmem:[#allocation33_spill] sm:$0xff] %v4571_v10  ;;  %v4576_v51 = vpop.permute.xlu0 %1025  ;;  %3841 = vset.pattern.permute.xlu2 %v7178_v43 }
  0xdb   :  { %7181 = vst [vmem:[#allocation34_spill] sm:$0xff] %v4576_v51  ;;  %747 = vperm.xlu2 %3841, %v4242_v22   ;;  %v201_v51 = vadd.f32 %v200_v49, %v199_v19 }
  0xdc   :  { %1715 = vperm.xlu0 %3864, %v4286_v34  }
  0xdd   :  { %v4585_v62 = vpop.f32.mrf.mxu0 }
  0xde   :  { %753 = vperm.xlu1 %3840, %v4466_v33   ;;  %v231_v2 = vmul.f32 %v4585_v62, %v4585_v62  ;;  %v202_v17 = vsel %vm184_vm2, %v4585_v62, 0.0 }
  0xdf   :  { %v4591_v25 = vpop.permute.xlu2 %1502  ;;  %v4608_v26 = vpop.f32.mrf.mxu3  ;;  %v203_v49 = vadd.f32 %v202_v17, %v201_v51  ;;  %v234_v51 = vmul.f32 %v4546_v7, %v4546_v7 }
  0xe0   :  { %7182 = vst [vmem:[#allocation35_spill] sm:$0xff] %v4591_v25  ;;  %v255_v46 = vsel %vm184_vm2, %v231_v2, 0.0 }
  0xe1   :  { %v4595_v5 = vpop.permute.xlu1 %1202  ;;  %v256_v32 = vadd.f32 %v255_v46, %v254_v53  ;;  %v208_v53 = vsel %vm184_vm2, %v4546_v7, 0.0  ;;  %v235_v46 = vmul.f32 %v4580_v6, %v4580_v6  ;;  %v236_v7 = vmul.f32 %v4608_v26, %v4608_v26 }
  0xe2   :  { %7183 = vst [vmem:[#allocation36_spill] sm:$0xff] %v4595_v5  ;;  %v4600_v3 = vpop.permute.xlu0 %1019  ;;  %v7185_v5 = vmov 6  }
  0xe3   :  { %7184 = vst [vmem:[#allocation37_spill] sm:$0xff] %v4600_v3  ;;  %756 = vperm.xlu2 %3841, %v4340_v47   ;;  %v265_v31 = vsel %vm184_vm2, %v236_v7, 0.0 }
  0xe4   :  { %1733 = vperm.xlu0 %3864, %v4300_v37  }
  0xe5   :  { %v4606_v50 = vpop.f32.mrf.mxu0 }
  0xe6   :  { %v232_v20 = vmul.f32 %v4606_v50, %v4606_v50  ;;  %3842 = vset.pattern.permute.xlu1 %v7185_v5  ;;  %v204_v25 = vsel %vm184_vm2, %v4606_v50, 0.0 }
  0xe7   :  { %1397 = vperm.xlu1 %3842, %v4223_v16   ;;  %v4615_v19 = vpop.permute.xlu2 %1511  ;;  %v205_v2 = vadd.f32 %v204_v25, %v203_v49 }
  0xe8   :  { %7186 = vst [vmem:[#allocation38_spill] sm:$0xff] %v4615_v19  ;;  %v257_v45 = vsel %vm184_vm2, %v232_v20, 0.0 }
  0xe9   :  { %v258_v16 = vadd.f32 %v257_v45, %v256_v32  ;;  %v261_v32 = vsel %vm184_vm2, %v234_v51, 0.0  ;;  %v210_v45 = vsel %vm184_vm2, %v4580_v6, 0.0 }
  0xea   :  { %v4620_v3 = vpop.permute.xlu0 %1049  ;;  %v4622_v44 = vpop.permute.xlu1 %911 }
  0xeb   :  { %7187 = vst [vmem:[#allocation39_spill] sm:$0xff] %v4620_v3  ;;  %3843 = vset.pattern.permute.xlu2 %v7185_v5 }
  0xec   :  { %7188 = vst [vmem:[#allocation40_spill] sm:$0xff] %v4622_v44  ;;  %1712 = vperm.xlu0 %3864, %v4317_v42   ;;  %1413 = vperm.xlu2 %3843, %v4218_v15   ;;  %v4642_v15 = vpop.f32.mrf.mxu3 }
  0xed   :  { %v4629_v17 = vpop.f32.mrf.mxu0  ;;  %v237_v51 = vmul.f32 %v4642_v15, %v4642_v15 }
  0xee   :  { %7189 = vst [vmem:[#allocation41_spill] sm:$0xff] %v4629_v17  ;;  %v206_v25 = vsel %vm184_vm2, %v4629_v17, 0.0  ;;  %v233_v20 = vmul.f32 %v4629_v17, %v4629_v17 }
  0xef   :  { %v207_v49 = vadd.f32 %v206_v25, %v205_v2  ;;  %3845 = vset.pattern.permute.xlu1 %v7178_v43  ;;  %v4640_v3 = vpop.permute.xlu2 %1505  ;;  %v263_v25 = vsel %vm184_vm2, %v235_v46, 0.0  ;;  %v212_v43 = vsel %vm184_vm2, %v4608_v26, 0.0  ;;  %v267_v46 = vsel %vm184_vm2, %v237_v51, 0.0 }
  0xf0   :  { %7190 = vst [vmem:[#allocation42_spill] sm:$0xff] %v4640_v3  ;;  %v259_v44 = vsel %vm184_vm2, %v233_v20, 0.0  ;;  %750 = vperm.xlu1 %3845, %v4385_v60  }
  0xf1   :  { %v209_v17 = vadd.f32 %v208_v53, %v207_v49  ;;  %v260_v2 = vadd.f32 %v259_v44, %v258_v16  ;;  %v214_v44 = vsel %vm184_vm2, %v4642_v15, 0.0 }
  0xf2   :  { %v4654_v3 = vpop.permute.xlu0 %1043 }
  0xf3   :  { %7191 = vst [vmem:[#allocation43_spill] sm:$0xff] %v4654_v3  ;;  %v262_v19 = vadd.f32 %v261_v32, %v260_v2  ;;  %v211_v10 = vadd.f32 %v210_v45, %v209_v17  ;;  %v4658_v20 = vpop.permute.xlu1 %1499  ;;  %v7193_v32 = vmov 4  }
  0xf4   :  { %3846 = vset.pattern.permute.xlu2 %v7192_v39  ;;  %3870 = vset.pattern.permute.xlu0 %v7185_v5 }
  0xf5   :  { %v213_v16 = vadd.f32 %v212_v43, %v211_v10  ;;  %v264_v53 = vadd.f32 %v263_v25, %v262_v19  ;;  %473 = vperm.xlu2 %3846, %v4455_v0   ;;  %1445 = vperm.xlu0 %3870, %v4385_v60  }
  0xf7   :  { %v266_v17 = vadd.f32 %v265_v31, %v264_v53  ;;  %v215_v49 = vadd.f32 %v214_v44, %v213_v16 }
  0xf8   :  { %3848 = vset.pattern.permute.xlu1 %v7193_v32  ;;  %v4669_v7 = vpop.permute.xlu2 %1697 }
  0xf9   :  { %v216_v45 = vrot.slane %v215_v49, 4  ;;  %v268_v2 = vadd.f32 %v267_v46, %v266_v17  ;;  %1034 = vperm.xlu1 %3848, %v4286_v34  }
  0xfb   :  { %v217_v3 = vadd.f32 %v216_v45, %v215_v49  ;;  %v269_v5 = vrot.slane %v268_v2, 4  ;;  %v4672_v43 = vpop.permute.xlu0 %1211  ;;  %v4674_v10 = vpop.permute.xlu1 %1508 }
  0xfc   :  { %7194 = vst [vmem:[#allocation44_spill] sm:$0xff] %v4674_v10 }
  0xfd   :  { %v218_v19 = vrot.slane %v217_v3, 2  ;;  %v270_v25 = vadd.f32 %v269_v5, %v268_v2  ;;  %3849 = vset.pattern.permute.xlu2 %v7193_v32  ;;  %3877 = vset.pattern.permute.xlu0 %v7193_v32 }
  0xfe   :  { %1037 = vperm.xlu2 %3849, %v4455_v0  }
  0xff   :  { %v219_v31 = vadd.f32 %v218_v19, %v217_v3  ;;  %v271_v51 = vrot.slane %v270_v25, 2  ;;  %v574_v19 = vrot.slane %v4378_v58, 7 }
 0x100   :  { %v4679_v44 = vpop.permute.xlu2 %1706 }
 0x101   :  { %v220_v16 = vrot.slane %v219_v31, 1  ;;  %v272_v53 = vadd.f32 %v271_v51, %v270_v25  ;;  %1040 = vperm.xlu1 %3848, %v4242_v22   ;;  %v576_v51 = vrot.slane %v4342_v48, 7 }
 0x103   :  { %v221_v46 = vadd.f32 %v220_v16, %v219_v31  ;;  %v273_v17 = vrot.slane %v272_v53, 1  ;;  %v4682_v49 = vpop.permute.xlu1 %1493  ;;  %v4684_v45 = vpop.permute.xlu0 %1235 }
 0x104   :  { %7195 = vst [vmem:[#allocation45_spill] sm:$0xff] %v4682_v49 }
 0x105   :  { %7196 = vst [vmem:[#allocation46_spill] sm:$0xff] %v4684_v45  ;;  %v274_v5 = vadd.f32 %v273_v17, %v272_v53  ;;  %v4686_v2 = vmul.f32 0.0078125, %v221_v46 }
 0x106   :  { %1046 = vperm.xlu2 %3849, %v4466_v33  }
 0x107   :  { %v276_v10 = vmul.f32 0.0078125, %v274_v5  ;;  %v277_v3 = vmul.f32 %v4686_v2, %v4686_v2 }
 0x109   :  { %v278_v25 = vsub.f32 %v276_v10, %v277_v3  ;;  %1052 = vperm.xlu1 %3848, %v4300_v37   ;;  %v4696_v31 = vpop.permute.xlu2 %548 }
 0x10a   :  { %7197 = vst [vmem:[#allocation47_spill] sm:$0xff] %v4696_v31 }
 0x10b   :  { %v279_v53 = vmax.f32 %v278_v25, 0.0 }
 0x10c   :  { %v4702_v46 = vpop.permute.xlu0 %935  ;;  %v4704_v17 = vpop.permute.xlu1 %1694 }
 0x10d   :  { %v296_v5 = vadd.f32 1e-05, %v279_v53  ;;  %v7066_v53 = vrot.slane %v4353_v52, 7  ;;  %v769_v52 = vrot.slane %v4428_v23, 6 }
 0x10e   :  { %3850 = vset.pattern.permute.xlu2 %v7192_v39 }
 0x10f   :  { %4004 = vrsqrt.f32 %v296_v5  ;;  %463 = vperm.xlu2 %3850, %v4317_v42   ;;  %v4727_v48 = vsel %vm7140_vm0, %v576_v51, %v7066_v53  ;;  %vm303_vm4 = vweird.f32 %v296_v5  ;;  %v771_v53 = vrot.slane %v4371_v57, 6 }
 0x111   :  { %3851 = vset.pattern.permute.xlu1 %v7192_v39  ;;  %v4709_v10 = vpop.permute.xlu2 %560  ;;  %v570_v39 = vrot.slane %v4367_v55, 7 }
 0x112   :  { %7198 = vst [vmem:[#allocation48_spill] sm:$0xff] %v4709_v10  ;;  %483 = vperm.xlu1 %3851, %v4385_v60   ;;  %v568_v10 = vrot.slane %v4380_v59, 7  ;;  %v7070_v59 = vrot.slane %v4396_v4, 7 }
 0x114   :  { %v4712_v3 = vpop.permute.xlu0 %967  ;;  %v4714_v16 = vpop.permute.xlu1 %1703  ;;  %v4748_v55 = vsel %vm7140_vm0, %v568_v10, %v570_v39 }
 0x115   :  { %7199 = vst [vmem:[#allocation49_spill] sm:$0xff] %v4712_v3  ;;  %v4005_v25 = vpop.eup %4004  ;;  %v572_v3 = vrot.slane %v4393_v63, 7  ;;  %v773_v63 = vrot.slane %v4415_v14, 6 }
 0x116   :  { %7200 = vst [vmem:[#allocation50_spill] sm:$0xff] %v4714_v16  ;;  %v298_v22 = vmul.f32 %v4005_v25, %v296_v5  ;;  %vm304_vm5 = vweird.f32 %v4005_v25 }
 0x117   :  { %3852 = vset.pattern.permute.xlu2 %v7193_v32  ;;  %v7201_v32 = vmov 5   ;;  %v4751_v14 = vsel %vm7140_vm0, %v570_v39, %v572_v3  ;;  %vm305_vm6 = vmor %vm303_vm4, %vm304_vm5  ;;  %v4768_v39 = vmul.f32 0.0, %v7070_v59  ;;  %v4772_v5 = vsel %vm761_vm3, %v771_v53, %v773_v63 }
 0x118   :  { %v299_v45 = vmul.f32 %v4005_v25, %v298_v22  ;;  %1031 = vperm.xlu2 %3852, %v4317_v42   ;;  %vm2500_vm4 = vcmask 195584   ;;  %vm2505_vm5 = vcmask 261120  }
 0x119   :  { %7205 = vst [vmem:[#allocation53_spill] sm:$0xff] %v4768_v39 }
 0x11a   :  { %v300_v31 = vmul.f32 0.5, %v299_v45  ;;  %3854 = vset.pattern.permute.xlu1 %v7201_v32  ;;  %v4730_v58 = vpop.permute.xlu2 %1405  ;;  %v4739_v45 = vsel %vm7140_vm0, %v574_v19, %v576_v51  ;;  %v767_v51 = vrot.slane %v4406_v8, 6 }
 0x11b   :  { %7202 = vst [vmem:[#allocation51_spill] sm:$0xff] %v4730_v58  ;;  %1229 = vperm.xlu1 %3854, %v4286_v34   ;;  %v7203_v58 = vrot.slane %v4369_v56, 7  ;;  %v295_v34 = vsub.f32 %v4642_v15, %v4686_v2  ;;  %v1057_v15 = vrot.slane %v4408_v9, 7  ;;  %v7206_v56 = vrot.slane %v4387_v61, 6 }
 0x11c   :  { %v301_v16 = vsub.f32 1.5, %v300_v31  ;;  %v4762_v31 = vsel %vm7140_vm0, %v572_v3, %v574_v19  ;;  %v4781_v8 = vsel %vm761_vm3, %v767_v51, %v769_v52  ;;  %v7209_v9 = vsub.f32 %v4580_v6, %v4686_v2 }
 0x11d   :  { %v4745_v22 = vsel %vm7140_vm0, %v7203_v58, %v568_v10  ;;  %v4757_v57 = vpop.permute.xlu0 %1496  ;;  %v4759_v23 = vpop.permute.xlu1 %545  ;;  %v765_v10 = vrot.slane %v4431_v24, 6  ;;  %7207 = vst [vmem:[#allocation54_spill] sm:$0xff] %v4781_v8  ;;  %v4784_v24 = vsel %vm761_vm3, %v769_v52, %v771_v53  ;;  %v284_v52 = vsub.f32 %v4472_v36, %v4686_v2 }
 0x11e   :  { %7204 = vst [vmem:[#allocation52_spill] sm:$0xff] %v4759_v23  ;;  %v302_v58 = vmul.f32 %v4005_v25, %v301_v16  ;;  %v4777_v23 = vsel %vm761_vm3, %v773_v63, %v7206_v56  ;;  %v7210_v56 = vsub.f32 %v4608_v26, %v4686_v2  ;;  %v285_v26 = vsub.f32 %v4483_v41, %v4686_v2 }
 0x11f   :  { %7208 = vst [vmem:[#allocation55_spill] sm:$0xff] %v4784_v24  ;;  %v4807_v6 = vsel %vm761_vm3, %v765_v10, %v767_v51  ;;  %v281_v41 = vsub.f32 %v4425_v21, %v4686_v2  ;;  %v1258_v21 = vrot.slane %v4550_v1, 6  ;;  %v1260_v51 = vrot.slane %v4481_v40, 6 }
 0x120   :  { %v4786_v16 = vsel %vm305_vm6, %v4005_v25, %v302_v58  ;;  %3855 = vset.pattern.permute.xlu2 %v7201_v32  ;;  %v7211_v25 = vrot.slane %v4361_v54, 6  ;;  %v286_v58 = vsub.f32 %v4512_v30, %v4686_v2  ;;  %vm2510_vm6 = vcmask 326656  }
 0x121   :  { %v320_v61 = vmul.f32 %v4786_v16, %v7209_v9  ;;  %v321_v3 = vmul.f32 %v4786_v16, %v7210_v56  ;;  %v322_v63 = vmul.f32 %v4786_v16, %v295_v34  ;;  %1232 = vperm.xlu2 %3855, %v4455_v0  }
 0x122   :  { %v4804_v53 = vsel %vm761_vm3, %v7211_v25, %v765_v10  ;;  %v280_v10 = vsub.f32 %v4412_v13, %v4686_v2  ;;  %v312_v13 = vmul.f32 %v4786_v16, %v285_v26  ;;  %v313_v54 = vmul.f32 %v4786_v16, %v286_v58 }
 0x123   :  { %v336_v9 = vmax.f32 %v320_v61, 0.0  ;;  %v337_v36 = vmax.f32 %v321_v3, 0.0  ;;  %v338_v56 = vmax.f32 %v322_v63, 0.0  ;;  %1241 = vperm.xlu1 %3854, %v4466_v33   ;;  %v4815_v59 = vpop.permute.xlu2 %1700  ;;  %v311_v3 = vmul.f32 %v4786_v16, %v284_v52 }
 0x124   :  { %v7218_v26 = vrot.slane %v4458_v11, 7  ;;  %v7221_v58 = vsub.f32 %v4585_v62, %v4686_v2  ;;  %v7225_v62 = vld [vmem:[#allocation33_spill] sm:$0xff] }
 0x125   :  { %v4823_v30 = vrot.slane %v336_v9, 7  ;;  %v398_v19 = vrot.slane %v337_v36, 7  ;;  %v4825_v61 = vrot.slane %v338_v56, 7  ;;  %v4828_v63 = vpop.permute.xlu0 %1514  ;;  %v4830_v34 = vpop.permute.xlu1 %557  ;;  %v282_v36 = vsub.f32 %v4437_v27, %v4686_v2 }
 0x126   :  { %7213 = vst [vmem:[#allocation57_spill] sm:$0xff] %v4828_v63  ;;  %v7217_v56 = vrot.slane %v4440_v28, 7  ;;  %v4855_v1 = vsel %vm7140_vm0, %v1057_v15, %v7218_v26  ;;  %v329_v26 = vmax.f32 %v313_v54, 0.0  ;;  %v316_v40 = vmul.f32 %v4786_v16, %v7221_v58  ;;  %v7226_v58 = vld [vmem:[#allocation27_spill] sm:$0xff] }
 0x127   :  { %7212 = vst [vmem:[#allocation56_spill] sm:$0xff] %v4825_v61  ;;  %v4839_v9 = vsel %vm7140_vm0, %v4823_v30, %v398_v19  ;;  %v4843_v52 = vsel %vm7140_vm0, %v398_v19, %v4825_v61  ;;  %v7219_v19 = vrot.slane %v4470_v35, 6  ;;  %v7220_v61 = vrot.slane %v4525_v12, 6 }
 0x128   :  { %7214 = vst [vmem:[#allocation58_spill] sm:$0xff] %v4830_v34  ;;  %v4850_v25 = vsel %vm7140_vm0, %v7217_v56, %v1057_v15  ;;  %v307_v56 = vmul.f32 %v4786_v16, %v280_v10  ;;  %v328_v15 = vmax.f32 %v312_v13, 0.0  ;;  %v7222_v34 = vsub.f32 %v4606_v50, %v4686_v2  ;;  %v7223_v10 = vld [vmem:[#allocation28_spill] sm:$0xff] }
 0x129   :  { %7215 = vst [vmem:[#allocation59_spill] sm:$0xff] %v4839_v9  ;;  %v4864_v27 = vsel %vm761_vm3, %v7220_v61, %v7219_v19  ;;  %v308_v9 = vmul.f32 %v4786_v16, %v281_v41  ;;  %1244 = vperm.xlu2 %3855, %v4340_v47   ;;  %v7224_v41 = vld [vmem:[#allocation17_spill] sm:$0xff]  ;;  %v309_v54 = vmul.f32 %v4786_v16, %v282_v36  ;;  %v332_v50 = vmax.f32 %v316_v40, 0.0 }
 0x12a   :  { %7216 = vst [vmem:[#allocation60_spill] sm:$0xff] %v4843_v52  ;;  %v327_v52 = vmax.f32 %v311_v3, 0.0  ;;  %v317_v61 = vmul.f32 %v4786_v16, %v7222_v34  ;;  %v4878_v3 = vsel %vm761_vm3, %v1258_v21, %v1260_v51  ;;  %v283_v47 = vsub.f32 %v7224_v41, %v4686_v2  ;;  %v7227_v34 = vld [vmem:[#allocation34_spill] sm:$0xff] }
 0x12b   :  { %1247 = vperm.xlu1 %3854, %v4300_v37   ;;  %v287_v12 = vsub.f32 %v7226_v58, %v4686_v2  ;;  %v1065_v29 = vrot.slane %v7227_v34, 7  ;;  %v323_v4 = vmax.f32 %v307_v56, 0.0  ;;  %v324_v19 = vmax.f32 %v308_v9, 0.0 }
 0x12c   :  { %v333_v28 = vmax.f32 %v317_v61, 0.0  ;;  %v4889_v39 = vrot.slane %v327_v52, 7  ;;  %v4891_v24 = vpop.permute.xlu2 %554  ;;  %v380_v41 = vrot.slane %v328_v15, 7  ;;  %v4893_v8 = vrot.slane %v329_v26, 7  ;;  %v7231_v61 = vld [vmem:[#allocation37_spill] sm:$0xff]  ;;  %v7234_v15 = vld [vmem:[#allocation35_spill] sm:$0xff] }
 0x12d   :  { %7228 = vst [vmem:[#allocation28_spill] sm:$0xff] %v4891_v24  ;;  %v4895_v36 = vrot.slane %v332_v50, 7  ;;  %v7229_v13 = vrot.slane %v7223_v10, 6  ;;  %v1061_v58 = vrot.slane %v7231_v61, 7  ;;  %v310_v52 = vmul.f32 %v4786_v16, %v283_v47  ;;  %v4906_v9 = vpop.permute.xlu0 %1520  ;;  %v4908_v34 = vpop.permute.xlu1 %563 }
 0x12e   :  { %v4897_v37 = vrot.slane %v333_v28, 7  ;;  %v325_v56 = vmax.f32 %v309_v54, 0.0  ;;  %7232 = vst [vmem:[#allocation27_spill] sm:$0xff] %v4906_v9  ;;  %v1543_v50 = vrot.slane %v4658_v20, 7  ;;  %v314_v28 = vmul.f32 %v4786_v16, %v287_v12 }
 0x12f   :  { %v4902_v40 = vsel %vm761_vm3, %v7229_v13, %v1258_v21  ;;  %7233 = vst [vmem:[#allocation34_spill] sm:$0xff] %v4908_v34  ;;  %v7236_v13 = vrot.slane %v4419_v18, 7  ;;  %v7237_v54 = vrot.slane %v7225_v62, 6  ;;  %v4928_v26 = vrot.slane %v323_v4, 7  ;;  %v7244_v62 = vld [vmem:[#allocation38_spill] sm:$0xff] }
 0x130   :  { %7230 = vst [vmem:[#allocation17_spill] sm:$0xff] %v4902_v40  ;;  %v4916_v21 = vsel %vm7140_vm0, %v4895_v36, %v4897_v37  ;;  %v372_v20 = vrot.slane %v324_v19, 7  ;;  %v7239_v9 = vmov 3   ;;  %v7240_v12 = vrot.slane %v4474_v38, 7 }
 0x131   :  { %7235 = vst [vmem:[#allocation37_spill] sm:$0xff] %v4916_v21  ;;  %v4921_v47 = vsel %vm7140_vm0, %v7236_v13, %v1065_v29  ;;  %v4926_v61 = vsel %vm761_vm3, %v1260_v51, %v7237_v54  ;;  %3857 = vset.pattern.permute.xlu2 %v7239_v9  ;;  %v4939_v13 = vsel %vm7140_vm0, %v380_v41, %v4893_v8  ;;  %v7241_v4 = vrot.slane %v4458_v11, 7 }
 0x132   :  { %7238 = vst [vmem:[#allocation61_spill] sm:$0xff] %v4928_v26  ;;  %v4934_v34 = vsel %vm7140_vm0, %v1065_v29, %v7240_v12  ;;  %v4943_v51 = vsel %vm7140_vm0, %v4889_v39, %v380_v41  ;;  %951 = vperm.xlu2 %3857, %v4455_v0   ;;  %v7242_v29 = vrot.slane %v4419_v18, 7  ;;  %v326_v12 = vmax.f32 %v310_v52, 0.0 }
 0x133   :  { %v4949_v19 = vsel %vm7140_vm0, %v7241_v4, %v1061_v58  ;;  %v374_v21 = vrot.slane %v325_v56, 7  ;;  %1226 = vperm.xlu1 %3854, %v4317_v42   ;;  %v7245_v41 = vrot.slane %v7234_v15, 7  ;;  %v330_v11 = vmax.f32 %v314_v28, 0.0 }
 0x134   :  { %v4954_v54 = vsel %vm7140_vm0, %v1061_v58, %v7242_v29  ;;  %v1541_v4 = vrot.slane %v4757_v57, 7  ;;  %v4967_v18 = vsel %vm7140_vm0, %v4928_v26, %v372_v20  ;;  %v619_v58 = vmul.f32 %v4739_v45, %v4943_v51 }
 0x135   :  { %7243 = vst [vmem:[#allocation62_spill] sm:$0xff] %v4954_v54  ;;  %v4961_v24 = vsel %vm7140_vm0, %v1543_v50, %v7245_v41  ;;  %v620_v52 = vmul.f32 %v4727_v48, %v4939_v13  ;;  %v4973_v56 = vpop.permute.xlu2 %747  ;;  %v7248_v29 = vrot.slane %v4672_v43, 6  ;;  %v7249_v28 = vrot.slane %v4470_v35, 6  ;;  %v7250_v41 = vld [vmem:[#allocation44_spill] sm:$0xff]  ;;  %v7252_v48 = vld [vmem:[#allocation31_spill] sm:$0xff] }
 0x136   :  { %7246 = vst [vmem:[#allocation38_spill] sm:$0xff] %v4967_v18  ;;  %v7086_v38 = vrot.slane %v4682_v49, 7  ;;  %v376_v26 = vrot.slane %v326_v12, 7  ;;  %v4983_v45 = vsel %vm7140_vm0, %v372_v20, %v374_v21  ;;  %v288_v15 = vsub.f32 %v7252_v48, %v4686_v2  ;;  %v4989_v54 = vpop.permute.xlu1 %1688 }
 0x137   :  { %7247 = vst [vmem:[#allocation63_spill] sm:$0xff] %v4973_v56  ;;  %v1255_v57 = vsel %vm761_vm3, %v7249_v28, %v7248_v29  ;;  %v4987_v56 = vpop.permute.xlu0 %1538  ;;  %v4991_v35 = vrot.slane %v330_v11, 7  ;;  %v4995_v29 = vmul.f32 %v4745_v22, %v4967_v18  ;;  %v4999_v12 = vmul.f32 %v4748_v55, %v4983_v45 }
 0x138   :  { %7251 = vst [vmem:[#allocation44_spill] sm:$0xff] %v4983_v45  ;;  %v1542_v20 = vsel %vm7140_vm0, %v7086_v38, %v1541_v4  ;;  %v659_v28 = vrot.slane %v619_v58, 1  ;;  %v661_v48 = vrot.slane %v620_v52, 1  ;;  %v5006_v40 = vmul.f32 %v4804_v53, %v4967_v18  ;;  %v7258_v53 = vld [vmem:[#allocation10_spill] sm:$0xff] }
 0x139   :  { %7253 = vst [vmem:[#allocation31_spill] sm:$0xff] %v4987_v56  ;;  %v5010_v11 = vmul.f32 %v4807_v6, %v4983_v45  ;;  %v816_v22 = vmul.f32 %v4772_v5, %v4943_v51  ;;  %v817_v55 = vmul.f32 %v4777_v23, %v4939_v13  ;;  %v7091_v38 = vrot.slane %v4999_v12, 1  ;;  %v7260_v5 = vld [vmem:[#allocation25_spill] sm:$0xff] }
 0x13a   :  { %7254 = vst [vmem:[#allocation64_spill] sm:$0xff] %v4995_v29  ;;  %3859 = vset.pattern.permute.xlu2 %v7201_v32  ;;  %v5020_v58 = vsel %vm7140_vm0, %v374_v21, %v376_v26  ;;  %v503_v52 = vmul.f32 %v7258_v53, %v4967_v18  ;;  %v5030_v23 = vsel %vm7140_vm0, %v376_v26, %v4889_v39  ;;  %v7261_v21 = vrot.slane %v4995_v29, 1 }
 0x13b   :  { %7255 = vst [vmem:[#allocation65_spill] sm:$0xff] %v4999_v12  ;;  %3860 = vset.pattern.permute.xlu1 %v7239_v9  ;;  %1238 = vperm.xlu2 %3859, %v4385_v60   ;;  %v507_v56 = vmul.f32 %v7260_v5, %v4943_v51  ;;  %v1544_v6 = vsel %vm7140_vm0, %v1541_v4, %v1543_v50  ;;  %v856_v29 = vrot.slane %v816_v22, 2  ;;  %v858_v12 = vrot.slane %v817_v55, 2 }
 0x13c   :  { %7256 = vst [vmem:[#allocation66_spill] sm:$0xff] %v5010_v11  ;;  %v654_v53 = vsel %vm647_vm7, %v7261_v21, %v7091_v38  ;;  %943 = vperm.xlu1 %3860, %v4317_v42   ;;  %v5044_v49 = vsel %vm7140_vm0, %v4893_v8, %v4991_v35  ;;  %v662_v39 = vsel %vm647_vm7, %v659_v28, %v661_v48  ;;  %v7262_v8 = vrot.slane %v5010_v11, 2 }
 0x13d   :  { %7257 = vst [vmem:[#allocation67_spill] sm:$0xff] %v5020_v58  ;;  %v699_v26 = vmax.f32 %v503_v52, %v654_v53  ;;  %v5048_v5 = vmul.f32 %v1542_v20, %v4983_v45  ;;  %v5050_v32 = vpop.permute.xlu2 %756  ;;  %v5054_v50 = vmul.f32 %v4850_v25, %v4983_v45  ;;  %v5057_v42 = vmul.f32 %v1544_v6, %v5020_v58 }
 0x13e   :  { %7259 = vst [vmem:[#allocation10_spill] sm:$0xff] %v5030_v23  ;;  %v7263_v4 = vrot.slane %v5006_v40, 2  ;;  %v5066_v20 = vmul.f32 %v4855_v1, %v5020_v58  ;;  %v315_v22 = vmul.f32 %v4786_v16, %v288_v15  ;;  %v5073_v25 = vmul.f32 %v1255_v57, %v5020_v58  ;;  %v7265_v57 = vld [vmem:[#allocation24_spill] sm:$0xff] }
 0x13f   :  { %v5070_v55 = vpop.permute.xlu0 %1691  ;;  %v703_v52 = vmax.f32 %v507_v56, %v662_v39  ;;  %v7093_v21 = vrot.slane %v5057_v42, 1  ;;  %v980_v53 = vmul.f32 %v4702_v46, %v4939_v13  ;;  %v1108_v1 = vmul.f32 %v4921_v47, %v4939_v13  ;;  %v5082_v15 = vpop.permute.xlu1 %542 }
 0x140   :  { %v851_v28 = vsel %vm844_vm8, %v7263_v4, %v7262_v8  ;;  %v331_v8 = vmax.f32 %v315_v22, 0.0  ;;  %v7264_v4 = vld [vmem:[#allocation29_spill] sm:$0xff]  ;;  %v859_v48 = vsel %vm844_vm8, %v856_v29, %v858_v12  ;;  %v1109_v56 = vmul.f32 %v4934_v34, %v5044_v49 }
 0x141   :  { %v896_v6 = vmax.f32 %v699_v26, %v851_v28  ;;  %v292_v38 = vsub.f32 %v7264_v4, %v4686_v2  ;;  %v976_v39 = vmul.f32 %v7265_v57, %v4983_v45  ;;  %v7266_v46 = vrot.slane %v5048_v5, 1  ;;  %v7268_v57 = vld [vmem:[#allocation41_spill] sm:$0xff] }
 0x142   :  { %v7094_v28 = vrot.slane %v5066_v20, 1  ;;  %v5100_v29 = vmul.f32 %v4864_v27, %v4983_v45  ;;  %v386_v12 = vrot.slane %v331_v8, 7  ;;  %v900_v34 = vmax.f32 %v703_v52, %v859_v48 }
 0x143   :  { %v5094_v47 = vsel %vm647_vm7, %v7266_v46, %v7093_v21  ;;  %3861 = vset.pattern.permute.xlu2 %v7239_v9  ;;  %v992_v22 = vmax.f32 %v896_v6, %v976_v39  ;;  %v319_v4 = vmul.f32 %v4786_v16, %v292_v38  ;;  %v291_v11 = vsub.f32 %v7268_v57, %v4686_v2 }
 0x144   :  { %7267 = vst [vmem:[#allocation25_spill] sm:$0xff] %v5094_v47  ;;  %v7269_v46 = vmov 7   ;;  %v1303_v26 = vmul.f32 %v4878_v3, %v4939_v13  ;;  %v1304_v27 = vmul.f32 %v4926_v61, %v5044_v49  ;;  %v5114_v8 = vsel %vm7140_vm0, %v386_v12, %v4895_v36  ;;  %959 = vperm.xlu2 %3861, %v4385_v60  }
 0x145   :  { %3862 = vset.pattern.permute.xlu1 %v7269_v46  ;;  %v1147_v38 = vrot.slane %v1108_v1, 1  ;;  %v5120_v2 = vsel %vm7140_vm0, %v4991_v35, %v386_v12  ;;  %v335_v48 = vmax.f32 %v319_v4, 0.0  ;;  %v318_v52 = vmul.f32 %v4786_v16, %v291_v11 }
 0x146   :  { %1523 = vperm.xlu1 %3862, %v4455_v0   ;;  %v5123_v3 = vpop.permute.xlu2 %1413  ;;  %v1149_v6 = vrot.slane %v1109_v56, 1  ;;  %v7270_v36 = vrot.slane %v5054_v50, 1  ;;  %v996_v1 = vmax.f32 %v900_v34, %v980_v53  ;;  %v7271_v16 = vrot.slane %v7244_v62, 7 }
 0x147   :  { %v394_v35 = vrot.slane %v335_v48, 7  ;;  %v334_v12 = vmax.f32 %v318_v52, 0.0  ;;  %v5132_v4 = vpop.permute.xlu0 %1709  ;;  %v7272_v11 = vrot.slane %v7250_v41, 7  ;;  %v1746_v57 = vrot.slane %v4679_v44, 6 }
 0x148   :  { %v1142_v61 = vsel %vm647_vm7, %v7270_v36, %v7094_v28  ;;  %v1738_v36 = vrot.slane %v4704_v17, 6  ;;  %v7273_v28 = vld [vmem:[#allocation50_spill] sm:$0xff]  ;;  %v1342_v21 = vrot.slane %v1303_v26, 2  ;;  %v1344_v0 = vrot.slane %v1304_v27, 2  ;;  %v5161_v27 = vpop.permute.xlu1 %744 }
 0x149   :  { %v1187_v39 = vmax.f32 %v992_v22, %v1142_v61  ;;  %v1552_v56 = vsel %vm7140_vm0, %v7272_v11, %v7271_v16  ;;  %v7095_v60 = vrot.slane %v7273_v28, 6  ;;  %v5144_v53 = vsel %vm7140_vm0, %v394_v35, %v4823_v30  ;;  %v7278_v11 = vld [vmem:[#allocation42_spill] sm:$0xff] }
 0x14a   :  { %v392_v34 = vrot.slane %v334_v12, 7  ;;  %v1150_v22 = vsel %vm647_vm7, %v1147_v38, %v1149_v6  ;;  %v7274_v48 = vrot.slane %v5073_v25, 2  ;;  %v7275_v52 = vrot.slane %v5100_v29, 2 }
 0x14b   :  { %v5154_v44 = vmul.f32 %v4961_v24, %v5030_v23  ;;  %v7276_v17 = vrot.slane %v4828_v63, 7  ;;  %v7277_v26 = vmov %v7271_v16  ;;  %v1191_v12 = vmax.f32 %v996_v1, %v1150_v22  ;;  %v5188_v22 = vld [vmem:[%s7013_s2 + $0x58] sm:$0xff] }
 0x14c   :  { %v1337_v61 = vsel %vm844_vm8, %v7275_v52, %v7274_v48  ;;  %v5165_v6 = vsel %vm7140_vm0, %v4897_v37, %v392_v34  ;;  %v5168_v16 = vsel %vm7140_vm0, %v392_v34, %v394_v35  ;;  %v1594_v48 = vmul.f32 %v1552_v56, %v5044_v49  ;;  %3863 = vset.pattern.permute.xlu2 %v7269_v46  ;;  %v7280_v37 = vld [vmem:[#allocation51_spill] sm:$0xff] }
 0x14d   :  { %v1554_v30 = vsel %vm7140_vm0, %v7277_v26, %v7276_v17  ;;  %v1382_v38 = vmax.f32 %v1187_v39, %v1337_v61  ;;  %v7279_v52 = vrot.slane %v4669_v7, 6  ;;  %v1747_v1 = vsel %vm761_vm3, %v7095_v60, %v1746_v57  ;;  %1526 = vperm.xlu2 %3863, %v5188_v22  }
 0x14e   :  { %1532 = vperm.xlu1 %3862, %v4466_v33   ;;  %v1462_v39 = vmul.f32 %v7280_v37, %v5020_v58  ;;  %v1595_v35 = vmul.f32 %v1554_v30, %v5120_v2  ;;  %v7096_v34 = vrot.slane %v4989_v54, 6  ;;  %v1736_v56 = vrot.slane %v5070_v55, 6 }
 0x14f   :  { %v1741_v62 = vsel %vm761_vm3, %v1738_v36, %v7279_v52  ;;  %v1345_v61 = vsel %vm844_vm8, %v1342_v21, %v1344_v0  ;;  %v1789_v17 = vmul.f32 %v1747_v1, %v5044_v49  ;;  %v5197_v30 = vpop.permute.xlu2 %473  ;;  %v7282_v24 = vrot.slane %v7223_v10, 6 }
 0x150   :  { %v5193_v33 = vmul.f32 %v1741_v62, %v5030_v23  ;;  %7281 = vst [vmem:[#allocation29_spill] sm:$0xff] %v5197_v30  ;;  %v1386_v52 = vmax.f32 %v1191_v12, %v1345_v61  ;;  %v1478_v55 = vmax.f32 %v1382_v38, %v1462_v39  ;;  %v1737_v37 = vsel %vm761_vm3, %v7096_v34, %v1736_v56  ;;  %v5220_v61 = vpop.permute.xlu0 %1715 }
 0x151   :  { %v1739_v60 = vsel %vm761_vm3, %v1736_v56, %v1738_v36  ;;  %v7283_v21 = vrot.slane %v4672_v43, 6  ;;  %v7284_v62 = vrot.slane %v7250_v41, 7  ;;  %v7285_v1 = vrot.slane %v7278_v11, 7  ;;  %v7286_v36 = vld [vmem:[#allocation12_spill] sm:$0xff]  ;;  %7287 = vst [vmem:[#allocation24_spill] sm:$0xff] %v5220_v61 }
 0x152   :  { %v5214_v12 = vmul.f32 %v1737_v37, %v4983_v45  ;;  %v1785_v38 = vmul.f32 %v1739_v60, %v5020_v58  ;;  %v1633_v39 = vrot.slane %v1594_v48, 1  ;;  %v1466_v56 = vmul.f32 %v7286_v36, %v5044_v49  ;;  %v5229_v48 = vpop.permute.xlu1 %753 }
 0x153   :  { %v1257_v0 = vsel %vm761_vm3, %v7283_v21, %v7282_v24  ;;  %v1550_v26 = vsel %vm7140_vm0, %v7285_v1, %v7284_v62  ;;  %v1635_v10 = vrot.slane %v1595_v35, 1  ;;  %v7098_v43 = vrot.slane %v5132_v4, 6 }
 0x154   :  { %v7288_v24 = vrot.slane %v5154_v44, 1  ;;  %v7289_v21 = vrot.slane %v5057_v42, 1  ;;  %v7097_v62 = vrot.slane %v5214_v12, 2  ;;  %v1820_v60 = vrot.slane %v1785_v38, 2 }
 0x155   :  { %v1482_v1 = vmax.f32 %v1386_v52, %v1466_v56  ;;  %v1828_v36 = vrot.slane %v1789_v17, 2  ;;  %v1749_v34 = vsel %vm761_vm3, %v1746_v57, %v7098_v43  ;;  %v7291_v42 = vrot.slane %v5193_v33, 2  ;;  %v5250_v17 = vld [vmem:[%s7013_s2 + $0x40] sm:$0xff] }
 0x156   :  { %v1628_v37 = vsel %vm647_vm7, %v7289_v21, %v7288_v24  ;;  %v5237_v41 = vsel %vm844_vm8, %v7097_v62, %v1820_v60  ;;  %v1790_v38 = vmul.f32 %v1749_v34, %v5120_v2  ;;  %v5245_v52 = vmul.f32 %v4751_v14, %v5020_v58  ;;  %1517 = vperm.xlu1 %3862, %v5250_v17   ;;  %v5260_v14 = vld [vmem:[%s7013_s2 + $0x70] sm:$0xff] }
 0x157   :  { %v1673_v35 = vmax.f32 %v1478_v55, %v1628_v37  ;;  %7290 = vst [vmem:[#allocation41_spill] sm:$0xff] %v5237_v41  ;;  %v1823_v24 = vsel %vm844_vm8, %v1820_v60, %v7291_v42  ;;  %v1742_v57 = vrot.slane %v4815_v59, 6  ;;  %v1636_v55 = vsel %vm647_vm7, %v1633_v39, %v1635_v10  ;;  %1535 = vperm.xlu2 %3863, %v5260_v14   ;;  %v7292_v60 = vld [vmem:[#allocation54_spill] sm:$0xff]  ;;  %v7293_v59 = vld [vmem:[#allocation55_spill] sm:$0xff] }
 0x158   :  { %v618_v21 = vmul.f32 %v4762_v31, %v5030_v23  ;;  %v1830_v34 = vrot.slane %v1790_v38, 2  ;;  %v5266_v42 = vmul.f32 %v7292_v60, %v5020_v58  ;;  %v815_v39 = vmul.f32 %v7293_v59, %v5030_v23  ;;  %v5277_v62 = vpop.permute.xlu2 %1037  ;;  %v7296_v60 = vld [vmem:[#allocation21_spill] sm:$0xff] }
 0x159   :  { %v1868_v56 = vmax.f32 %v1673_v35, %v1823_v24  ;;  %v1677_v10 = vmax.f32 %v1482_v1, %v1636_v55  ;;  %v5273_v35 = vmul.f32 %v4949_v19, %v5030_v23  ;;  %v7294_v24 = vld [vmem:[#allocation62_spill] sm:$0xff]  ;;  %7295 = vst [vmem:[#allocation50_spill] sm:$0xff] %v5277_v62  ;;  %v505_v37 = vmul.f32 %v7296_v60, %v5020_v58 }
 0x15a   :  { %v657_v31 = vrot.slane %v618_v21, 1  ;;  %v1107_v38 = vmul.f32 %v7294_v24, %v4943_v51  ;;  %v1831_v43 = vsel %vm844_vm8, %v1828_v36, %v1830_v34  ;;  %v854_v1 = vrot.slane %v815_v39, 2  ;;  %v7298_v24 = vld [vmem:[#allocation17_spill] sm:$0xff]  ;;  %v7300_v36 = vld [vmem:[#allocation35_spill] sm:$0xff] }
 0x15b   :  { %1884 = vst.msk [vmem:[#allocation2 + $0x10] sm:$0xff] %vm184_vm2, %v1868_v56  ;;  %v5284_v55 = vmul.f32 %v1257_v0, %v5030_v23  ;;  %v1872_v56 = vmax.f32 %v1677_v10, %v1831_v43  ;;  %v7297_v19 = vrot.slane %v5245_v52, 1  ;;  %v1302_v41 = vmul.f32 %v7298_v24, %v4943_v51  ;;  %v5300_v10 = vpop.permute.xlu1 %1397 }
 0x15c   :  { %v7299_v47 = vrot.slane %v7278_v11, 7  ;;  %v7301_v34 = vrot.slane %v7300_v36, 7  ;;  %v1593_v59 = vmul.f32 %v1550_v26, %v4939_v13  ;;  %v7302_v39 = vrot.slane %v4669_v7, 6  ;;  %v5310_v36 = vpop.permute.xlu0 %1733  ;;  %v7306_v7 = vld [vmem:[#allocation8_spill] sm:$0xff] }
 0x15d   :  { %v658_v21 = vsel %vm647_vm7, %v7297_v19, %v657_v31  ;;  %v7303_v31 = vrot.slane %v7273_v28, 6  ;;  %1888 = vst.msk [vmem:[#allocation2 + $0x30] sm:$0xff] %vm184_vm2, %v1872_v56  ;;  %v7304_v11 = vrot.slane %v5266_v42, 2  ;;  %v1145_v26 = vrot.slane %v1107_v38, 1  ;;  %v7313_v38 = vld [vmem:[#allocation15_spill] sm:$0xff] }
 0x15e   :  { %v1548_v60 = vsel %vm7140_vm0, %v7301_v34, %v7299_v47  ;;  %v1743_v0 = vsel %vm761_vm3, %v7302_v39, %v1742_v57  ;;  %v701_v43 = vmax.f32 %v505_v37, %v658_v21  ;;  %7305 = vst [vmem:[#allocation42_spill] sm:$0xff] %v5310_v36  ;;  %v7307_v34 = vrot.slane %v7306_v7, 7  ;;  %v7308_v37 = vld [vmem:[#allocation9_spill] sm:$0xff] }
 0x15f   :  { %v1745_v19 = vsel %vm761_vm3, %v1742_v57, %v7303_v31  ;;  %v855_v24 = vsel %vm844_vm8, %v7304_v11, %v854_v1  ;;  %v7309_v21 = vrot.slane %v7308_v37, 7  ;;  %v7310_v57 = vld [vmem:[#allocation32_spill] sm:$0xff]  ;;  %v5320_v56 = vmul.f32 %v1548_v60, %v4943_v51  ;;  %v7312_v1 = vld [vmem:[#allocation53_spill] sm:$0xff] }
 0x160   :  { %v898_v28 = vmax.f32 %v701_v43, %v855_v24  ;;  %v978_v31 = vmul.f32 %v7310_v57, %v5030_v23  ;;  %v7311_v58 = vmov 8   ;;  %v648_v11 = vrot.slane %v7312_v1, 1  ;;  %v5330_v43 = vld [vmem:[%s7013_s2 + $0x60] sm:$0xff]  ;;  %v5336_v60 = vld [vmem:[%s7013_s2 + $0x50] sm:$0xff] }
 0x161   :  { %v567_v39 = vsel %vm7140_vm0, %v7309_v21, %v7307_v34  ;;  %3865 = vset.pattern.permute.xlu1 %v7311_v58  ;;  %v7314_v47 = vrot.slane %v7313_v38, 6  ;;  %v1340_v46 = vrot.slane %v1302_v41, 2  ;;  %1529 = vperm.xlu2 %3863, %v5330_v43   ;;  %v7315_v24 = vld [vmem:[#allocation16_spill] sm:$0xff]  ;;  %v1788_v41 = vmul.f32 %v1745_v19, %v4939_v13  ;;  %v7316_v21 = vld [vmem:[#allocation7_spill] sm:$0xff] }
 0x162   :  { %1718 = vperm.xlu1 %3865, %v5336_v60   ;;  %v1054_v34 = vrot.slane %v7315_v24, 7  ;;  %v994_v37 = vmax.f32 %v898_v28, %v978_v31  ;;  %v7317_v57 = vrot.slane %v7316_v21, 6  ;;  %v7318_v1 = vrot.slane %v7313_v38, 6  ;;  %v7319_v23 = vld [vmem:[#allocation36_spill] sm:$0xff]  ;;  %v5353_v24 = vpop.permute.xlu2 %1046  ;;  %v7322_v28 = vld [vmem:[#allocation61_spill] sm:$0xff] }
 0x163   :  { %v810_v45 = vmul.f32 0.0, %v7314_v47  ;;  %v5341_v47 = vmul.f32 %v1743_v0, %v4943_v51  ;;  %v1249_v36 = vrot.slane %v7319_v23, 6  ;;  %v1631_v63 = vrot.slane %v1593_v59, 1  ;;  %7321 = vst [vmem:[#allocation51_spill] sm:$0xff] %v5353_v24 }
 0x164   :  { %v764_v7 = vsel %vm761_vm3, %v7318_v1, %v7317_v57  ;;  %v7320_v61 = vrot.slane %v5273_v35, 1  ;;  %v1464_v13 = vmul.f32 %v5123_v3, %v4943_v51  ;;  %v5360_v31 = vsel %vm7140_vm0, 0.0, %v7322_v28  ;;  %v5375_v1 = vpop.permute.xlu1 %750 }
 0x165   :  { %7323 = vst [vmem:[#allocation12_spill] sm:$0xff] %v5360_v31  ;;  %v845_v38 = vrot.slane %v810_v45, 2  ;;  %v7324_v23 = vrot.slane %v5284_v55, 2  ;;  %v5366_v21 = vmul.f32 %v567_v39, %v5360_v31  ;;  %v1102_v39 = vmul.f32 %v1054_v34, %v5360_v31 }
 0x166   :  { %v1146_v9 = vsel %vm647_vm7, %v7320_v61, %v1145_v26  ;;  %v5369_v61 = vmul.f32 %v764_v7, %v5360_v31  ;;  %7327 = vst [vmem:[#allocation54_spill] sm:$0xff] %v5375_v1  ;;  %v7328_v7 = vld [vmem:[#allocation13_spill] sm:$0xff] }
 0x167   :  { %v1189_v0 = vmax.f32 %v994_v37, %v1146_v9  ;;  %v1341_v59 = vsel %vm844_vm8, %v7324_v23, %v1340_v46  ;;  %v7325_v9 = vld [vmem:[#allocation14_spill] sm:$0xff]  ;;  %v1826_v37 = vrot.slane %v1788_v41, 2  ;;  %v501_v23 = vmul.f32 0.0, %v7328_v7  ;;  %v5398_v7 = vpop.permute.xlu0 %1712 }
 0x168   :  { %v7326_v26 = vrot.slane %v7325_v9, 7  ;;  %v7329_v9 = vld [vmem:[#allocation26_spill] sm:$0xff]  ;;  %v7331_v41 = vrot.slane %v5320_v56, 1  ;;  %v7333_v46 = vrot.slane %v5366_v21, 1  ;;  %v7338_v45 = vrot.slane %v5369_v61, 2 }
 0x169   :  { %v1384_v57 = vmax.f32 %v1189_v0, %v1341_v59  ;;  %v7330_v19 = vrot.slane %v7329_v9, 6  ;;  %v7332_v59 = vld [vmem:[#allocation47_spill] sm:$0xff]  ;;  %3866 = vset.pattern.permute.xlu2 %v7311_v58  ;;  %v1136_v1 = vrot.slane %v1102_v39, 1  ;;  %v7342_v39 = vld [vmem:[#allocation28_spill] sm:$0xff] }
 0x16a   :  { %v1056_v51 = vsel %vm7140_vm0, %v1054_v34, %v7326_v26  ;;  %v1632_v0 = vsel %vm647_vm7, %v7331_v41, %v1631_v63  ;;  %v650_v34 = vsel %vm647_vm7, %v648_v11, %v7333_v46  ;;  %v7334_v63 = vld [vmem:[#allocation11_spill] sm:$0xff]  ;;  %1721 = vperm.xlu2 %3866, %v5188_v22   ;;  %v847_v24 = vsel %vm844_vm8, %v845_v38, %v7338_v45  ;;  %v7341_v38 = vld [vmem:[#allocation58_spill] sm:$0xff] }
 0x16b   :  { %v5381_v28 = vmul.f32 %v1056_v51, %v4967_v18  ;;  %v1251_v26 = vsel %vm761_vm3, %v1249_v36, %v7330_v19  ;;  %v1480_v3 = vmax.f32 %v1384_v57, %v1464_v13  ;;  %v1297_v51 = vmul.f32 %v1249_v36, %v5360_v31  ;;  %v4029_v13 = vld [vmem:[%s7013_s2 + $0x68] sm:$0xff]  ;;  %v7335_v57 = vld [vmem:[#allocation45_spill] sm:$0xff] }
 0x16c   :  { %v5396_v62 = vmul.f32 %v1251_v26, %v4967_v18  ;;  %1727 = vperm.xlu1 %3865, %v4029_v13   ;;  %v586_v19 = vrot.slane %v7334_v63, 7  ;;  %v7336_v9 = vrot.slane %v7335_v57, 7  ;;  %v697_v36 = vmax.f32 %v501_v23, %v650_v34  ;;  %v7339_v57 = vld [vmem:[#allocation40_spill] sm:$0xff]  ;;  %v5419_v23 = vpop.permute.xlu2 %463 }
 0x16d   :  { %v1675_v46 = vmax.f32 %v1480_v3, %v1632_v0  ;;  %v7337_v26 = vrot.slane %v5341_v47, 2  ;;  %v7106_v3 = vrot.slane %v5398_v7, 6  ;;  %v7340_v22 = vrot.slane %v7332_v59, 7 }
 0x16e   :  { %v1588_v11 = vmul.f32 %v7336_v9, %v4967_v18  ;;  %v894_v30 = vmax.f32 %v697_v36, %v847_v24  ;;  %v974_v9 = vmul.f32 %v7339_v57, %v5360_v31  ;;  %v1331_v0 = vrot.slane %v1297_v51, 2  ;;  %v7344_v57 = vld [vmem:[#allocation48_spill] sm:$0xff]  ;;  %v7345_v51 = vld [vmem:[#allocation34_spill] sm:$0xff] }
 0x16f   :  { %v1827_v41 = vsel %vm844_vm8, %v7337_v26, %v1826_v37  ;;  %v587_v37 = vsel %vm7140_vm0, %v7340_v22, %v586_v19  ;;  %v590_v45 = vrot.slane %v7341_v38, 7  ;;  %v588_v26 = vrot.slane %v7342_v39, 7 }
 0x170   :  { %v1870_v63 = vmax.f32 %v1675_v46, %v1827_v41  ;;  %v990_v24 = vmax.f32 %v894_v30, %v974_v9  ;;  %v7343_v46 = vrot.slane %v5132_v4, 6  ;;  %v5433_v41 = vpop.permute.xlu1 %1034  ;;  %v592_v22 = vrot.slane %v7344_v57, 7 }
 0x171   :  { %v594_v13 = vrot.slane %v7345_v51, 7  ;;  %v7346_v34 = vrot.slane %v5381_v28, 1  ;;  %v1622_v30 = vrot.slane %v1588_v11, 1  ;;  %v7348_v57 = vrot.slane %v4989_v54, 6 }
 0x172   :  { %1886 = vst.msk [vmem:[#allocation2 + $0x20] sm:$0xff] %vm184_vm2, %v1870_v63  ;;  %v1751_v36 = vsel %vm761_vm3, %v7343_v46, %v7106_v3  ;;  %v7347_v63 = vld [vmem:[#allocation37_spill] sm:$0xff]  ;;  %v1460_v46 = vmul.f32 %v5300_v10, %v4967_v18  ;;  %v7349_v31 = vrot.slane %v5396_v62, 2  ;;  %v7350_v11 = vmov 6   ;;  %1730 = vperm.xlu2 %3866, %v5260_v14  }
 0x173   :  { %v1138_v38 = vsel %vm647_vm7, %v1136_v1, %v7346_v34  ;;  %v5441_v39 = vmul.f32 %v1751_v36, %v5114_v8  ;;  %v5444_v9 = vmul.f32 %v587_v37, %v7347_v63  ;;  %v1783_v3 = vmul.f32 %v7348_v57, %v4967_v18  ;;  %v7351_v37 = vld [vmem:[#allocation52_spill] sm:$0xff] }
 0x174   :  { %v1185_v4 = vmax.f32 %v990_v24, %v1138_v38  ;;  %v1333_v1 = vsel %vm844_vm8, %v1331_v0, %v7349_v31  ;;  %3867 = vset.pattern.permute.xlu1 %v7350_v11  ;;  %v582_v36 = vrot.slane %v7351_v37, 7  ;;  %v593_v24 = vsel %vm7140_vm0, %v590_v45, %v592_v22  ;;  %v1930_v31 = vld [vmem:[%s7014_s3] sm:$0x3] }
 0x175   :  { %v589_v10 = vsel %vm7140_vm0, %v586_v19, %v588_v26  ;;  %1437 = vperm.xlu1 %3867, %v5336_v60   ;;  %v591_v54 = vsel %vm7140_vm0, %v588_v26, %v590_v45  ;;  %v595_v57 = vsel %vm7140_vm0, %v592_v22, %v594_v13  ;;  %v789_v0 = vrot.slane %v5050_v32, 6  ;;  %v5478_v26 = vpop.permute.xlu2 %1031  ;;  %v7355_v22 = vld [vmem:[#allocation59_spill] sm:$0xff] }
 0x176   :  { %v1380_v38 = vmax.f32 %v1185_v4, %v1333_v1  ;;  %v4073_v34 = vmov 65535   ;;  %v1817_v19 = vrot.slane %v1783_v3, 2  ;;  %v7352_v4 = vrot.slane %v5082_v15, 7 }
 0x177   :  { %v1939_v51 = vsel %vm7140_vm0, 4294967295, %v4073_v34  ;;  %v7353_v60 = vrot.slane %v5048_v5, 1  ;;  %v5481_v32 = vmul.f32 %v593_v24, %v5144_v53 }
 0x178   :  { %v1476_v37 = vmax.f32 %v1380_v38, %v1460_v46  ;;  %v583_v1 = vsel %vm7140_vm0, %v7352_v4, %v582_v36  ;;  %v5476_v13 = vsel %vm761_vm3, %v1939_v51, 0  ;;  %v5484_v46 = vmul.f32 %v595_v57, %v7355_v22  ;;  %v5487_v38 = vpop.permute.xlu1 %1040  ;;  %v7356_v4 = vld [vmem:[#allocation20_spill] sm:$0xff] }
 0x179   :  { %v1624_v45 = vsel %vm647_vm7, %v1622_v30, %v7353_v60  ;;  %7354 = vst [vmem:[#allocation55_spill] sm:$0xff] %v5476_v13  ;;  %v1942_v34 = vand.u32 %v5476_v13, %v1930_v31  ;;  %v791_v5 = vrot.slane %v7356_v4, 6  ;;  %v5491_v30 = vmul.f32 %v589_v10, %v5165_v6  ;;  %v7358_v31 = vld [vmem:[#allocation22_spill] sm:$0xff]  ;;  %v7359_v4 = vld [vmem:[#allocation23_spill] sm:$0xff] }
 0x17a   :  { %v1671_v3 = vmax.f32 %v1476_v37, %v1624_v45  ;;  %v5494_v51 = vmul.f32 %v591_v54, %v5168_v16  ;;  %v7357_v60 = vrot.slane %v5214_v12, 2  ;;  %v5500_v57 = vmul.f32 %v583_v1, %v5120_v2  ;;  %3868 = vset.pattern.permute.xlu2 %v7350_v11 }
 0x17b   :  { %1951 = vmatpush.bf16.msra.mxu1 %v1942_v34  ;;  %v818_v45 = vmul.f32 %v7358_v31, %v5044_v49  ;;  %v819_v18 = vmul.f32 %v7359_v4, %v5120_v2  ;;  %v7360_v54 = vrot.slane %v7332_v59, 7  ;;  %v792_v12 = vsel %vm761_vm3, %v789_v0, %v791_v5  ;;  %v1904_v31 = vld [vmem:[#allocation2 + $0x30] ss:$2 sm:$0xf]  ;;  %1453 = vperm.xlu2 %3868, %v5260_v14  }
 0x17c   :  { %v1819_v24 = vsel %vm844_vm8, %v1817_v19, %v7357_v60  ;;  %v675_v19 = vrot.slane %v5481_v32, 1  ;;  %v677_v1 = vrot.slane %v5484_v46, 1  ;;  %v7361_v60 = vld [vmem:[#allocation63_spill] sm:$0xff]  ;;  %v825_v46 = vmul.f32 %v792_v12, %v7355_v22  ;;  %v7365_v12 = vld [vmem:[#allocation64_spill] sm:$0xff] }
 0x17d   :  { %v1866_v37 = vmax.f32 %v1671_v3, %v1819_v24  ;;  %v585_v13 = vsel %vm7140_vm0, %v582_v36, %v7360_v54  ;;  %v787_v3 = vrot.slane %v5229_v48, 6  ;;  %v783_v24 = vrot.slane %v7361_v60, 6  ;;  %3869 = vset.pattern.permute.xlu1 %v7311_v58 }
 0x17e   :  { %v623_v34 = vmul.f32 %v585_v13, %v5114_v8  ;;  %v860_v59 = vrot.slane %v818_v45, 2  ;;  %v862_v36 = vrot.slane %v819_v18, 2  ;;  %1724 = vperm.xlu1 %3869, %v5330_v43   ;;  %v781_v13 = vrot.slane %v5161_v27, 6  ;;  %v7363_v45 = vld [vmem:[#allocation65_spill] sm:$0xff] }
 0x17f   :  { %1882 = vst.msk [vmem:[#allocation2] sm:$0xff] %vm184_vm2, %v1866_v37  ;;  %v1900_v37 = vld [vmem:[#allocation2 + $0x10] ss:$2 sm:$0xf]  ;;  %v7362_v18 = vrot.slane %v5245_v52, 1  ;;  %v7364_v5 = vrot.slane %v7363_v45, 1  ;;  %v790_v27 = vsel %vm761_vm3, %v787_v3, %v789_v0  ;;  %v5548_v52 = vpop.permute.xlu2 %1232 }
 0x180   :  { %v5527_v54 = vsel %vm844_vm8, %v860_v59, %v862_v36  ;;  %v7366_v10 = vrot.slane %v7365_v12, 1  ;;  %v7367_v4 = vrot.slane %v5366_v21, 1  ;;  %v1917_v43 = vrot.slane %v1904_v31, 4  ;;  %v5546_v59 = vpop.permute.xlu1 %1052  ;;  %v7379_v12 = vld [vmem:[#allocation66_spill] sm:$0xff] }
 0x181   :  { %v5534_v32 = vsel %vm647_vm7, %v7364_v5, %v7362_v18  ;;  %v7369_v36 = vrot.slane %v5006_v40, 2  ;;  %v7370_v5 = vrot.slane %v5369_v61, 2  ;;  %v7372_v21 = vrot.slane %v5054_v50, 1 }
 0x182   :  { %v5541_v14 = vsel %vm647_vm7, %v7367_v4, %v7366_v10  ;;  %v7373_v10 = vrot.slane %v5381_v28, 1  ;;  %v1914_v0 = vrot.slane %v1900_v37, 4  ;;  %v7375_v31 = vrot.slane %v5100_v29, 2 }
 0x183   :  { %7368 = vst [vmem:[#allocation62_spill] sm:$0xff] %v5541_v14  ;;  %v5555_v18 = vsel %vm844_vm8, %v7370_v5, %v7369_v36  ;;  %v7376_v45 = vrot.slane %v5396_v62, 2  ;;  %v7378_v61 = vrot.slane %v5266_v42, 2  ;;  %v7380_v36 = vrot.slane %v7379_v12, 2  ;;  %1429 = vperm.xlu2 %3868, %v5250_v17   ;;  %v7397_v17 = vld [vmem:[#allocation29_spill] sm:$0xff] }
 0x184   :  { %7371 = vst [vmem:[#allocation21_spill] sm:$0xff] %v5555_v18  ;;  %v5562_v4 = vsel %vm647_vm7, %v7373_v10, %v7372_v21  ;;  %v7381_v28 = vrot.slane %v5273_v35, 1  ;;  %v7382_v5 = vrot.slane %v5066_v20, 1  ;;  %v7384_v29 = vrot.slane %v5284_v55, 2  ;;  %v7393_v55 = vld [vmem:[#allocation18_spill] sm:$0xff] }
 0x185   :  { %7374 = vst [vmem:[#allocation17_spill] sm:$0xff] %v5562_v4  ;;  %v5569_v40 = vsel %vm844_vm8, %v7376_v45, %v7375_v31  ;;  %v5576_v50 = vsel %vm844_vm8, %v7380_v36, %v7378_v61  ;;  %v7385_v62 = vrot.slane %v5073_v25, 2  ;;  %v7387_v42 = vrot.slane %v5320_v56, 1  ;;  %v1902_v36 = vld [vmem:[#allocation2 + $0x20] ss:$2 sm:$0xf] }
 0x186   :  { %7377 = vst [vmem:[#allocation35_spill] sm:$0xff] %v5569_v40  ;;  %v5583_v37 = vsel %vm647_vm7, %v7382_v5, %v7381_v28  ;;  %v7388_v10 = vrot.slane %v5154_v44, 1  ;;  %v7390_v35 = vrot.slane %v5341_v47, 2  ;;  %v7391_v20 = vrot.slane %v5193_v33, 2 }
 0x187   :  { %7383 = vst [vmem:[#allocation8_spill] sm:$0xff] %v5583_v37  ;;  %v5590_v21 = vsel %vm844_vm8, %v7385_v62, %v7384_v29  ;;  %v7394_v61 = vrot.slane %v7393_v55, 6  ;;  %v1898_v12 = vld [vmem:[#allocation2] ss:$2 sm:$0xf]  ;;  %v824_v56 = vmul.f32 %v790_v27, %v5144_v53  ;;  %v1927_v28 = vsel %vm1925_vm9, %v1902_v36, %v1917_v43 }
 0x188   :  { %7386 = vst [vmem:[#allocation9_spill] sm:$0xff] %v5590_v21  ;;  %v5597_v31 = vsel %vm647_vm7, %v7388_v10, %v7387_v42  ;;  %v5604_v45 = vsel %vm844_vm8, %v7391_v20, %v7390_v35  ;;  %v1926_v44 = vsel %vm1925_vm9, %v1898_v12, %v1914_v0  ;;  %v667_v5 = vrot.slane %v623_v34, 1  ;;  %v7396_v27 = vld [vmem:[#allocation30_spill] sm:$0xff]  ;;  %v7398_v20 = vld [vmem:[#allocation49_spill] sm:$0xff] }
 0x189   :  { %7389 = vst [vmem:[#allocation32_spill] sm:$0xff] %v5597_v31  ;;  %v782_v25 = vsel %vm761_vm3, %v7394_v61, %v781_v13  ;;  %v5612_v29 = vpack.c.bf16 %v1927_v28, %v1926_v44  ;;  %v874_v47 = vrot.slane %v825_v46, 2  ;;  %v784_v33 = vsel %vm761_vm3, %v781_v13, %v783_v24  ;;  %v5625_v46 = vpop.permute.xlu2 %1244  ;;  %v484_v13 = vpop.permute.xlu1 %483  ;;  %v7416_v21 = vld [vmem:[#allocation6_spill] sm:$0xff] }
 0x18a   :  { %7392 = vst [vmem:[#allocation53_spill] sm:$0xff] %v5604_v45  ;;  %v7395_v62 = vmov 1   ;;  %v820_v42 = vmul.f32 %v782_v25, %v5114_v8  ;;  %v515_v43 = vmul.f32 %v7396_v27, %v5144_v53  ;;  %v678_v34 = vsel %vm647_vm7, %v675_v19, %v677_v1 }
 0x18b   :  { %3871 = vset.pattern.permute.xlu1 %v7395_v62  ;;  %3699 = vmatmul.msk.bf16.vlgmr.msra.gmra.mxu1 %vm184_vm2, %v5612_v29  ;;  %v872_v0 = vrot.slane %v824_v56, 2  ;;  %v821_v10 = vmul.f32 %v784_v33, %v7347_v63  ;;  %v511_v35 = vmul.f32 %v7397_v17, %v5114_v8  ;;  %v5632_v55 = vmul.f32 %v7398_v20, %v7355_v22  ;;  %v7402_v17 = vld [vmem:[#allocation43_spill] sm:$0xff] }
 0x18c   :  { %v864_v61 = vrot.slane %v820_v42, 2  ;;  %v711_v25 = vmax.f32 %v515_v43, %v678_v34  ;;  %v7399_v19 = vrot.slane %v5444_v9, 1  ;;  %3872 = vset.pattern.permute.xlu2 %v7395_v62  ;;  %v7400_v9 = vld [vmem:[#allocation54_spill] sm:$0xff]  ;;  %v7403_v20 = vld [vmem:[#allocation51_spill] sm:$0xff]  ;;  %v7405_v34 = vrot.slane %v5494_v51, 1 }
 0x18d   :  { %v875_v12 = vsel %vm844_vm8, %v872_v0, %v874_v47  ;;  %v866_v36 = vrot.slane %v821_v10, 2  ;;  %v7401_v0 = vld [vmem:[#allocation39_spill] sm:$0xff]  ;;  %v7415_v31 = vrot.slane %v5082_v15, 7  ;;  %v7417_v37 = vrot.slane %v7416_v21, 7 }
 0x18e   :  { %v670_v1 = vsel %vm647_vm7, %v667_v5, %v7399_v19  ;;  %v5638_v56 = vmax.f32 %v711_v25, %v875_v12  ;;  %v785_v5 = vrot.slane %v7400_v9, 6  ;;  %v1081_v10 = vrot.slane %v7401_v0, 7  ;;  %v7404_v19 = vld [vmem:[#allocation46_spill] sm:$0xff] }
 0x18f   :  { %v707_v44 = vmax.f32 %v511_v35, %v670_v1  ;;  %v867_v27 = vsel %vm844_vm8, %v864_v61, %v866_v36  ;;  %v1077_v35 = vrot.slane %v7402_v17, 7  ;;  %v1079_v25 = vrot.slane %v7403_v20, 7 }
 0x190   :  { %v786_v61 = vsel %vm761_vm3, %v783_v24, %v785_v5  ;;  %v788_v12 = vsel %vm761_vm3, %v785_v5, %v787_v3  ;;  %v1075_v36 = vrot.slane %v5487_v38, 7  ;;  %v7110_v1 = vrot.slane %v7404_v19, 6 }
 0x191   :  { %v952_v33 = vpop.permute.xlu2 %951  ;;  %v5644_v42 = vmax.f32 %v707_v44, %v867_v27  ;;  %v5649_v43 = vpop.permute.xlu1 %1229  ;;  %v822_v27 = vmul.f32 %v786_v61, %v5165_v6  ;;  %v823_v9 = vmul.f32 %v788_v12, %v5168_v16  ;;  %v1080_v24 = vsel %vm7140_vm0, %v1077_v35, %v1079_v25 }
 0x192   :  { %v5647_v47 = vmul.f32 %v952_v33, %v7347_v63  ;;  %v1082_v48 = vsel %vm7140_vm0, %v1079_v25, %v1081_v10  ;;  %v1078_v3 = vsel %vm7140_vm0, %v1075_v36, %v1077_v35  ;;  %v513_v38 = vmul.f32 %v484_v13, %v5165_v6 }
 0x193   :  { %v1115_v12 = vmul.f32 %v1080_v24, %v5144_v53  ;;  %v5684_v25 = vmul.f32 %v1082_v48, %v7355_v22  ;;  %v868_v35 = vrot.slane %v822_v27, 2  ;;  %v1114_v13 = vmul.f32 %v1078_v3, %v5168_v16 }
 0x194   :  { %v1268_v3 = vrot.slane %v5548_v52, 6  ;;  %v581_v40 = vsel %vm7140_vm0, %v7417_v37, %v7415_v31  ;;  %v7418_v15 = vmax.f32 %v5644_v42, %v5647_v47  ;;  %v7422_v18 = vrot.slane %v5478_v26, 7 }
 0x195   :  { %v1161_v48 = vrot.slane %v1115_v12, 1  ;;  %v1163_v27 = vrot.slane %v5684_v25, 1  ;;  %v1159_v51 = vrot.slane %v1114_v13, 1  ;;  %v7113_v25 = vrot.slane %v5478_v26, 7  ;;  %v7407_v13 = vld [vmem:[#allocation50_spill] sm:$0xff] }
 0x196   :  { %v1073_v52 = vrot.slane %v7407_v13, 7  ;;  %v7427_v26 = vrot.slane %v5398_v7, 6 }
 0x199   :  { %v5665_v44 = vpop.permute.xlu1 %1241  ;;  %v1239_v33 = vpop.permute.xlu2 %1238 }
 0x19a   :  { %v7111_v0 = vrot.slane %v5665_v44, 6  ;;  %v1272_v60 = vrot.slane %v1239_v33, 6  ;;  %v870_v33 = vrot.slane %v823_v9, 2  ;;  %v5701_v9 = vld [vmem:[%s7015_s4] sm:$0xff] }
 0x19b   :  { %2070 = vperm.xlu1 %3871, %v5701_v9   ;;  %2157 = vperm.xlu0 %3877, %v5701_v9  }
 0x19c   :  { %v1273_v5 = vsel %vm761_vm3, %v7110_v1, %v1272_v60  ;;  %v1275_v17 = vsel %vm761_vm3, %v1272_v60, %v7111_v0  ;;  %v7406_v1 = vrot.slane %v5491_v30, 1 }
 0x19d   :  { %v1309_v20 = vmul.f32 %v1273_v5, %v5168_v16  ;;  %v1310_v61 = vmul.f32 %v1275_v17, %v5144_v53  ;;  %v1083_v17 = vrot.slane %v5546_v59, 7 }
 0x19e   :  { %v674_v28 = vsel %vm647_vm7, %v7406_v1, %v7405_v34  ;;  %v871_v34 = vsel %vm844_vm8, %v868_v35, %v870_v33 }
 0x19f   :  { %v1354_v60 = vrot.slane %v1309_v20, 2  ;;  %v1356_v0 = vrot.slane %v1310_v61, 2  ;;  %v709_v5 = vmax.f32 %v513_v38, %v674_v28  ;;  %v1266_v28 = vrot.slane %v5649_v43, 6 }
 0x1a0   :  { %v1162_v20 = vsel %vm647_vm7, %v1159_v51, %v1161_v48  ;;  %v1084_v59 = vsel %vm7140_vm0, %v1081_v10, %v1083_v17  ;;  %v7408_v48 = vmov 5  }
 0x1a1   :  { %v5692_v45 = vpop.permute.xlu1 %1247  ;;  %v5695_v24 = vsel %vm844_vm8, %v1354_v60, %v1356_v0  ;;  %v960_v30 = vpop.permute.xlu2 %959  ;;  %v906_v1 = vmax.f32 %v709_v5, %v871_v34  ;;  %v1269_v61 = vsel %vm761_vm3, %v1266_v28, %v1268_v3  ;;  %v1071_v60 = vrot.slane %v5433_v41, 7  ;;  %v5733_v34 = vld [vmem:[%s7015_s4 + $0x10] sm:$0xff] }
 0x1a2   :  { %v986_v0 = vmul.f32 %v960_v30, %v5168_v16  ;;  %v1307_v5 = vmul.f32 %v1269_v61, %v7347_v63 }
 0x1a3   :  { %3882 = vset.pattern.permute.xlu0 %v7408_v48  ;;  %v1072_v41 = vsel %vm7140_vm0, %v7113_v25, %v1071_v60  ;;  %2076 = vperm.xlu1 %3871, %v5733_v34  }
 0x1a4   :  { %v1002_v38 = vmax.f32 %v906_v1, %v986_v0  ;;  %2192 = vperm.xlu0 %3882, %v5733_v34   ;;  %v7409_v1 = vld [vmem:[#allocation60_spill] sm:$0xff]  ;;  %v1350_v17 = vrot.slane %v1307_v5, 2  ;;  %v5748_v61 = vmul.f32 %v1072_v41, %v5114_v8  ;;  %v7410_v5 = vmov 2  }
 0x1a5   :  { %v1117_v0 = vmul.f32 %v1084_v59, %v7409_v1 }
 0x1a6   :  { %v5712_v12 = vmax.f32 %v1002_v38, %v1162_v20  ;;  %v1074_v38 = vsel %vm7140_vm0, %v1071_v60, %v1073_v52  ;;  %v7412_v20 = vld [vmem:[#allocation56_spill] sm:$0xff] }
 0x1a7   :  { %v1165_v43 = vrot.slane %v1117_v0, 1  ;;  %v7411_v0 = vmax.f32 %v5638_v56, %v5632_v55 }
 0x1a9   :  { %v5715_v35 = vpop.permute.xlu1 %1226  ;;  %v5728_v30 = vpop.permute.xlu2 %1526 }
 0x1aa   :  { %v7112_v33 = vrot.slane %v5715_v35, 6 }
 0x1ab   :  { %3874 = vset.pattern.permute.xlu1 %v7410_v5 }
 0x1ac   :  { %v1267_v51 = vsel %vm761_vm3, %v7112_v33, %v1266_v28  ;;  %v1076_v28 = vsel %vm7140_vm0, %v1073_v52, %v1075_v36  ;;  %v5757_v36 = vld [vmem:[%s7015_s4 + $0x8] sm:$0xff]  ;;  %3883 = vset.pattern.permute.xlu0 %v7410_v5  ;;  %2105 = vperm.xlu1 %3874, %v5733_v34   ;;  %v5775_v52 = vsel %vm7140_vm0, %v7412_v20, 0.0 }
 0x1ad   :  { %v5739_v10 = vmul.f32 %v1267_v51, %v5114_v8  ;;  %v1113_v13 = vmul.f32 %v1076_v28, %v5165_v6  ;;  %v1112_v51 = vmul.f32 %v1074_v38, %v7347_v63  ;;  %2073 = vperm.xlu2 %3872, %v5757_v36   ;;  %v1166_v28 = vsel %vm647_vm7, %v1163_v27, %v1165_v43 }
 0x1ae   :  { %2102 = vperm.xlu0 %3883, %v5757_v36   ;;  %v5771_v38 = vmax.f32 %v7411_v0, %v1166_v28  ;;  %v7413_v27 = vmov 3   ;;  %v7414_v43 = vrot.slane %v7404_v19, 6 }
 0x1af   :  { %v1157_v59 = vrot.slane %v1113_v13, 1  ;;  %v1155_v41 = vrot.slane %v1112_v51, 1 }
 0x1b0   :  { %v1271_v55 = vsel %vm761_vm3, %v1268_v3, %v7414_v43 }
 0x1b1   :  { %v5752_v33 = vpop.permute.xlu1 %943  ;;  %v5760_v60 = vpop.permute.xlu2 %1535  ;;  %v1308_v56 = vmul.f32 %v1271_v55, %v5165_v6  ;;  %v1158_v19 = vsel %vm647_vm7, %v1155_v41, %v1157_v59  ;;  %v7419_v59 = vmov 4   ;;  %v7420_v41 = vld [vmem:[#allocation27_spill] sm:$0xff] }
 0x1b2   :  { %v1567_v51 = vrot.slane %v5760_v60, 7  ;;  %v5809_v37 = vmax.f32 %v7418_v15, %v1158_v19  ;;  %v509_v19 = vmul.f32 %v5419_v23, %v5044_v49 }
 0x1b3   :  { %v1352_v3 = vrot.slane %v1308_v56, 2  ;;  %v1557_v56 = vrot.slane %v7420_v41, 7 }
 0x1b4   :  { %3876 = vset.pattern.permute.xlu1 %v7413_v27 }
 0x1b5   :  { %3873 = vset.pattern.permute.xlu2 %v7410_v5  ;;  %2131 = vperm.xlu1 %3876, %v5757_v36  }
 0x1b6   :  { %2099 = vperm.xlu2 %3873, %v5701_v9  }
 0x1b9   :  { %v5777_v13 = vpop.permute.xlu1 %1523 }
 0x1ba   :  { %v7115_v43 = vrot.slane %v5777_v13, 7 }
 0x1bb   :  { %v5779_v25 = vpop.permute.xlu2 %1529 }
 0x1bc   :  { %v7114_v28 = vrot.slane %v5779_v25, 7 }
 0x1bd   :  { %3878 = vset.pattern.permute.xlu1 %v7419_v59 }
 0x1be   :  { %3875 = vset.pattern.permute.xlu2 %v7413_v27  ;;  %2160 = vperm.xlu1 %3878, %v5757_v36  }
 0x1bf   :  { %2128 = vperm.xlu2 %3875, %v5701_v9  }
 0x1c1   :  { %v1533_v20 = vpop.permute.xlu1 %1532 }
 0x1c2   :  { %v1565_v0 = vrot.slane %v1533_v20, 7  ;;  %v621_v20 = vmul.f32 %v581_v40, %v5044_v49  ;;  %v7426_v49 = vrot.slane %v5500_v57, 1 }
 0x1c4   :  { %v5797_v4 = vpop.permute.xlu2 %1721  ;;  %v1566_v60 = vsel %vm7140_vm0, %v7114_v28, %v1565_v0  ;;  %v1568_v55 = vsel %vm7140_vm0, %v1565_v0, %v1567_v51  ;;  %v5821_v0 = vsel %vm844_vm8, %v1350_v17, %v1352_v3  ;;  %v663_v40 = vrot.slane %v621_v20, 1  ;;  %v7421_v17 = vld [vmem:[#allocation24_spill] sm:$0xff] }
 0x1c5   :  { %v5812_v21 = vmul.f32 %v1566_v60, %v7355_v22  ;;  %v5815_v31 = vmul.f32 %v1568_v55, %v7409_v1  ;;  %v1560_v60 = vsel %vm7140_vm0, %v1557_v56, %v7115_v43  ;;  %v1278_v55 = vrot.slane %v5692_v45, 6  ;;  %v7423_v43 = vld [vmem:[#allocation19_spill] sm:$0xff] }
 0x1c6   :  { %v1752_v3 = vrot.slane %v7421_v17, 6  ;;  %v1276_v28 = vrot.slane %v5625_v46, 6  ;;  %v5835_v42 = vmul.f32 %v1560_v60, %v5165_v6  ;;  %v7424_v14 = vrot.slane %v7423_v43, 7  ;;  %3880 = vset.pattern.permute.xlu1 %v7408_v48 }
 0x1c7   :  { %2134 = vperm.xlu2 %3875, %v5733_v34   ;;  %v7425_v46 = vrot.slane %v5665_v44, 6  ;;  %v666_v23 = vsel %vm647_vm7, %v663_v40, %v7426_v49  ;;  %2186 = vperm.xlu1 %3880, %v5701_v9   ;;  %v7429_v40 = vld [vmem:[#allocation33_spill] sm:$0xff] }
 0x1c8   :  { %v1070_v45 = vsel %vm7140_vm0, %v7424_v14, %v7422_v18  ;;  %v1753_v14 = vsel %vm761_vm3, %v7427_v26, %v1752_v3  ;;  %v7431_v26 = vld [vmem:[#allocation31_spill] sm:$0xff] }
 0x1c9   :  { %v1518_v15 = vpop.permute.xlu1 %1517  ;;  %v1277_v60 = vsel %vm761_vm3, %v7425_v46, %v1276_v28  ;;  %v1110_v18 = vmul.f32 %v1070_v45, %v5120_v2  ;;  %v5874_v46 = vmul.f32 %v1753_v14, %v7347_v63  ;;  %v982_v45 = vmul.f32 %v5752_v33, %v5120_v2 }
 0x1ca   :  { %v1555_v41 = vrot.slane %v1518_v15, 7  ;;  %v1279_v15 = vsel %vm761_vm3, %v1276_v28, %v1278_v55  ;;  %v705_v28 = vmax.f32 %v509_v19, %v666_v23  ;;  %v7428_v55 = vrot.slane %v5715_v35, 6 }
 0x1cb   :  { %v1312_v57 = vmul.f32 %v1279_v15, %v7409_v1  ;;  %v1569_v44 = vrot.slane %v7431_v26, 7  ;;  %v1151_v19 = vrot.slane %v1110_v18, 1 }
 0x1cc   :  { %v5837_v47 = vpop.permute.xlu2 %1730  ;;  %v1558_v20 = vsel %vm7140_vm0, %v1555_v41, %v1557_v56  ;;  %v1311_v56 = vmul.f32 %v1277_v60, %v7355_v22  ;;  %v902_v35 = vmax.f32 %v705_v28, %v5527_v54 }
 0x1cd   :  { %v5853_v17 = vmul.f32 %v1558_v20, %v7347_v63  ;;  %v7430_v20 = vrot.slane %v7429_v40, 6  ;;  %v1360_v43 = vrot.slane %v1312_v57, 2  ;;  %v7432_v63 = vld [vmem:[#allocation57_spill] sm:$0xff]  ;;  %v1762_v33 = vrot.slane %v5837_v47, 6 }
 0x1ce   :  { %v1358_v15 = vrot.slane %v1311_v56, 2  ;;  %v7433_v14 = vrot.slane %v7432_v63, 7  ;;  %v1834_v57 = vrot.slane %v5874_v46, 2  ;;  %v998_v54 = vmax.f32 %v902_v35, %v982_v45 }
 0x1cf   :  { %v1265_v7 = vsel %vm761_vm3, %v7430_v20, %v7428_v55  ;;  %3879 = vset.pattern.permute.xlu2 %v7419_v59  ;;  %v1570_v55 = vsel %vm7140_vm0, %v1567_v51, %v1569_v44  ;;  %v1561_v51 = vrot.slane %v5728_v30, 7  ;;  %v7435_v44 = vrot.slane %v5748_v61, 1 }
 0x1d0   :  { %v1305_v60 = vmul.f32 %v1265_v7, %v5120_v2  ;;  %v1556_v40 = vsel %vm7140_vm0, %v7433_v14, %v1555_v41  ;;  %2163 = vperm.xlu2 %3879, %v5733_v34   ;;  %v7434_v2 = vld [vmem:[#allocation42_spill] sm:$0xff]  ;;  %v7436_v47 = vmov 7   ;;  %v1361_v63 = vsel %vm844_vm8, %v1358_v15, %v1360_v43 }
 0x1d1   :  { %v1764_v56 = vrot.slane %v7434_v2, 6  ;;  %v1154_v41 = vsel %vm647_vm7, %v1151_v19, %v7435_v44  ;;  %3884 = vset.pattern.permute.xlu1 %v7436_v47  ;;  %v1756_v61 = vrot.slane %v5797_v4, 6  ;;  %v1394_v19 = vmax.f32 %v5771_v38, %v1361_v63 }
 0x1d2   :  { %v1346_v7 = vrot.slane %v1305_v60, 2  ;;  %2235 = vperm.xlu1 %3884, %v5701_v9   ;;  %v1193_v30 = vmax.f32 %v998_v54, %v1154_v41 }
 0x1d3   :  { %v1765_v46 = vsel %vm761_vm3, %v1762_v33, %v1764_v56 }
 0x1d4   :  { %v1719_v49 = vpop.permute.xlu1 %1718  ;;  %v1798_v43 = vmul.f32 %v1765_v46, %v5775_v52 }
 0x1d5   :  { %v1754_v23 = vrot.slane %v1719_v49, 6  ;;  %v1454_v18 = vpop.permute.xlu2 %1453  ;;  %v1596_v49 = vmul.f32 %v1556_v40, %v5114_v8 }
 0x1d6   :  { %v1474_v45 = vmul.f32 %v1454_v18, %v7409_v1  ;;  %v7438_v18 = vrot.slane %v5739_v10, 2  ;;  %v1846_v44 = vrot.slane %v1798_v43, 2 }
 0x1d7   :  { %v1755_v20 = vsel %vm761_vm3, %v1752_v3, %v1754_v23  ;;  %v1603_v3 = vmul.f32 %v1570_v55, %v5775_v52  ;;  %v7437_v55 = vrot.slane %v5777_v13, 7  ;;  %v1637_v15 = vrot.slane %v1596_v49, 1 }
 0x1d8   :  { %v1793_v28 = vmul.f32 %v1755_v20, %v5165_v6  ;;  %v1490_v20 = vmax.f32 %v1394_v19, %v1474_v45  ;;  %v1349_v4 = vsel %vm844_vm8, %v1346_v7, %v7438_v18  ;;  %3881 = vset.pattern.permute.xlu2 %v7408_v48  ;;  %v1757_v38 = vsel %vm761_vm3, %v1754_v23, %v1756_v61 }
 0x1d9   :  { %v1651_v14 = vrot.slane %v1603_v3, 1  ;;  %v1562_v40 = vsel %vm7140_vm0, %v7437_v55, %v1561_v51  ;;  %v1388_v13 = vmax.f32 %v1193_v30, %v1349_v4  ;;  %2189 = vperm.xlu2 %3881, %v5757_v36   ;;  %v1794_v23 = vmul.f32 %v1757_v38, %v5168_v16 }
 0x1da   :  { %v1836_v26 = vrot.slane %v1793_v28, 2  ;;  %v1599_v52 = vmul.f32 %v1562_v40, %v5168_v16  ;;  %2241 = vperm.xlu1 %3884, %v5733_v34   ;;  %v7442_v16 = vmax.f32 %v5809_v37, %v5821_v0  ;;  %v7443_v40 = vrot.slane %v5835_v42, 1  ;;  %v1446_v42 = vpop.permute.xlu0 %1445 }
 0x1db   :  { %v1838_v55 = vrot.slane %v1794_v23, 2 }
 0x1dc   :  { %v1643_v46 = vrot.slane %v1599_v52, 1 }
 0x1dd   :  { %v1430_v56 = vpop.permute.xlu2 %1429 }
 0x1de   :  { %v1728_v60 = vpop.permute.xlu1 %1727  ;;  %v1468_v28 = vmul.f32 %v1430_v56, %v5114_v8  ;;  %v7445_v56 = vld [vmem:[#allocation55_spill] sm:$0xff] }
 0x1df   :  { %v1760_v35 = vrot.slane %v1728_v60, 6 }
 0x1e0   :  { %v1484_v7 = vmax.f32 %v1388_v13, %v1468_v28 }
 0x1e1   :  { %v1763_v2 = vsel %vm761_vm3, %v1760_v35, %v1762_v33  ;;  %v7439_v33 = vrot.slane %v5815_v31, 1  ;;  %v7441_v31 = vrot.slane %v5441_v39, 2  ;;  %3885 = vset.pattern.permute.xlu2 %v7436_v47  ;;  %v1644_v39 = vsel %vm647_vm7, %v7443_v40, %v1643_v46 }
 0x1e2   :  { %v1797_v54 = vmul.f32 %v1763_v2, %v7409_v1  ;;  %v7440_v1 = vrot.slane %v5853_v17, 1  ;;  %2238 = vperm.xlu2 %3885, %v5757_v36   ;;  %3887 = vset.pattern.permute.xlu1 %v7311_v58 }
 0x1e3   :  { %v1652_v10 = vsel %vm647_vm7, %v7439_v33, %v1651_v14  ;;  %v1835_v30 = vsel %vm844_vm8, %v7441_v31, %v1834_v57  ;;  %v7444_v57 = vrot.slane %v5779_v25, 7  ;;  %2270 = vperm.xlu1 %3887, %v5733_v34   ;;  %v2740_v25 = vld [vmem:[%s7018_s7] sm:$0x3] }
 0x1e4   :  { %v1844_v41 = vrot.slane %v1797_v54, 2  ;;  %v1685_v3 = vmax.f32 %v1490_v20, %v1652_v10  ;;  %v1640_v8 = vsel %vm647_vm7, %v1637_v15, %v7440_v1  ;;  %v1839_v15 = vsel %vm844_vm8, %v1836_v26, %v1838_v55 }
 0x1e5   :  { %v1679_v63 = vmax.f32 %v1484_v7, %v1640_v8  ;;  %v2742_v18 = vand.u32 %v2740_v25, %v7445_v56  ;;  %v1472_v26 = vmul.f32 %v1446_v42, %v5144_v53  ;;  %v7446_v54 = vrot.slane %v5812_v21, 1  ;;  %v5972_v21 = vld [vmem:[%s7015_s4 + $0x18] sm:$0xff]  ;;  %s4074_s4 = smov 48  }
 0x1e6   :  { %v1847_v49 = vsel %vm844_vm8, %v1844_v41, %v1846_v44  ;;  %v7447_v44 = vmax.f32 %v5712_v12, %v5695_v24  ;;  %2108 = vperm.xlu0 %3883, %v5972_v21  }
 0x1e7   :  { %v1880_v45 = vmax.f32 %v1685_v3, %v1847_v49  ;;  %v1438_v60 = vpop.permute.xlu1 %1437  ;;  %v1874_v19 = vmax.f32 %v1679_v63, %v1835_v30  ;;  %2751 = vmatpush.bf16.msrb.mxu1 %v2742_v18  ;;  %v7448_v63 = vmov 0  }
 0x1e8   :  { %v1470_v14 = vmul.f32 %v1438_v60, %v5165_v6  ;;  %v1564_v6 = vsel %vm7140_vm0, %v1561_v51, %v7444_v57  ;;  %v1488_v33 = vmax.f32 %v7447_v44, %v1472_v26 }
 0x1e9   :  { %1896 = vst.msk [vmem:[#allocation2 + $0x70] sm:$0xff] %vm184_vm2, %v1880_v45  ;;  %v1600_v0 = vmul.f32 %v1564_v6, %v5144_v53 }
 0x1ea   :  { %1890 = vst.msk [vmem:[#allocation2 + $0x40] sm:$0xff] %vm184_vm2, %v1874_v19  ;;  %v1486_v17 = vmax.f32 %v7442_v16, %v1470_v14  ;;  %3886 = vset.pattern.permute.xlu2 %v7311_v58 }
 0x1eb   :  { %v1645_v51 = vrot.slane %v1600_v0, 1  ;;  %2264 = vperm.xlu2 %3886, %v5701_v9   ;;  %3889 = vset.pattern.permute.xlu1 %v7350_v11 }
 0x1ec   :  { %v1681_v43 = vmax.f32 %v1486_v17, %v1644_v39  ;;  %2219 = vperm.xlu1 %3889, %v5757_v36  }
 0x1ed   :  { %v1648_v13 = vsel %vm647_vm7, %v1645_v51, %v7446_v54 }
 0x1ee   :  { %v1876_v37 = vmax.f32 %v1681_v43, %v1839_v15  ;;  %v1683_v10 = vmax.f32 %v1488_v33, %v1648_v13  ;;  %3891 = vset.pattern.permute.xlu0 %v7311_v58 }
 0x1ef   :  { %2267 = vperm.xlu0 %3891, %v5757_v36  }
 0x1f0   :  { %1892 = vst.msk [vmem:[#allocation2 + $0x50] sm:$0xff] %vm184_vm2, %v1876_v37  ;;  %v1725_v20 = vpop.permute.xlu1 %1724  ;;  %v1912_v12 = vld [vmem:[#allocation2 + $0x70] ss:$2 sm:$0xf] }
 0x1f1   :  { %v1758_v2 = vrot.slane %v1725_v20, 6  ;;  %v1923_v7 = vrot.slane %v1912_v12, 4  ;;  %v1906_v23 = vld [vmem:[#allocation2 + $0x40] ss:$2 sm:$0xf] }
 0x1f3   :  { %v1759_v4 = vsel %vm761_vm3, %v1756_v61, %v1758_v2  ;;  %v1761_v38 = vsel %vm761_vm3, %v1758_v2, %v1760_v35  ;;  %3888 = vset.pattern.permute.xlu2 %v7350_v11 }
 0x1f4   :  { %v1795_v28 = vmul.f32 %v1759_v4, %v5144_v53  ;;  %v1796_v52 = vmul.f32 %v1761_v38, %v7355_v22  ;;  %2215 = vperm.xlu2 %3888, %v5701_v9   ;;  %3892 = vset.pattern.permute.xlu1 %v7413_v27 }
 0x1f5   :  { %2137 = vperm.xlu1 %3892, %v5972_v21  }
 0x1f6   :  { %v1840_v61 = vrot.slane %v1795_v28, 2  ;;  %v1842_v35 = vrot.slane %v1796_v52, 2 }
 0x1f7   :  { %v1908_v24 = vld [vmem:[#allocation2 + $0x50] ss:$2 sm:$0xf]  ;;  %2273 = vperm.xlu0 %3891, %v5972_v21  }
 0x1f8   :  { %v1843_v53 = vsel %vm844_vm8, %v1840_v61, %v1842_v35  ;;  %v1920_v41 = vrot.slane %v1908_v24, 4 }
 0x1f9   :  { %v1878_v22 = vmax.f32 %v1683_v10, %v1843_v53 }
 0x1fa   :  { %v1928_v1 = vsel %vm1925_vm9, %v1906_v23, %v1920_v41 }
 0x1fb   :  { %1894 = vst.msk [vmem:[#allocation2 + $0x60] sm:$0xff] %vm184_vm2, %v1878_v22 }
 0x1fc   :  { %3890 = vset.pattern.permute.xlu2 %v7395_v62 }
 0x1fd   :  { %2079 = vperm.xlu2 %3890, %v5972_v21   ;;  %3894 = vset.pattern.permute.xlu1 %v7408_v48 }
 0x1fe   :  { %2195 = vperm.xlu1 %3894, %v5972_v21  }
 0x1ff   :  { %3935 = vset.pattern.permute.xlu0 %v7448_v63 }
 0x202   :  { %v1910_v3 = vld [vmem:[#allocation2 + $0x60] ss:$2 sm:$0xf] }
 0x203   :  { %v1929_v8 = vsel %vm1925_vm9, %v1910_v3, %v1923_v7 }
 0x204   :  { %v1932_v49 = vpack.c.bf16 %v1929_v8, %v1928_v1 }
 0x205   :  { %3893 = vset.pattern.permute.xlu2 %v7419_v59 }
 0x206   :  { %3700 = vmatmul.msk.bf16.gmra.mxu1 %vm184_vm2, %v1932_v49  ;;  %2166 = vperm.xlu2 %3893, %v5972_v21  }
 0x207   :  { %3896 = vset.pattern.permute.xlu1 %v7350_v11  ;;  %v6004_v45 = vpop.permute.xlu2 %2073 }
 0x208   :  { %2223 = vperm.xlu1 %3896, %v5733_v34   ;;  %v2082_v31 = vrot.slane %v6004_v45, 7 }
 0x20d   :  { %v5998_v46 = vpop.permute.xlu1 %2070 }
 0x20e   :  { %3895 = vset.pattern.permute.xlu2 %v7436_v47 }
 0x20f   :  { %2244 = vperm.xlu2 %3895, %v5972_v21  }
 0x210   :  { %3898 = vset.pattern.permute.xlu1 %v7448_v63  ;;  %v6027_v14 = vpop.permute.xlu2 %2099 }
 0x211   :  { %2047 = vperm.xlu1 %3898, %v5701_v9   ;;  %v6023_v9 = vpop.f32.mrf.mxu1 }
 0x212   :  { %v1977_v40 = vmul.f32 %v6023_v9, %v6023_v9  ;;  %v1964_v39 = vsel %vm1963_vm10, %v6023_v9, 0.0 }
 0x214   :  { %v1981_v37 = vsel %vm1963_vm10, %v1977_v40, 0.0 }
 0x215   :  { %v6008_v30 = vpop.permute.xlu1 %2076 }
 0x216   :  { %3721 = vmatmul.msk.bf16.vlgmr.msrb.gmra.mxu1 %vm184_vm2, %v5612_v29  ;;  %v7118_v29 = vrot.slane %v6008_v30, 7 }
 0x217   :  { %3897 = vset.pattern.permute.xlu2 %v7350_v11 }
 0x218   :  { %2227 = vperm.xlu2 %3897, %v5972_v21   ;;  %v6017_v60 = vsel %vm7140_vm0, %v2082_v31, %v7118_v29 }
 0x219   :  { %v6025_v19 = vpop.f32.mrf.mxu1  ;;  %v6044_v6 = vpop.permute.xlu2 %2128 }
 0x21a   :  { %v1978_v17 = vmul.f32 %v6025_v19, %v6025_v19 }
 0x21c   :  { %v1982_v57 = vsel %vm1963_vm10, %v1978_v17, 0.0 }
 0x21d   :  { %v1983_v42 = vadd.f32 %v1982_v57, %v1981_v37 }
 0x21e   :  { %v6029_v55 = vpop.permute.xlu1 %2105 }
 0x220   :  { %3899 = vset.pattern.permute.xlu2 %v7448_v63 }
 0x221   :  { %2052 = vperm.xlu2 %3899, %v5757_v36   ;;  %v6059_v52 = vpop.permute.xlu2 %2134 }
 0x226   :  { %3722 = vmatmul.msk.bf16.gmra.mxu1 %vm184_vm2, %v1932_v49 }
 0x227   :  { %v6056_v56 = vpop.permute.xlu1 %2131 }
 0x229   :  { %2057 = vperm.xlu2 %3899, %v5733_v34   ;;  %v1965_v34 = vsel %vm1963_vm10, %v6025_v19, 0.0 }
 0x22a   :  { %v1966_v15 = vadd.f32 %v1965_v34, %v1964_v39  ;;  %v6063_v23 = vpop.permute.xlu2 %2163 }
 0x230   :  { %v6061_v10 = vpop.permute.xlu1 %2160 }
 0x233   :  { %v6065_v34 = vpop.permute.xlu2 %2189 }
 0x239   :  { %v2187_v49 = vpop.permute.xlu1 %2186 }
 0x23c   :  { %v6069_v37 = vpop.permute.xlu2 %2238 }
 0x244   :  { %v6067_v39 = vpop.permute.xlu1 %2235 }
 0x283   :  { %v6031_v16 = vpop.f32.mrf.mxu1 }
 0x284   :  { %v1979_v36 = vmul.f32 %v6031_v16, %v6031_v16  ;;  %v1967_v43 = vsel %vm1963_vm10, %v6031_v16, 0.0 }
 0x285   :  { %v1968_v20 = vadd.f32 %v1967_v43, %v1966_v15  ;;  %v2158_v43 = vpop.permute.xlu0 %2157 }
 0x286   :  { %v1984_v0 = vsel %vm1963_vm10, %v1979_v36, 0.0 }
 0x287   :  { %v1985_v18 = vadd.f32 %v1984_v0, %v1983_v42 }
 0x28b   :  { %v6050_v2 = vpop.f32.mrf.mxu1 }
 0x28c   :  { %v1969_v25 = vsel %vm1963_vm10, %v6050_v2, 0.0  ;;  %v1980_v51 = vmul.f32 %v6050_v2, %v6050_v2 }
 0x28d   :  { %v1970_v26 = vadd.f32 %v1969_v25, %v1968_v20  ;;  %v6071_v25 = vpop.permute.xlu1 %2241 }
 0x28e   :  { %v1986_v4 = vsel %vm1963_vm10, %v1980_v51, 0.0  ;;  %v6073_v51 = vpop.permute.xlu0 %2192 }
 0x28f   :  { %v1971_v38 = vrot.slane %v1970_v26, 4  ;;  %v1987_v54 = vadd.f32 %v1986_v4, %v1985_v18 }
 0x291   :  { %v1972_v13 = vadd.f32 %v1971_v38, %v1970_v26  ;;  %v1988_v28 = vrot.slane %v1987_v54, 4 }
 0x293   :  { %v1973_v44 = vrot.slane %v1972_v13, 2  ;;  %v1989_v33 = vadd.f32 %v1988_v28, %v1987_v54  ;;  %v2265_v54 = vpop.permute.xlu2 %2264 }
 0x295   :  { %v1974_v61 = vadd.f32 %v1973_v44, %v1972_v13  ;;  %v1990_v35 = vrot.slane %v1989_v33, 2 }
 0x297   :  { %v1975_v53 = vrot.slane %v1974_v61, 1  ;;  %v1991_v22 = vadd.f32 %v1990_v35, %v1989_v33  ;;  %v6078_v33 = vpop.permute.xlu1 %2270 }
 0x299   :  { %v1976_v24 = vadd.f32 %v1975_v53, %v1974_v61  ;;  %v1992_v12 = vrot.slane %v1991_v22, 1 }
 0x29b   :  { %v1993_v41 = vadd.f32 %v1992_v12, %v1991_v22  ;;  %v1994_v7 = vmul.f32 0.03125, %v1976_v24  ;;  %v2103_v22 = vpop.permute.xlu0 %2102 }
 0x29d   :  { %v1995_v3 = vmul.f32 0.03125, %v1993_v41  ;;  %v1996_v1 = vmul.f32 %v1994_v7, %v1994_v7  ;;  %v1999_v26 = vsub.f32 %v6023_v9, %v1994_v7  ;;  %v2000_v4 = vsub.f32 %v6025_v19, %v1994_v7  ;;  %v6081_v9 = vpop.permute.xlu2 %2215 }
 0x29e   :  { %v2001_v38 = vsub.f32 %v6031_v16, %v1994_v7  ;;  %v2002_v24 = vsub.f32 %v6050_v2, %v1994_v7  ;;  %7449 = vst [vmem:[#allocation15_spill] sm:$0xff] %v6081_v9  ;;  %v2111_v2 = vrot.slane %v2103_v22, 6  ;;  %v6096_v7 = vrot.slane %v6044_v6, 4 }
 0x29f   :  { %v1997_v8 = vsub.f32 %v1995_v3, %v1996_v1  ;;  %v7120_v6 = vrot.slane %v6063_v23, 3 }
 0x2a1   :  { %v1998_v17 = vmax.f32 %v1997_v8, 0.0  ;;  %v6090_v8 = vrot.slane %v6027_v14, 6 }
 0x2a3   :  { %v2003_v40 = vadd.f32 1e-05, %v1998_v17  ;;  %v6093_v17 = vrot.slane %v5998_v46, 7 }
 0x2a5   :  { %4006 = vrsqrt.f32 %v2003_v40  ;;  %vm2010_vm12 = vweird.f32 %v2003_v40 }
 0x2ab   :  { %v4007_v36 = vpop.eup %4006 }
 0x2ac   :  { %v2005_v57 = vmul.f32 %v4007_v36, %v2003_v40  ;;  %vm2011_vm11 = vweird.f32 %v4007_v36  ;;  %v7117_v40 = vrot.slane %v6059_v52, 4 }
 0x2ad   :  { %vm2012_vm13 = vmor %vm2010_vm12, %vm2011_vm11  ;;  %vm7150_vm11 = vcmask 392192   ;;  %vm7149_vm12 = vcmask 457728  }
 0x2ae   :  { %v2006_v15 = vmul.f32 %v4007_v36, %v2005_v57  ;;  %v6100_v57 = vpop.permute.xlu1 %2219 }
 0x2af   :  { %7450 = vst [vmem:[#allocation16_spill] sm:$0xff] %v6100_v57 }
 0x2b0   :  { %v2007_v0 = vmul.f32 0.5, %v2006_v15 }
 0x2b2   :  { %v2008_v42 = vsub.f32 1.5, %v2007_v0  ;;  %v2140_v0 = vrot.slane %v6056_v56, 4  ;;  %v7116_v56 = vrot.slane %v6073_v51, 2 }
 0x2b4   :  { %v2009_v20 = vmul.f32 %v4007_v36, %v2008_v42 }
 0x2b6   :  { %v2013_v18 = vsel %vm2012_vm13, %v4007_v36, %v2009_v20  ;;  %v2113_v36 = vrot.slane %v6029_v55, 6  ;;  %v2198_v20 = vrot.slane %v6065_v34, 2  ;;  %v2169_v55 = vrot.slane %v6061_v10, 3 }
 0x2b7   :  { %v2014_v13 = vmul.f32 %v2013_v18, %v1999_v26  ;;  %v2015_v28 = vmul.f32 %v2013_v18, %v2000_v4  ;;  %v2016_v44 = vmul.f32 %v2013_v18, %v2001_v38  ;;  %v2017_v19 = vmul.f32 %v2013_v18, %v2002_v24  ;;  %v2109_v26 = vpop.permute.xlu0 %2108 }
 0x2b8   :  { %v6113_v18 = vrot.slane %v2158_v43, 3  ;;  %v6115_v4 = vrot.slane %v2187_v49, 2  ;;  %v6120_v38 = vsel %vm761_vm3, %v6090_v8, %v2111_v2  ;;  %v6130_v10 = vsel %vm7140_vm0, %v6093_v17, %v2082_v31 }
 0x2b9   :  { %v2018_v61 = vmax.f32 %v2014_v13, 0.0  ;;  %v2019_v35 = vmax.f32 %v2015_v28, 0.0  ;;  %v2020_v53 = vmax.f32 %v2016_v44, 0.0  ;;  %v2021_v15 = vmax.f32 %v2017_v19, 0.0 }
 0x2ba   :  { %7451 = vst [vmem:[#allocation7_spill] sm:$0xff] %v6115_v4  ;;  %v6134_v49 = vsel %vm1925_vm9, %v6096_v7, %v2140_v0  ;;  %v6139_v43 = vsel %vm1925_vm9, %v2140_v0, %v7117_v40  ;;  %v6148_v45 = vsel %vm2030_vm14, %v2169_v55, %v7120_v6  ;;  %v6152_v31 = vsel %vm2030_vm14, %v6113_v18, %v2169_v55 }
 0x2bb   :  { %v2031_v12 = vrot.slane %v2018_v61, 3  ;;  %v2032_v41 = vrot.slane %v2019_v35, 3  ;;  %v2034_v3 = vrot.slane %v2020_v53, 3  ;;  %v2036_v28 = vrot.slane %v2021_v15, 3  ;;  %v2080_v61 = vpop.permute.xlu2 %2079 }
 0x2bc   :  { %v6142_v35 = vsel %vm761_vm3, %v2111_v2, %v2113_v36  ;;  %v6154_v53 = vrot.slane %v2109_v26, 6  ;;  %v2247_v24 = vrot.slane %v6069_v37, 7  ;;  %v6170_v19 = vsel %vm844_vm8, %v2198_v20, %v7116_v56 }
 0x2bd   :  { %v6084_v16 = vsel %vm2030_vm14, %v2031_v12, %v2032_v41  ;;  %v6087_v1 = vsel %vm2030_vm14, %v2032_v41, %v2034_v3  ;;  %v6104_v42 = vsel %vm2030_vm14, 0.0, %v2031_v12  ;;  %v6163_v12 = vsel %vm844_vm8, %v6115_v4, %v2198_v20  ;;  %7454 = vst [vmem:[#allocation14_spill] sm:$0xff] %v6170_v19 }
 0x2be   :  { %v2230_v46 = vmul.f32 %v6081_v9, %v6084_v16  ;;  %v2231_v14 = vmul.f32 %v6100_v57, %v6087_v1  ;;  %v2122_v44 = vmul.f32 %v6090_v8, %v6104_v42  ;;  %v2123_v34 = vmul.f32 %v6120_v38, %v6084_v16  ;;  %7452 = vst [vmem:[#allocation36_spill] sm:$0xff] %v6163_v12 }
 0x2bf   :  { %v6158_v22 = vmul.f32 %v6142_v35, %v6087_v1  ;;  %v6165_v41 = vrot.slane %v2265_v54, 6  ;;  %v6173_v2 = vsel %vm2030_vm14, %v2034_v3, %v2036_v28  ;;  %v6177_v37 = vrot.slane %v6067_v39, 7  ;;  %v2268_v26 = vpop.permute.xlu0 %2267 }
 0x2c0   :  { %v3900_v13 = vpack.i.bf16 %v2231_v14, %v2230_v46  ;;  %v2323_v15 = vrot.slane %v2122_v44, 2  ;;  %v2324_v0 = vrot.slane %v2123_v34, 2  ;;  %v7122_v14 = vrot.slane %v6071_v25, 7 }
 0x2c1   :  { %7453 = vst [vmem:[#allocation61_spill] sm:$0xff] %v6165_v41  ;;  %v7119_v46 = vrot.slane %v6158_v22, 2  ;;  %v6181_v54 = vsel %vm2030_vm14, %v2036_v28, 0.0  ;;  %v2093_v55 = vmul.f32 %v6093_v17, %v6104_v42  ;;  %v6188_v3 = vsel %vm761_vm3, %v2113_v36, %v6154_v53 }
 0x2c2   :  { %3901 = vrot.lane.b32.xlu2 %v3900_v13, %s4074_s4  ;;  %v2325_v13 = vsel %vm844_vm8, %v2323_v15, %v2324_v0  ;;  %v6196_v28 = vmul.f32 %v6188_v3, %v6173_v2  ;;  %v2276_v44 = vrot.slane %v2268_v26, 6  ;;  %v2094_v56 = vmul.f32 %v6130_v10, %v6084_v16 }
 0x2c3   :  { %v2327_v39 = vsel %vm844_vm8, %v2324_v0, %v7119_v46  ;;  %v2126_v36 = vmul.f32 %v6154_v53, %v6181_v54  ;;  %v6204_v40 = vmul.f32 %v6017_v60, %v6087_v1  ;;  %v2297_v15 = vrot.slane %v2093_v55, 1 }
 0x2c4   :  { %v3910_v34 = vpack.i.bf16 %v2327_v39, %v2325_v13  ;;  %v2151_v0 = vmul.f32 %v6096_v7, %v6104_v42  ;;  %v6210_v29 = vsel %vm7140_vm0, %v6177_v37, %v2247_v24  ;;  %v6215_v26 = vsel %vm7140_vm0, %v2247_v24, %v7122_v14  ;;  %v2167_v39 = vpop.permute.xlu2 %2166 }
 0x2c5   :  { %v6217_v13 = vrot.slane %v2080_v61, 7  ;;  %v2298_v46 = vrot.slane %v2094_v56, 1  ;;  %v6220_v55 = vrot.slane %v2167_v39, 3  ;;  %v7129_v6 = vrot.slane %v6204_v40, 1 }
 0x2c6   :  { %3911 = vrot.lane.b32.xlu1 %v3910_v34, %s4075_s1  ;;  %v2152_v20 = vmul.f32 %v6134_v49, %v6084_v16  ;;  %v6227_v63 = vmul.f32 %v6139_v43, %v6087_v1  ;;  %v2328_v24 = vrot.slane %v6196_v28, 2  ;;  %v6232_v61 = vsel %vm761_vm3, %v6165_v41, %v2276_v44 }
 0x2c7   :  { %7455 = vst [vmem:[#allocation13_spill] sm:$0xff] %v6220_v55  ;;  %v7457_v34 = vrot.slane %v6078_v33, 6  ;;  %v2299_v39 = vsel %vm647_vm7, %v2297_v15, %v2298_v46  ;;  %v2330_v14 = vrot.slane %v2126_v36, 2  ;;  %v2301_v58 = vsel %vm647_vm7, %v2298_v46, %v7129_v6 }
 0x2c8   :  { %7456 = vst [vmem:[#allocation26_spill] sm:$0xff] %v6232_v61  ;;  %v2349_v59 = vrot.slane %v2151_v0, 4  ;;  %v2350_v47 = vrot.slane %v2152_v20, 4  ;;  %v3905_v48 = vpack.i.bf16 %v2301_v58, %v2299_v39  ;;  %v7132_v28 = vrot.slane %v6227_v63, 4 }
 0x2c9   :  { %v6237_v56 = vsel %vm761_vm3, %v2276_v44, %v7457_v34  ;;  %v2209_v57 = vmul.f32 %v6115_v4, %v6104_v42  ;;  %v2210_v9 = vmul.f32 %v6163_v12, %v6084_v16  ;;  %v2288_v44 = vmul.f32 %v6232_v61, %v6087_v1 }
 0x2ca   :  { %7458 = vst [vmem:[#allocation47_spill] sm:$0xff] %v6237_v56  ;;  %v6252_v36 = vmul.f32 %v6237_v56, %v6173_v2  ;;  %v2351_v46 = vsel %vm1925_vm9, %v2349_v59, %v2350_v47  ;;  %v6257_v58 = vmul.f32 %v6170_v19, %v6087_v1  ;;  %3906 = vrot.lane.b32.xlu0 %v3905_v48, %s4076_s16  ;;  %v7459_v48 = vrot.slane %v6063_v23, 3 }
 0x2cb   :  { %v2353_v20 = vsel %vm1925_vm9, %v2350_v47, %v7132_v28  ;;  %v2402_v15 = vrot.slane %v2209_v57, 6  ;;  %v2403_v0 = vrot.slane %v2210_v9, 6  ;;  %v2180_v34 = vmul.f32 %v6113_v18, %v6104_v42 }
 0x2cc   :  { %v3915_v39 = vpack.i.bf16 %v2353_v20, %v2351_v46  ;;  %v7138_v6 = vrot.slane %v6257_v58, 6  ;;  %v2181_v59 = vmul.f32 %v6152_v31, %v6084_v16  ;;  %v2182_v56 = vmul.f32 %v6148_v45, %v6087_v1 }
 0x2cd   :  { %v6274_v61 = vsel %vm2030_vm14, %v7459_v48, %v6220_v55  ;;  %v2404_v47 = vsel %vm761_vm3, %v2402_v15, %v2403_v0  ;;  %v2376_v9 = vrot.slane %v2180_v34, 5  ;;  %v2184_v46 = vmul.f32 %v6220_v55, %v6181_v54 }
 0x2ce   :  { %7460 = vst [vmem:[#allocation11_spill] sm:$0xff] %v6274_v61  ;;  %v2183_v57 = vmul.f32 %v6274_v61, %v6173_v2  ;;  %3916 = vrot.lane.b32.xlu2 %v3915_v39, %s4077_s17  ;;  %v2406_v23 = vsel %vm761_vm3, %v2403_v0, %v7138_v6  ;;  %v2377_v20 = vrot.slane %v2181_v59, 5  ;;  %v2471_v48 = vrot.slane %v2288_v44, 2  ;;  %v2138_v61 = vpop.permute.xlu1 %2137 }
 0x2cf   :  { %v3925_v28 = vpack.i.bf16 %v2406_v23, %v2404_v47  ;;  %v2379_v19 = vrot.slane %v2182_v56, 5  ;;  %v2287_v15 = vmul.f32 %v6165_v41, %v6084_v16  ;;  %v2473_v34 = vrot.slane %v6252_v36, 2  ;;  %v2245_v47 = vpop.permute.xlu2 %2244 }
 0x2d0   :  { %v2378_v12 = vsel %vm2375_vm15, %v2376_v9, %v2377_v20  ;;  %v7461_v4 = vrot.slane %v6158_v22, 2  ;;  %v2331_v39 = vsel %vm844_vm8, %v2328_v24, %v2330_v14  ;;  %v2258_v0 = vmul.f32 %v6177_v37, %v6084_v16 }
 0x2d1   :  { %3926 = vrot.lane.b32.xlu1 %v3925_v28, %s4078_s18  ;;  %v2380_v44 = vsel %vm2375_vm15, %v2377_v20, %v2379_v19  ;;  %v2470_v56 = vrot.slane %v2287_v15, 2  ;;  %v2259_v59 = vmul.f32 %v6210_v29, %v6087_v1  ;;  %v7462_v22 = vrot.slane %v6008_v30, 7 }
 0x2d2   :  { %v2329_v55 = vsel %vm844_vm8, %v7461_v4, %v2328_v24  ;;  %v3920_v9 = vpack.i.bf16 %v2380_v44, %v2378_v12  ;;  %v2260_v4 = vmul.f32 %v6215_v26, %v6173_v2  ;;  %v2251_v24 = vrot.slane %v2245_v47, 7 }
 0x2d3   :  { %v6305_v14 = vsel %vm7140_vm0, %v7462_v22, %v6217_v13  ;;  %v2444_v28 = vrot.slane %v2258_v0, 1  ;;  %v2445_v23 = vrot.slane %v2259_v59, 1  ;;  %v3946_v20 = vpack.i.bf16 %v2331_v39, %v2329_v55 }
 0x2d4   :  { %3921 = vrot.lane.b32.xlu0 %v3920_v9, %s4079_s19  ;;  %v2472_v15 = vsel %vm844_vm8, %v2470_v56, %v2471_v48  ;;  %v2474_v12 = vsel %vm844_vm8, %v2471_v48, %v2473_v34  ;;  %v2447_v44 = vrot.slane %v2260_v4, 1  ;;  %v2381_v6 = vrot.slane %v2183_v57, 5 }
 0x2d5   :  { %v2383_v41 = vrot.slane %v2184_v46, 5  ;;  %v2096_v30 = vmul.f32 %v6305_v14, %v6173_v2  ;;  %v2097_v0 = vmul.f32 %v6217_v13, %v6181_v54  ;;  %v6316_v59 = vrot.slane %v2138_v61, 4 }
 0x2d6   :  { %3947 = vrot.lane.b32.xlu2 %v3946_v20, %s4075_s1  ;;  %v3936_v55 = vpack.i.bf16 %v2474_v12, %v2472_v15  ;;  %v2446_v39 = vsel %vm647_vm7, %v2444_v28, %v2445_v23  ;;  %v2448_v56 = vsel %vm647_vm7, %v2445_v23, %v2447_v44  ;;  %v7463_v48 = vrot.slane %v6071_v25, 7  ;;  %v2196_v61 = vpop.permute.xlu1 %2195 }
 0x2d7   :  { %v2302_v46 = vrot.slane %v2096_v30, 1  ;;  %v2304_v47 = vrot.slane %v2097_v0, 1  ;;  %v6328_v4 = vmul.f32 0.0, %v2251_v24  ;;  %v2382_v22 = vsel %vm2375_vm15, %v2379_v19, %v2381_v6 }
 0x2d8   :  { %v6324_v57 = vsel %vm7140_vm0, %v7463_v48, %v2251_v24  ;;  %v2384_v28 = vsel %vm2375_vm15, %v2381_v6, %v2383_v41  ;;  %v7465_v25 = vrot.slane %v6059_v52, 4  ;;  %v6339_v20 = vrot.slane %v2196_v61, 2 }
 0x2d9   :  { %v2261_v9 = vmul.f32 %v6324_v57, %v6181_v54  ;;  %7464 = vst [vmem:[#allocation45_spill] sm:$0xff] %v6328_v4  ;;  %3937 = vrot.lane.b32.xlu1 %v3936_v55, %s4080_s20  ;;  %v3930_v15 = vpack.i.bf16 %v2448_v56, %v2446_v39  ;;  %v2155_v12 = vmul.f32 %v6316_v59, %v6181_v54  ;;  %v7466_v6 = vrot.slane %v6204_v40, 1  ;;  %v2274_v55 = vpop.permute.xlu0 %2273 }
 0x2da   :  { %v6337_v23 = vsel %vm1925_vm9, %v7465_v25, %v6316_v59  ;;  %v3961_v19 = vpack.i.bf16 %v2384_v28, %v2382_v22  ;;  %v2305_v41 = vsel %vm647_vm7, %v2302_v46, %v2304_v47  ;;  %v7144_v0 = vrot.slane %v6328_v4, 1 }
 0x2db   :  { %v2154_v24 = vmul.f32 %v6337_v23, %v6173_v2  ;;  %v2303_v52 = vsel %vm647_vm7, %v7466_v6, %v2302_v46  ;;  %v2449_v30 = vrot.slane %v2261_v9, 1  ;;  %v7467_v39 = vrot.slane %v6073_v51, 2 }
 0x2dc   :  { %3931 = vrot.lane.b32.xlu0 %v3930_v15, %s4081_s0  ;;  %v2213_v40 = vmul.f32 %v6339_v20, %v6181_v54  ;;  %v3941_v61 = vpack.i.bf16 %v2305_v41, %v2303_v52  ;;  %v2356_v47 = vrot.slane %v2155_v12, 4  ;;  %v2280_v9 = vrot.slane %v2274_v55, 6 }
 0x2dd   :  { %v6355_v56 = vsel %vm844_vm8, %v7467_v39, %v6339_v20  ;;  %v2354_v46 = vrot.slane %v2154_v24, 4  ;;  %v2452_v22 = vsel %vm647_vm7, %v2449_v30, %v7144_v0  ;;  %v2450_v51 = vsel %vm647_vm7, %v2447_v44, %v2449_v30 }
 0x2de   :  { %3962 = vrot.lane.b32.xlu2 %v3961_v19, %s4079_s19  ;;  %v2212_v48 = vmul.f32 %v6355_v56, %v6173_v2  ;;  %v2409_v25 = vrot.slane %v2213_v40, 6  ;;  %v7468_v15 = vrot.slane %v6078_v33, 6  ;;  %v3971_v24 = vpack.i.bf16 %v2452_v22, %v2450_v51  ;;  %v6389_v39 = vpop.permute.xlu1 %2223 }
 0x2df   :  { %v7469_v12 = vrot.slane %v6227_v63, 4  ;;  %v2357_v52 = vsel %vm1925_vm9, %v2354_v46, %v2356_v47  ;;  %v6377_v41 = vmul.f32 0.0, %v2280_v9  ;;  %v7471_v30 = vrot.slane %v6257_v58, 6  ;;  %v6387_v63 = vpop.permute.xlu2 %2227  ;;  %v4030_v47 = vld [vmem:[%s7013_s2 + $0x18] sm:$0xff] }
 0x2e0   :  { %v2407_v28 = vrot.slane %v2212_v48, 6  ;;  %v6370_v19 = vsel %vm761_vm3, %v7468_v15, %v2280_v9  ;;  %v2233_v40 = vmul.f32 %v6387_v63, %v6181_v54  ;;  %vm7142_vm13 = vcmask 523264  }
 0x2e1   :  { %3942 = vrot.lane.b32.xlu1 %v3941_v61, %s4076_s16  ;;  %v2355_v6 = vsel %vm1925_vm9, %v7469_v12, %v2354_v46  ;;  %7470 = vst [vmem:[#allocation40_spill] sm:$0xff] %v6377_v41  ;;  %v2290_v44 = vmul.f32 %v6370_v19, %v6181_v54  ;;  %v2232_v61 = vmul.f32 %v6389_v39, %v6173_v2  ;;  %v7143_v58 = vrot.slane %v6377_v41, 2 }
 0x2e2   :  { %v3951_v33 = vpack.i.bf16 %v2357_v52, %v2355_v6  ;;  %v2408_v55 = vsel %vm761_vm3, %v7471_v30, %v2407_v28  ;;  %v3773_v52 = vld [vmem:[%s7016_s5 + $0x10] sm:$0xff]  ;;  %v3771_v30 = vld [vmem:[%s7016_s5] sm:$0xff]  ;;  %vm7141_vm0 = vcmask 588800  }
 0x2e3   :  { %v2475_v46 = vrot.slane %v2290_v44, 2  ;;  %v3956_v9 = vpack.i.bf16 %v2233_v40, %v2232_v61  ;;  %v3772_v44 = vld [vmem:[%s7016_s5 + $0x8] sm:$0xff] }
 0x2e4   :  { %2062 = vperm.xlu0 %3935, %v5972_v21   ;;  %v2410_v21 = vsel %vm761_vm3, %v2407_v28, %v2409_v25  ;;  %v4031_v28 = vld [vmem:[%s7013_s2 + $0x8] sm:$0xff] }
 0x2e5   :  { %v3966_v48 = vpack.i.bf16 %v2410_v21, %v2408_v55  ;;  %v2476_v54 = vsel %vm844_vm8, %v2473_v34, %v2475_v46  ;;  %v2478_v22 = vsel %vm844_vm8, %v2475_v46, %v7143_v58 }
 0x2e6   :  { %3972 = vrot.lane.b32.xlu2 %v3971_v24, %s4081_s0  ;;  %v3976_v51 = vpack.i.bf16 %v2478_v22, %v2476_v54 }
 0x2e7   :  { %v6417_v36 = vpop.permute.xlu2 %2052 }
 0x2e9   :  { %3952 = vrot.lane.b32.xlu1 %v3951_v33, %s4077_s17  ;;  %v6437_v33 = vpop.permute.xlu1 %2047 }
 0x2ec   :  { %3967 = vrot.lane.b32.xlu0 %v3966_v48, %s4078_s18 }
 0x2ed   :  { %3981 = vset.pattern.permute.xlu0 %v7413_v27 }
 0x2ee   :  { %438 = vperm.xlu2 %3899, %v4030_v47  }
 0x2ef   :  { %v6420_v34 = vpop.permute.xlu2 %2057 }
 0x2f1   :  { %3957 = vrot.lane.b32.xlu1 %v3956_v9, %s4074_s4  ;;  %v2065_v9 = vmul.f32 %v6437_v33, %v6104_v42 }
 0x2f4   :  { %3977 = vrot.lane.b32.xlu0 %v3976_v51, %s4080_s20 }
 0x2f6   :  { %3983 = vset.pattern.permute.xlu2 %v7350_v11 }
 0x2f7   :  { %1401 = vperm.xlu2 %3983, %v4031_v28  }
 0x2f9   :  { %428 = vperm.xlu1 %3898, %v4031_v28  }
 0x2fc   :  { %915 = vperm.xlu0 %3981, %v4031_v28  }
 0x2ff   :  { %3985 = vset.pattern.permute.xlu2 %v7395_v62  ;;  %v2538_v62 = vld [vmem:[%s7016_s5 + $0x20] sm:$0xf] }
 0x300   :  { %v2558_v15 = vunpack.c.l.b16 %v2538_v62 }
 0x301   :  { %3982 = vset.pattern.permute.xlu1 %v7413_v27 }
 0x302   :  { %923 = vperm.xlu1 %3982, %v4030_v47   ;;  %v2563_v24 = vpack.c.b16 %v2558_v15, %v2558_v15 }
 0x304   :  { %3986 = vset.pattern.permute.xlu0 %v7410_v5  ;;  %v2576_v12 = vsel %vm1925_vm9, %v2563_v24, 0  ;;  %v3774_v5 = vld [vmem:[%s7016_s5 + $0x18] sm:$0xff] }
 0x305   :  { %2581 = vmatpush.bf16.msra.mxu2 %v2576_v12 }
 0x309   :  { %2582 = vmatpush.bf16.msra.mxu2 %v3774_v5 }
 0x30a   :  { %3984 = vset.pattern.permute.xlu1 %v7350_v11 }
 0x30b   :  { %1409 = vperm.xlu1 %3984, %v4030_v47   ;;  %v2066_v47 = vmul.f32 %v6417_v36, %v6084_v16 }
 0x30d   :  { %2583 = vmatpush.bf16.msra.mxu2 %v3773_v52 }
 0x311   :  { %2584 = vmatpush.bf16.msra.mxu2 %v3772_v44 }
 0x313   :  { %3987 = vset.pattern.permute.xlu1 %v7413_v27 }
 0x315   :  { %2585 = vmatpush.bf16.msra.mxu2 %v3771_v30 }
 0x31c   :  { %v6422_v25 = vpop.permute.xlu2 %3901 }
 0x328   :  { %v3917_v6 = vpop.permute.xlu2 %3916 }
 0x329   :  { %v3919_v5 = vunpack.i.h.bf16 %v3917_v6  ;;  %v3918_v16 = vunpack.i.l.bf16 %v3917_v6 }
 0x330   :  { %v6442_v55 = vpop.permute.xlu2 %3947 }
 0x338   :  { %v3912_v21 = vpop.permute.xlu1 %3911  ;;  %v6444_v40 = vpop.permute.xlu2 %3962 }
 0x339   :  { %v3914_v54 = vunpack.i.h.bf16 %v3912_v21  ;;  %v3913_v22 = vunpack.i.l.bf16 %v3912_v21 }
 0x33c   :  { %v3907_v48 = vpop.permute.xlu0 %3906 }
 0x33d   :  { %v3909_v61 = vunpack.i.h.bf16 %v3907_v48  ;;  %v3908_v46 = vunpack.i.l.bf16 %v3907_v48 }
 0x33f   :  { %v2491_v51 = vsel %vm1963_vm10, %v2065_v9, %v3908_v46  ;;  %v2492_v28 = vsel %vm1963_vm10, %v2066_v47, %v3909_v61 }
 0x340   :  { %v2496_v15 = vsel %vm2495_vm1, %v2491_v51, %v3913_v22  ;;  %v2497_v24 = vsel %vm2495_vm1, %v2492_v28, %v3914_v54  ;;  %v6454_v42 = vpop.permute.xlu2 %3972  ;;  %v3904_v54 = vunpack.i.h.bf16 %v6422_v25  ;;  %v3903_v51 = vunpack.i.l.bf16 %v6422_v25 }
 0x341   :  { %v2501_v48 = vsel %vm2500_vm4, %v2496_v15, %v3918_v16  ;;  %v2502_v61 = vsel %vm2500_vm4, %v2497_v24, %v3919_v5 }
 0x343   :  { %v3927_v62 = vpop.permute.xlu1 %3926 }
 0x344   :  { %v3929_v30 = vunpack.i.h.bf16 %v3927_v62  ;;  %v3928_v21 = vunpack.i.l.bf16 %v3927_v62 }
 0x346   :  { %v3922_v12 = vpop.permute.xlu0 %3921 }
 0x347   :  { %v3924_v52 = vunpack.i.h.bf16 %v3922_v12  ;;  %v3923_v44 = vunpack.i.l.bf16 %v3922_v12 }
 0x348   :  { %v439_v25 = vpop.permute.xlu2 %438 }
 0x349   :  { %v2506_v46 = vsel %vm2505_vm5, %v2501_v48, %v3923_v44  ;;  %v2507_v47 = vsel %vm2505_vm5, %v2502_v61, %v3924_v52 }
 0x34a   :  { %v2511_v6 = vsel %vm2510_vm6, %v2506_v46, %v3928_v21  ;;  %v2512_v22 = vsel %vm2510_vm6, %v2507_v47, %v3929_v30  ;;  %v7472_v46 = vld [vmem:[#allocation44_spill] sm:$0xff] }
 0x34b   :  { %v3938_v9 = vpop.permute.xlu1 %3937  ;;  %v2516_v5 = vsel %vm7150_vm11, %v2511_v6, %v3903_v51  ;;  %v2517_v16 = vsel %vm7150_vm11, %v2512_v22, %v3904_v54  ;;  %v504_v47 = vmul.f32 %v439_v25, %v7472_v46  ;;  %v2067_v51 = vmul.f32 %v6420_v34, %v6087_v1 }
 0x34c   :  { %v3940_v28 = vunpack.i.h.bf16 %v3938_v9  ;;  %v3939_v62 = vunpack.i.l.bf16 %v3938_v9  ;;  %v3965_v25 = vunpack.i.h.bf16 %v6444_v40 }
 0x34e   :  { %v3932_v15 = vpop.permute.xlu0 %3931 }
 0x34f   :  { %v3934_v24 = vunpack.i.h.bf16 %v3932_v15  ;;  %v3933_v12 = vunpack.i.l.bf16 %v3932_v15 }
 0x351   :  { %v2521_v52 = vsel %vm7149_vm12, %v2516_v5, %v3933_v12  ;;  %v2522_v44 = vsel %vm7149_vm12, %v2517_v16, %v3934_v24  ;;  %v3950_v12 = vunpack.i.h.bf16 %v6442_v55  ;;  %v3949_v5 = vunpack.i.l.bf16 %v6442_v55 }
 0x352   :  { %v2526_v30 = vsel %vm7142_vm13, %v2521_v52, %v3939_v62  ;;  %v2527_v21 = vsel %vm7142_vm13, %v2522_v44, %v3940_v28  ;;  %v700_v28 = vmax.f32 %v504_v47, %v5534_v32 }
 0x353   :  { %v2539_v48 = vpack.c.bf16 %v2527_v21, %v2526_v30  ;;  %v3943_v61 = vpop.permute.xlu1 %3942 }
 0x354   :  { %v3945_v6 = vunpack.i.h.bf16 %v3943_v61  ;;  %v3944_v54 = vunpack.i.l.bf16 %v3943_v61  ;;  %v897_v1 = vmax.f32 %v700_v28, %v5576_v50  ;;  %v3974_v50 = vunpack.i.l.bf16 %v6454_v42 }
 0x355   :  { %3717 = vmatmul.msk.bf16.vlgmr.msra.gmra.mxu2 %vm7141_vm0, %v2539_v48  ;;  %v3964_v48 = vunpack.i.l.bf16 %v6444_v40 }
 0x356   :  { %v6472_v9 = vpop.permute.xlu0 %2062  ;;  %v2493_v62 = vsel %vm1963_vm10, %v2067_v51, %v3944_v54 }
 0x357   :  { %v2068_v22 = vmul.f32 %v6472_v9, %v6173_v2  ;;  %v2498_v44 = vsel %vm2495_vm1, %v2493_v62, %v3949_v5  ;;  %v3975_v62 = vunpack.i.h.bf16 %v6454_v42 }
 0x359   :  { %v2494_v15 = vsel %vm1963_vm10, %v2068_v22, %v3945_v6 }
 0x35a   :  { %v2499_v2 = vsel %vm2495_vm1, %v2494_v15, %v3950_v12 }
 0x35b   :  { %v3953_v24 = vpop.permute.xlu1 %3952 }
 0x35c   :  { %v3955_v16 = vunpack.i.h.bf16 %v3953_v24  ;;  %v3954_v52 = vunpack.i.l.bf16 %v3953_v24 }
 0x35e   :  { %v3968_v30 = vpop.permute.xlu0 %3967  ;;  %v2503_v32 = vsel %vm2500_vm4, %v2498_v44, %v3954_v52  ;;  %v2504_v21 = vsel %vm2500_vm4, %v2499_v2, %v3955_v16 }
 0x35f   :  { %v2508_v61 = vsel %vm2505_vm5, %v2503_v32, %v3964_v48  ;;  %v2509_v55 = vsel %vm2505_vm5, %v2504_v21, %v3965_v25  ;;  %v3970_v47 = vunpack.i.h.bf16 %v3968_v30  ;;  %v3969_v6 = vunpack.i.l.bf16 %v3968_v30  ;;  %v7473_v21 = vld [vmem:[#allocation12_spill] sm:$0xff]  ;;  %v7474_v48 = vld [vmem:[#allocation62_spill] sm:$0xff] }
 0x361   :  { %v2514_v28 = vsel %vm2510_vm6, %v2509_v55, %v3970_v47  ;;  %v2513_v15 = vsel %vm2510_vm6, %v2508_v61, %v3969_v6  ;;  %v7475_v47 = vld [vmem:[#allocation21_spill] sm:$0xff] }
 0x363   :  { %v3958_v54 = vpop.permute.xlu1 %3957 }
 0x364   :  { %v3960_v22 = vunpack.i.h.bf16 %v3958_v54  ;;  %v3959_v51 = vunpack.i.l.bf16 %v3958_v54  ;;  %v7476_v54 = vld [vmem:[#allocation38_spill] sm:$0xff] }
 0x366   :  { %v2518_v24 = vsel %vm7150_vm11, %v2513_v15, %v3959_v51  ;;  %v2519_v40 = vsel %vm7150_vm11, %v2514_v28, %v3960_v22  ;;  %v3978_v12 = vpop.permute.xlu0 %3977 }
 0x367   :  { %v3980_v5 = vunpack.i.h.bf16 %v3978_v12  ;;  %v3979_v16 = vunpack.i.l.bf16 %v3978_v12  ;;  %v2523_v52 = vsel %vm7149_vm12, %v2518_v24, %v3974_v50  ;;  %v2524_v44 = vsel %vm7149_vm12, %v2519_v40, %v3975_v62  ;;  %v1402_v50 = vpop.permute.xlu2 %1401  ;;  %v7477_v62 = vld [vmem:[#allocation17_spill] sm:$0xff]  ;;  %v7478_v24 = vld [vmem:[#allocation67_spill] sm:$0xff] }
 0x368   :  { %v1461_v12 = vmul.f32 %v1402_v50, %v7472_v46 }
 0x369   :  { %v2528_v2 = vsel %vm7142_vm13, %v2523_v52, %v3979_v16  ;;  %v2529_v30 = vsel %vm7142_vm13, %v2524_v44, %v3980_v5  ;;  %v7479_v5 = vld [vmem:[#allocation35_spill] sm:$0xff] }
 0x36a   :  { %v2540_v42 = vpack.c.bf16 %v2529_v30, %v2528_v2  ;;  %v7480_v2 = vld [vmem:[#allocation8_spill] sm:$0xff] }
 0x36b   :  { %v429_v32 = vpop.permute.xlu1 %428 }
 0x36c   :  { %v502_v25 = vmul.f32 %v429_v32, %v7473_v21  ;;  %3718 = vmatmul.msk.bf16.gmra.mxu2 %vm7141_vm0, %v2540_v42  ;;  %v7481_v42 = vld [vmem:[#allocation25_spill] sm:$0xff] }
 0x36d   :  { %v7482_v21 = vld [vmem:[#allocation9_spill] sm:$0xff] }
 0x36e   :  { %v698_v61 = vmax.f32 %v502_v25, %v7474_v48  ;;  %v916_v55 = vpop.permute.xlu0 %915  ;;  %v7483_v48 = vld [vmem:[#allocation41_spill] sm:$0xff] }
 0x36f   :  { %v975_v22 = vmul.f32 %v916_v55, %v7476_v54 }
 0x370   :  { %v895_v6 = vmax.f32 %v698_v61, %v7475_v47  ;;  %v7484_v47 = vld [vmem:[#allocation10_spill] sm:$0xff] }
 0x372   :  { %v991_v51 = vmax.f32 %v895_v6, %v975_v22  ;;  %v7485_v22 = vld [vmem:[#allocation32_spill] sm:$0xff] }
 0x374   :  { %v1186_v28 = vmax.f32 %v991_v51, %v7477_v62  ;;  %v924_v15 = vpop.permute.xlu1 %923  ;;  %v7486_v51 = vld [vmem:[#allocation53_spill] sm:$0xff] }
 0x375   :  { %v977_v40 = vmul.f32 %v924_v15, %v7478_v24 }
 0x376   :  { %v1381_v16 = vmax.f32 %v1186_v28, %v7479_v5 }
 0x377   :  { %v993_v52 = vmax.f32 %v897_v1, %v977_v40 }
 0x378   :  { %v1477_v44 = vmax.f32 %v1381_v16, %v1461_v12 }
 0x379   :  { %v1188_v30 = vmax.f32 %v993_v52, %v7480_v2 }
 0x37a   :  { %v1672_v32 = vmax.f32 %v1477_v44, %v7481_v42 }
 0x37b   :  { %v1383_v25 = vmax.f32 %v1188_v30, %v7482_v21 }
 0x37c   :  { %v1867_v61 = vmax.f32 %v1672_v32, %v7483_v48 }
 0x37d   :  { %v1410_v55 = vpop.permute.xlu1 %1409 }
 0x37e   :  { %1883 = vst.msk [vmem:[#allocation2 + $0x8] sm:$0xff] %vm184_vm2, %v1867_v61  ;;  %v1463_v6 = vmul.f32 %v1410_v55, %v7484_v47 }
 0x380   :  { %v1479_v54 = vmax.f32 %v1383_v25, %v1463_v6 }
 0x382   :  { %v1674_v46 = vmax.f32 %v1479_v54, %v7485_v22 }
 0x384   :  { %v1869_v50 = vmax.f32 %v1674_v46, %v7486_v51 }
 0x386   :  { %1885 = vst.msk [vmem:[#allocation2 + $0x18] sm:$0xff] %vm184_vm2, %v1869_v50 }
 0x3d8   :  { %v2587_v1 = vpop.f32.mrf.mxu2 }
 0x3d9   :  { %v2610_v24 = vmul.f32 %v2587_v1, %v2587_v1  ;;  %v2597_v5 = vsel %vm1963_vm10, %v2587_v1, 0.0 }
 0x3db   :  { %v2614_v2 = vsel %vm1963_vm10, %v2610_v24, 0.0 }
 0x3e0   :  { %v2589_v62 = vpop.f32.mrf.mxu2 }
 0x3e1   :  { %v2611_v15 = vmul.f32 %v2589_v62, %v2589_v62  ;;  %v2598_v40 = vsel %vm1963_vm10, %v2589_v62, 0.0 }
 0x3e2   :  { %v2599_v44 = vadd.f32 %v2598_v40, %v2597_v5  ;;  %v2655_v5 = vld [vmem:[%s7017_s6] sm:$0xf] }
 0x3e3   :  { %v2615_v16 = vsel %vm1963_vm10, %v2611_v15, 0.0 }
 0x3e4   :  { %v2616_v42 = vadd.f32 %v2615_v16, %v2614_v2  ;;  %v2665_v16 = vsel %vm1925_vm9, %v2655_v5, 0 }
 0x3e5   :  { %2674 = vmatpush.bf16.msrb.mxu3 %v2665_v16 }
 0x3ef   :  { %v6520_v28 = vpop.f32.mrf.mxu2 }
 0x3f0   :  { %v2612_v12 = vmul.f32 %v6520_v28, %v6520_v28  ;;  %v2600_v52 = vsel %vm1963_vm10, %v6520_v28, 0.0 }
 0x3f1   :  { %v2601_v32 = vadd.f32 %v2600_v52, %v2599_v44 }
 0x3f2   :  { %v2617_v30 = vsel %vm1963_vm10, %v2612_v12, 0.0 }
 0x3f3   :  { %v2618_v61 = vadd.f32 %v2617_v30, %v2616_v42 }
 0x3f7   :  { %v2594_v21 = vpop.f32.mrf.mxu2 }
 0x3f8   :  { %v2602_v25 = vsel %vm1963_vm10, %v2594_v21, 0.0  ;;  %v2613_v48 = vmul.f32 %v2594_v21, %v2594_v21 }
 0x3f9   :  { %v2603_v55 = vadd.f32 %v2602_v25, %v2601_v32 }
 0x3fa   :  { %v2619_v47 = vsel %vm1963_vm10, %v2613_v48, 0.0 }
 0x3fb   :  { %v2604_v6 = vrot.slane %v2603_v55, 4  ;;  %v2620_v54 = vadd.f32 %v2619_v47, %v2618_v61 }
 0x3fd   :  { %v2605_v22 = vadd.f32 %v2604_v6, %v2603_v55  ;;  %v2621_v46 = vrot.slane %v2620_v54, 4 }
 0x3ff   :  { %v2606_v51 = vrot.slane %v2605_v22, 2  ;;  %v2622_v50 = vadd.f32 %v2621_v46, %v2620_v54 }
 0x401   :  { %v2607_v15 = vadd.f32 %v2606_v51, %v2605_v22  ;;  %v2623_v24 = vrot.slane %v2622_v50, 2 }
 0x403   :  { %v2608_v40 = vrot.slane %v2607_v15, 1  ;;  %v2624_v12 = vadd.f32 %v2623_v24, %v2622_v50 }
 0x405   :  { %v2609_v52 = vadd.f32 %v2608_v40, %v2607_v15  ;;  %v2625_v44 = vrot.slane %v2624_v12, 1 }
 0x407   :  { %v2626_v2 = vadd.f32 %v2625_v44, %v2624_v12  ;;  %v2627_v30 = vmul.f32 0.03125, %v2609_v52 }
 0x409   :  { %v2628_v42 = vmul.f32 0.03125, %v2626_v2  ;;  %v2629_v32 = vmul.f32 %v2627_v30, %v2627_v30  ;;  %v2632_v51 = vsub.f32 %v2587_v1, %v2627_v30  ;;  %v2633_v50 = vsub.f32 %v2589_v62, %v2627_v30  ;;  %v6540_v1 = vpop.f32.mrf.mxu1 }
 0x40a   :  { %v2635_v52 = vsub.f32 %v2594_v21, %v2627_v30  ;;  %v2634_v44 = vsub.f32 %v6520_v28, %v2627_v30  ;;  %v2763_v30 = vsel %vm1963_vm10, %v6540_v1, 0.0 }
 0x40b   :  { %v2630_v25 = vsub.f32 %v2628_v42, %v2629_v32 }
 0x40d   :  { %v2631_v48 = vmax.f32 %v2630_v25, 0.0 }
 0x40f   :  { %v2636_v61 = vadd.f32 1e-05, %v2631_v48 }
 0x411   :  { %4008 = vrsqrt.f32 %v2636_v61  ;;  %vm2643_vm0 = vweird.f32 %v2636_v61  ;;  %v6542_v62 = vpop.f32.mrf.mxu1 }
 0x412   :  { %v2777_v21 = vmul.f32 %v6542_v62, %v6542_v62 }
 0x417   :  { %v4009_v55 = vpop.eup %4008 }
 0x418   :  { %v2638_v47 = vmul.f32 %v4009_v55, %v2636_v61  ;;  %vm2644_vm2 = vweird.f32 %v4009_v55 }
 0x419   :  { %vm2645_vm13 = vmor %vm2643_vm0, %vm2644_vm2  ;;  %v6544_v61 = vpop.f32.mrf.mxu1 }
 0x41a   :  { %v2639_v6 = vmul.f32 %v4009_v55, %v2638_v47  ;;  %v2776_v47 = vmul.f32 %v6540_v1, %v6540_v1 }
 0x41c   :  { %v2640_v54 = vmul.f32 0.5, %v2639_v6  ;;  %v2766_v6 = vsel %vm1963_vm10, %v6544_v61, 0.0 }
 0x41e   :  { %v2641_v22 = vsub.f32 1.5, %v2640_v54  ;;  %v2778_v54 = vmul.f32 %v6544_v61, %v6544_v61 }
 0x420   :  { %v2642_v46 = vmul.f32 %v4009_v55, %v2641_v22 }
 0x421   :  { %v6550_v28 = vpop.f32.mrf.mxu1 }
 0x422   :  { %v2646_v15 = vsel %vm2645_vm13, %v4009_v55, %v2642_v46  ;;  %v2764_v55 = vsel %vm1963_vm10, %v6542_v62, 0.0  ;;  %v2781_v46 = vsel %vm1963_vm10, %v2777_v21, 0.0 }
 0x423   :  { %v2647_v24 = vmul.f32 %v2646_v15, %v2632_v51  ;;  %v2648_v40 = vmul.f32 %v2646_v15, %v2633_v50  ;;  %v2650_v2 = vmul.f32 %v2646_v15, %v2635_v52  ;;  %v2649_v42 = vmul.f32 %v2646_v15, %v2634_v44 }
 0x424   :  { %v2765_v22 = vadd.f32 %v2764_v55, %v2763_v30  ;;  %v2768_v51 = vsel %vm1963_vm10, %v6550_v28, 0.0  ;;  %v2779_v50 = vmul.f32 %v6550_v28, %v6550_v28 }
 0x425   :  { %v2651_v12 = vmax.f32 %v2647_v24, 0.0  ;;  %v2652_v5 = vmax.f32 %v2648_v40, 0.0  ;;  %v2653_v32 = vmax.f32 %v2649_v42, 0.0  ;;  %v2654_v25 = vmax.f32 %v2650_v2, 0.0 }
 0x426   :  { %v2767_v15 = vadd.f32 %v2766_v6, %v2765_v22  ;;  %v2780_v24 = vsel %vm1963_vm10, %v2776_v47, 0.0  ;;  %v2783_v40 = vsel %vm1963_vm10, %v2778_v54, 0.0 }
 0x427   :  { %v2656_v16 = vpack.c.bf16 %v2652_v5, %v2651_v12  ;;  %v2657_v48 = vpack.c.bf16 %v2654_v25, %v2653_v32  ;;  %v2782_v12 = vadd.f32 %v2781_v46, %v2780_v24 }
 0x428   :  { %v2769_v5 = vadd.f32 %v2768_v51, %v2767_v15 }
 0x429   :  { %3719 = vmatmul.msk.bf16.vlgmr.msrb.gmra.mxu3 %vm1963_vm10, %v2656_v16  ;;  %v2785_v16 = vsel %vm1963_vm10, %v2779_v50, 0.0  ;;  %v2784_v52 = vadd.f32 %v2783_v40, %v2782_v12 }
 0x42a   :  { %v2770_v44 = vrot.slane %v2769_v5, 4 }
 0x42b   :  { %v2786_v2 = vadd.f32 %v2785_v16, %v2784_v52 }
 0x42c   :  { %v2771_v42 = vadd.f32 %v2770_v44, %v2769_v5 }
 0x42d   :  { %v2787_v32 = vrot.slane %v2786_v2, 4 }
 0x42e   :  { %v2772_v25 = vrot.slane %v2771_v42, 2 }
 0x430   :  { %v2773_v21 = vadd.f32 %v2772_v25, %v2771_v42 }
 0x432   :  { %v2774_v6 = vrot.slane %v2773_v21, 1 }
 0x434   :  { %v2775_v54 = vadd.f32 %v2774_v6, %v2773_v21 }
 0x436   :  { %v6572_v15 = vmul.f32 0.03125, %v2775_v54 }
 0x438   :  { %v2795_v40 = vmul.f32 %v6572_v15, %v6572_v15 }
 0x439   :  { %3720 = vmatmul.msk.bf16.gmra.mxu3 %vm1963_vm10, %v2657_v48  ;;  %v2788_v48 = vadd.f32 %v2787_v32, %v2786_v2 }
 0x43b   :  { %v2789_v30 = vrot.slane %v2788_v48, 2 }
 0x43d   :  { %v2790_v22 = vadd.f32 %v2789_v30, %v2788_v48 }
 0x43f   :  { %v2791_v46 = vrot.slane %v2790_v22, 1 }
 0x441   :  { %v2792_v51 = vadd.f32 %v2791_v46, %v2790_v22 }
 0x443   :  { %v2794_v24 = vmul.f32 0.03125, %v2792_v51 }
 0x445   :  { %v2796_v44 = vsub.f32 %v2794_v24, %v2795_v40 }
 0x447   :  { %v2797_v54 = vmax.f32 %v2796_v44, 0.0 }
 0x4ac   :  { %v6568_v55 = vpop.f32.mrf.mxu3 }
 0x4ad   :  { %v2699_v5 = vmul.f32 %v6568_v55, %v6568_v55  ;;  %v2686_v2 = vsel %vm1963_vm10, %v6568_v55, 0.0 }
 0x4af   :  { %v2703_v48 = vsel %vm1963_vm10, %v2699_v5, 0.0  ;;  %v2802_v5 = vadd.f32 1e-05, %v2797_v54 }
 0x4b1   :  { %4010 = vrsqrt.f32 %v2802_v5  ;;  %vm2809_vm13 = vweird.f32 %v2802_v5 }
 0x4b4   :  { %v6570_v47 = vpop.f32.mrf.mxu3 }
 0x4b5   :  { %v2700_v12 = vmul.f32 %v6570_v47, %v6570_v47  ;;  %v2687_v16 = vsel %vm1963_vm10, %v6570_v47, 0.0 }
 0x4b6   :  { %v2688_v25 = vadd.f32 %v2687_v16, %v2686_v2 }
 0x4b7   :  { %v2704_v42 = vsel %vm1963_vm10, %v2700_v12, 0.0  ;;  %v4011_v41 = vpop.eup %4010 }
 0x4b8   :  { %v2705_v30 = vadd.f32 %v2704_v42, %v2703_v48  ;;  %vm2810_vm0 = vweird.f32 %v4011_v41 }
 0x4b9   :  { %vm2811_vm2 = vmor %vm2809_vm13, %vm2810_vm0 }
 0x4bc   :  { %v6574_v50 = vpop.f32.mrf.mxu3 }
 0x4bd   :  { %v2701_v52 = vmul.f32 %v6574_v50, %v6574_v50  ;;  %v2689_v32 = vsel %vm1963_vm10, %v6574_v50, 0.0 }
 0x4be   :  { %v2690_v6 = vadd.f32 %v2689_v32, %v2688_v25 }
 0x4bf   :  { %v2706_v21 = vsel %vm1963_vm10, %v2701_v52, 0.0 }
 0x4c0   :  { %v2707_v24 = vadd.f32 %v2706_v21, %v2705_v30  ;;  %v2804_v30 = vmul.f32 %v4011_v41, %v2802_v5 }
 0x4c4   :  { %v6593_v22 = vpop.f32.mrf.mxu3 }
 0x4c5   :  { %v2691_v46 = vsel %vm1963_vm10, %v6593_v22, 0.0  ;;  %v2702_v51 = vmul.f32 %v6593_v22, %v6593_v22 }
 0x4c6   :  { %v2692_v40 = vadd.f32 %v2691_v46, %v2690_v6 }
 0x4c7   :  { %v2708_v12 = vsel %vm1963_vm10, %v2702_v51, 0.0 }
 0x4c8   :  { %v2693_v16 = vrot.slane %v2692_v40, 4  ;;  %v2709_v2 = vadd.f32 %v2708_v12, %v2707_v24  ;;  %v2805_v24 = vmul.f32 %v4011_v41, %v2804_v30 }
 0x4ca   :  { %v2694_v58 = vadd.f32 %v2693_v16, %v2692_v40  ;;  %v2710_v52 = vrot.slane %v2709_v2, 4  ;;  %v2806_v12 = vmul.f32 0.5, %v2805_v24 }
 0x4cc   :  { %v2695_v42 = vrot.slane %v2694_v58, 2  ;;  %v2711_v32 = vadd.f32 %v2710_v52, %v2709_v2  ;;  %v2807_v16 = vsub.f32 1.5, %v2806_v12 }
 0x4ce   :  { %v2696_v25 = vadd.f32 %v2695_v42, %v2694_v58  ;;  %v2712_v44 = vrot.slane %v2711_v32, 2  ;;  %v2808_v52 = vmul.f32 %v4011_v41, %v2807_v16 }
 0x4d0   :  { %v2697_v48 = vrot.slane %v2696_v25, 1  ;;  %v2713_v0 = vadd.f32 %v2712_v44, %v2711_v32  ;;  %v2801_v44 = vsub.f32 %v6550_v28, %v6572_v15 }
 0x4d2   :  { %v2698_v27 = vadd.f32 %v2697_v48, %v2696_v25  ;;  %v2714_v11 = vrot.slane %v2713_v0, 1  ;;  %v2800_v25 = vsub.f32 %v6544_v61, %v6572_v15 }
 0x4d4   :  { %v2715_v4 = vadd.f32 %v2714_v11, %v2713_v0  ;;  %v2716_v21 = vmul.f32 0.03125, %v2698_v27  ;;  %v2812_v11 = vsel %vm2811_vm2, %v4011_v41, %v2808_v52  ;;  %v2798_v27 = vsub.f32 %v6540_v1, %v6572_v15 }
 0x4d5   :  { %v2799_v0 = vsub.f32 %v6542_v62, %v6572_v15  ;;  %v2815_v62 = vmul.f32 %v2812_v11, %v2800_v25 }
 0x4d6   :  { %v2717_v6 = vmul.f32 0.03125, %v2715_v4  ;;  %v2718_v46 = vmul.f32 %v2716_v21, %v2716_v21  ;;  %v2813_v48 = vmul.f32 %v2812_v11, %v2798_v27  ;;  %v2721_v5 = vsub.f32 %v6568_v55, %v2716_v21 }
 0x4d7   :  { %v2722_v41 = vsub.f32 %v6570_v47, %v2716_v21  ;;  %v2723_v1 = vsub.f32 %v6574_v50, %v2716_v21 }
 0x4d8   :  { %v2719_v51 = vsub.f32 %v2717_v6, %v2718_v46  ;;  %v2724_v6 = vsub.f32 %v6593_v22, %v2716_v21  ;;  %v2814_v46 = vmul.f32 %v2812_v11, %v2799_v0 }
 0x4da   :  { %v2720_v54 = vmax.f32 %v2719_v51, 0.0  ;;  %v2816_v51 = vmul.f32 %v2812_v11, %v2801_v44 }
 0x4dc   :  { %v2725_v40 = vadd.f32 1e-05, %v2720_v54 }
 0x4de   :  { %4012 = vrsqrt.f32 %v2725_v40  ;;  %vm2732_vm11 = vweird.f32 %v2725_v40 }
 0x4e4   :  { %v4013_v2 = vpop.eup %4012 }
 0x4e5   :  { %v2727_v58 = vmul.f32 %v4013_v2, %v2725_v40  ;;  %vm2733_vm12 = vweird.f32 %v4013_v2 }
 0x4e6   :  { %vm2734_vm0 = vmor %vm2732_vm11, %vm2733_vm12 }
 0x4e7   :  { %v2728_v42 = vmul.f32 %v4013_v2, %v2727_v58 }
 0x4e9   :  { %v2729_v32 = vmul.f32 0.5, %v2728_v42 }
 0x4eb   :  { %v2730_v4 = vsub.f32 1.5, %v2729_v32 }
 0x4ed   :  { %v2731_v30 = vmul.f32 %v4013_v2, %v2730_v4 }
 0x4ef   :  { %v2735_v24 = vsel %vm2734_vm0, %v4013_v2, %v2731_v30 }
 0x4f0   :  { %v2736_v61 = vmul.f32 %v2735_v24, %v2721_v5  ;;  %v2737_v54 = vmul.f32 %v2735_v24, %v2722_v41  ;;  %v2738_v12 = vmul.f32 %v2735_v24, %v2723_v1  ;;  %v2739_v28 = vmul.f32 %v2735_v24, %v2724_v6 }
 0x4f2   :  { %v2817_v15 = vadd.f32 %v2813_v48, %v2736_v61  ;;  %v2818_v16 = vadd.f32 %v2814_v46, %v2737_v54  ;;  %v2819_v40 = vadd.f32 %v2815_v62, %v2738_v12  ;;  %v2820_v58 = vadd.f32 %v2816_v51, %v2739_v28 }
 0x4f4   :  { %v2821_v55 = vmax.f32 %v2817_v15, 0.0  ;;  %v2822_v52 = vmax.f32 %v2818_v16, 0.0  ;;  %v2823_v47 = vmax.f32 %v2819_v40, 0.0  ;;  %v2824_v42 = vmax.f32 %v2820_v58, 0.0 }
 0x4f6   :  { %v2829_v50 = vrot.slane %v2821_v55, 3  ;;  %v2830_v32 = vrot.slane %v2822_v52, 3  ;;  %v2832_v22 = vrot.slane %v2823_v47, 3  ;;  %v2834_v21 = vrot.slane %v2824_v42, 3 }
 0x4f8   :  { %v6613_v27 = vsel %vm2030_vm14, %v2829_v50, %v2830_v32  ;;  %v6616_v2 = vsel %vm2030_vm14, %v2830_v32, %v2832_v22  ;;  %v6619_v11 = vsel %vm2030_vm14, %v2832_v22, %v2834_v21  ;;  %v6622_v4 = vsel %vm2030_vm14, 0.0, %v2829_v50 }
 0x4f9   :  { %v6625_v0 = vsel %vm2030_vm14, %v2834_v21, 0.0  ;;  %v2843_v25 = vmul.f32 %v6622_v4, %v6437_v33  ;;  %v2844_v44 = vmul.f32 %v6613_v27, %v6417_v36  ;;  %v2845_v48 = vmul.f32 %v6616_v2, %v6420_v34 }
 0x4fa   :  { %v2846_v30 = vmul.f32 %v6619_v11, %v6472_v9  ;;  %v2847_v5 = vmul.f32 %v6622_v4, %v6093_v17  ;;  %v2848_v41 = vmul.f32 %v6613_v27, %v6130_v10  ;;  %v2849_v1 = vmul.f32 %v6616_v2, %v6017_v60 }
 0x4fb   :  { %v2850_v33 = vmul.f32 %v6619_v11, %v6305_v14  ;;  %v2851_v36 = vmul.f32 %v6625_v0, %v6217_v13  ;;  %v2874_v34 = vmul.f32 %v6622_v4, %v6090_v8  ;;  %v2875_v9 = vmul.f32 %v6613_v27, %v6120_v38 }
 0x4fc   :  { %v2857_v6 = vrot.slane %v2847_v5, 1  ;;  %v2858_v17 = vrot.slane %v2848_v41, 1  ;;  %v2860_v46 = vrot.slane %v2849_v1, 1  ;;  %v2876_v10 = vmul.f32 %v6616_v2, %v6142_v35 }
 0x4fd   :  { %v2862_v62 = vrot.slane %v2850_v33, 1  ;;  %v2864_v60 = vrot.slane %v2851_v36, 1  ;;  %v2877_v14 = vmul.f32 %v6619_v11, %v6188_v3  ;;  %v2878_v13 = vmul.f32 %v6625_v0, %v6154_v53  ;;  %v7487_v36 = vld [vmem:[#allocation11_spill] sm:$0xff] }
 0x4fe   :  { %v2859_v51 = vsel %vm647_vm7, %v2857_v6, %v2858_v17  ;;  %v2861_v8 = vsel %vm647_vm7, %v2858_v17, %v2860_v46  ;;  %v2884_v24 = vrot.slane %v2874_v34, 2  ;;  %v2885_v38 = vrot.slane %v2875_v9, 2 }
 0x4ff   :  { %v2863_v61 = vsel %vm647_vm7, %v2860_v46, %v2862_v62  ;;  %v2865_v54 = vsel %vm647_vm7, %v2862_v62, %v2864_v60  ;;  %v2870_v12 = vmax.f32 %v2843_v25, %v2859_v51  ;;  %v2871_v35 = vmax.f32 %v2844_v44, %v2861_v8  ;;  %v7488_v62 = vld [vmem:[#allocation13_spill] sm:$0xff]  ;;  %v7489_v8 = vld [vmem:[#allocation7_spill] sm:$0xff] }
 0x500   :  { %v2872_v28 = vmax.f32 %v2845_v48, %v2863_v61  ;;  %v2873_v15 = vmax.f32 %v2846_v30, %v2865_v54  ;;  %v2886_v16 = vsel %vm844_vm8, %v2884_v24, %v2885_v38  ;;  %v2887_v3 = vrot.slane %v2876_v10, 2  ;;  %v7491_v54 = vld [vmem:[#allocation14_spill] sm:$0xff] }
 0x501   :  { %v2889_v40 = vrot.slane %v2877_v14, 2  ;;  %v2891_v58 = vrot.slane %v2878_v13, 2  ;;  %v2897_v53 = vmax.f32 %v2870_v12, %v2886_v16  ;;  %v2901_v55 = vmul.f32 %v6622_v4, %v6096_v7 }
 0x502   :  { %v2888_v52 = vsel %vm844_vm8, %v2885_v38, %v2887_v3  ;;  %v2902_v47 = vmul.f32 %v6613_v27, %v6134_v49  ;;  %v2903_v42 = vmul.f32 %v6616_v2, %v6139_v43  ;;  %v2904_v50 = vmul.f32 %v6619_v11, %v6337_v23  ;;  %v7490_v38 = vld [vmem:[#allocation36_spill] sm:$0xff] }
 0x503   :  { %v2890_v32 = vsel %vm844_vm8, %v2887_v3, %v2889_v40  ;;  %v2892_v22 = vsel %vm844_vm8, %v2889_v40, %v2891_v58  ;;  %v2898_v21 = vmax.f32 %v2871_v35, %v2888_v52  ;;  %v2905_v25 = vmul.f32 %v6625_v0, %v6316_v59 }
 0x504   :  { %v2899_v7 = vmax.f32 %v2872_v28, %v2890_v32  ;;  %v2900_v44 = vmax.f32 %v2873_v15, %v2892_v22  ;;  %v2911_v48 = vrot.slane %v2901_v55, 4  ;;  %v2912_v30 = vrot.slane %v2902_v47, 4  ;;  %v7492_v32 = vld [vmem:[#allocation15_spill] sm:$0xff] }
 0x505   :  { %v2914_v5 = vrot.slane %v2903_v42, 4  ;;  %v2916_v49 = vrot.slane %v2904_v50, 4  ;;  %v2918_v41 = vrot.slane %v2905_v25, 4  ;;  %v2928_v43 = vmul.f32 %v6622_v4, %v6113_v18 }
 0x506   :  { %v2913_v23 = vsel %vm1925_vm9, %v2911_v48, %v2912_v30  ;;  %v2929_v1 = vmul.f32 %v6613_v27, %v6152_v31  ;;  %v2930_v33 = vmul.f32 %v6616_v2, %v6148_v45  ;;  %v2931_v59 = vmul.f32 %v6619_v11, %v7487_v36 }
 0x507   :  { %v2915_v34 = vsel %vm1925_vm9, %v2912_v30, %v2914_v5  ;;  %v2917_v9 = vsel %vm1925_vm9, %v2914_v5, %v2916_v49  ;;  %v2919_v6 = vsel %vm1925_vm9, %v2916_v49, %v2918_v41  ;;  %v2924_v17 = vmax.f32 %v2897_v53, %v2913_v23 }
 0x508   :  { %v2925_v46 = vmax.f32 %v2898_v21, %v2915_v34  ;;  %v2926_v18 = vmax.f32 %v2899_v7, %v2917_v9  ;;  %v2927_v10 = vmax.f32 %v2900_v44, %v2919_v6  ;;  %v2932_v60 = vmul.f32 %v6625_v0, %v7488_v62  ;;  %v7493_v21 = vld [vmem:[#allocation16_spill] sm:$0xff]  ;;  %v7495_v62 = vld [vmem:[#allocation26_spill] sm:$0xff] }
 0x509   :  { %v2938_v31 = vrot.slane %v2928_v43, 5  ;;  %v2939_v14 = vrot.slane %v2929_v1, 5  ;;  %v2941_v13 = vrot.slane %v2930_v33, 5  ;;  %v2943_v45 = vrot.slane %v2931_v59, 5 }
 0x50a   :  { %v2945_v51 = vrot.slane %v2932_v60, 5  ;;  %v2955_v24 = vmul.f32 %v6622_v4, %v7489_v8  ;;  %v2956_v61 = vmul.f32 %v6613_v27, %v7490_v38  ;;  %v2957_v12 = vmul.f32 %v6616_v2, %v7491_v54 }
 0x50b   :  { %v2940_v35 = vsel %vm2375_vm15, %v2938_v31, %v2939_v14  ;;  %v2942_v28 = vsel %vm2375_vm15, %v2939_v14, %v2941_v13  ;;  %v2944_v15 = vsel %vm2375_vm15, %v2941_v13, %v2943_v45  ;;  %v2958_v16 = vmul.f32 %v6619_v11, %v6355_v56  ;;  %v7496_v31 = vld [vmem:[#allocation47_spill] sm:$0xff]  ;;  %v3094_v14 = vld [vmem:[%s7019_s8] sm:$0xf] }
 0x50c   :  { %v2946_v3 = vsel %vm2375_vm15, %v2943_v45, %v2945_v51  ;;  %v2951_v40 = vmax.f32 %v2924_v17, %v2940_v35  ;;  %v2952_v58 = vmax.f32 %v2925_v46, %v2942_v28  ;;  %v2953_v4 = vmax.f32 %v2926_v18, %v2944_v15  ;;  %v7494_v18 = vld [vmem:[#allocation61_spill] sm:$0xff] }
 0x50d   :  { %v2954_v53 = vmax.f32 %v2927_v10, %v2946_v3  ;;  %v2959_v55 = vmul.f32 %v6625_v0, %v6339_v20  ;;  %v2965_v52 = vrot.slane %v2955_v24, 6  ;;  %v2966_v47 = vrot.slane %v2956_v61, 6 }
 0x50e   :  { %v2968_v42 = vrot.slane %v2957_v12, 6  ;;  %v2970_v50 = vrot.slane %v2958_v16, 6  ;;  %v2982_v22 = vmul.f32 %v6613_v27, %v7492_v32  ;;  %v2983_v25 = vmul.f32 %v6616_v2, %v7493_v21  ;;  %v7499_v16 = vld [vmem:[#allocation40_spill] sm:$0xff] }
 0x50f   :  { %v2967_v56 = vsel %vm761_vm3, %v2965_v52, %v2966_v47  ;;  %v2972_v7 = vrot.slane %v2959_v55, 6  ;;  %v2984_v44 = vmul.f32 %v6619_v11, %v6389_v39  ;;  %v2985_v48 = vmul.f32 %v6625_v0, %v6387_v63 }
 0x510   :  { %v2969_v20 = vsel %vm761_vm3, %v2966_v47, %v2968_v42  ;;  %v2971_v30 = vsel %vm761_vm3, %v2968_v42, %v2970_v50  ;;  %v2978_v5 = vmax.f32 %v2951_v40, %v2967_v56  ;;  %v2990_v49 = vmul.f32 %v6613_v27, %v6177_v37 }
 0x511   :  { %v2973_v41 = vsel %vm761_vm3, %v2970_v50, %v2972_v7  ;;  %v2979_v43 = vmax.f32 %v2952_v58, %v2969_v20  ;;  %v2980_v23 = vmax.f32 %v2953_v4, %v2971_v30  ;;  %v2991_v1 = vmul.f32 %v6616_v2, %v6210_v29 }
 0x512   :  { %v2981_v33 = vmax.f32 %v2954_v53, %v2973_v41  ;;  %v2986_v39 = vmax.f32 %v2978_v5, %v2982_v22  ;;  %v2992_v63 = vmul.f32 %v6619_v11, %v6215_v26  ;;  %v2993_v36 = vmul.f32 %v6625_v0, %v6324_v57 }
 0x513   :  { %v2987_v59 = vmax.f32 %v2979_v43, %v2983_v25  ;;  %v2988_v34 = vmax.f32 %v2980_v23, %v2984_v44  ;;  %v2998_v9 = vrot.slane %v2990_v49, 1  ;;  %v2999_v6 = vrot.slane %v2991_v1, 1 }
 0x514   :  { %v2989_v37 = vmax.f32 %v2981_v33, %v2985_v48  ;;  %v3001_v17 = vrot.slane %v2992_v63, 1  ;;  %v3003_v46 = vrot.slane %v2993_v36, 1  ;;  %v3014_v10 = vmul.f32 %v6613_v27, %v7494_v18  ;;  %v7497_v27 = vld [vmem:[#allocation45_spill] sm:$0xff] }
 0x515   :  { %v3000_v29 = vsel %vm647_vm7, %v2998_v9, %v2999_v6  ;;  %v3015_v60 = vmul.f32 %v6616_v2, %v7495_v62  ;;  %v3016_v26 = vmul.f32 %v6619_v11, %v7496_v31  ;;  %v3017_v57 = vmul.f32 %v6625_v0, %v6370_v19 }
 0x516   :  { %v3002_v13 = vsel %vm647_vm7, %v2999_v6, %v3001_v17  ;;  %v3004_v45 = vsel %vm647_vm7, %v3001_v17, %v3003_v46  ;;  %v7498_v51 = vrot.slane %v7497_v27, 1  ;;  %v3010_v24 = vmax.f32 %v2986_v39, %v3000_v29 }
 0x517   :  { %v3011_v2 = vmax.f32 %v2987_v59, %v3002_v13  ;;  %v3012_v38 = vmax.f32 %v2988_v34, %v3004_v45  ;;  %v3022_v11 = vrot.slane %v3014_v10, 2  ;;  %v3023_v54 = vrot.slane %v3015_v60, 2 }
 0x518   :  { %v3005_v8 = vsel %vm647_vm7, %v3003_v46, %v7498_v51  ;;  %v3025_v12 = vrot.slane %v3016_v26, 2  ;;  %v3027_v19 = vrot.slane %v3017_v57, 2  ;;  %v3100_v0 = vsel %vm1925_vm9, %v3094_v14, 0 }
 0x519   :  { %v3013_v61 = vmax.f32 %v2989_v37, %v3005_v8  ;;  %3109 = vmatpush.bf16.msra.mxu3 %v3100_v0  ;;  %v3024_v35 = vsel %vm844_vm8, %v3022_v11, %v3023_v54  ;;  %v7500_v3 = vrot.slane %v7499_v16, 2  ;;  %v3149_v37 = vld [vmem:[%s7020_s9] sm:$0xff]  ;;  %v7501_v10 = vmov 5  }
 0x51a   :  { %v3026_v28 = vsel %vm844_vm8, %v3023_v54, %v3025_v12  ;;  %v3028_v15 = vsel %vm844_vm8, %v3025_v12, %v3027_v19  ;;  %v3034_v58 = vmax.f32 %v3010_v24, %v3024_v35  ;;  %3176 = vperm.xlu1 %3987, %v3149_v37   ;;  %3169 = vperm.xlu0 %3986, %v3149_v37   ;;  %v7502_v29 = vmov 7  }
 0x51b   :  { %v3029_v40 = vsel %vm844_vm8, %v3027_v19, %v7500_v3  ;;  %v3035_v4 = vmax.f32 %v3011_v2, %v3026_v28  ;;  %v3036_v53 = vmax.f32 %v3012_v38, %v3028_v15  ;;  %3162 = vperm.xlu2 %3985, %v3149_v37   ;;  %v7503_v62 = vmov 4  }
 0x51c   :  { %v3037_v55 = vmax.f32 %v3013_v61, %v3029_v40  ;;  %3038 = vst.msk [vmem:[#allocation2] sm:$0xff] %vm1963_vm10, %v3034_v58  ;;  %v7504_v57 = vmov 8   ;;  %v7505_v14 = vmov 0   ;;  %v7506_v45 = vmov 6  }
 0x51d   :  { %3039 = vst.msk [vmem:[#allocation2 + $0x8] sm:$0xff] %vm1963_vm10, %v3035_v4 }
 0x51e   :  { %3040 = vst.msk [vmem:[#allocation2 + $0x10] sm:$0xff] %vm1963_vm10, %v3036_v53 }
 0x51f   :  { %3041 = vst.msk [vmem:[#allocation2 + $0x18] sm:$0xff] %vm1963_vm10, %v3037_v55 }
 0x522   :  { %3989 = vset.pattern.permute.xlu1 %v7501_v10  ;;  %3991 = vset.pattern.permute.xlu0 %v7502_v29 }
 0x523   :  { %v3042_v52 = vld [vmem:[#allocation2] ss:$2 sm:$0x3]  ;;  %3190 = vperm.xlu1 %3989, %v3149_v37   ;;  %3204 = vperm.xlu0 %3991, %v3149_v37  }
 0x524   :  { %v3044_v47 = vld [vmem:[#allocation2 + $0x8] ss:$2 sm:$0x3]  ;;  %3988 = vset.pattern.permute.xlu2 %v7503_v62 }
 0x525   :  { %v3045_v42 = vld [vmem:[#allocation2 + $0x10] ss:$2 sm:$0x3]  ;;  %v3049_v50 = vrot.slane %v3044_v47, 6  ;;  %3183 = vperm.xlu2 %3988, %v3149_v37  }
 0x526   :  { %v3047_v32 = vld [vmem:[#allocation2 + $0x18] ss:$2 sm:$0x3]  ;;  %v3052_v22 = vrot.slane %v3045_v42, 4 }
 0x527   :  { %v3055_v21 = vrot.slane %v3047_v32, 2  ;;  %v3057_v25 = vsel %vm761_vm3, %v3042_v52, %v3049_v50 }
 0x528   :  { %v3058_v56 = vsel %vm1925_vm9, %v3057_v25, %v3052_v22 }
 0x529   :  { %v6752_v7 = vsel %vm844_vm8, %v3058_v56, %v3055_v21 }
 0x52a   :  { %v3060_v44 = vsel %vm1963_vm10, %v6752_v7, 0.0  ;;  %v3067_v48 = vmul.f32 %v6752_v7, %v6752_v7 }
 0x52b   :  { %v3061_v20 = vrot.slane %v3060_v44, 4  ;;  %3992 = vset.pattern.permute.xlu1 %v7504_v57  ;;  %3995 = vset.pattern.permute.xlu0 %v7505_v14 }
 0x52c   :  { %v3068_v30 = vsel %vm1963_vm10, %v3067_v48, 0.0  ;;  %3211 = vperm.xlu1 %3992, %v3149_v37  }
 0x52d   :  { %v3062_v5 = vadd.f32 %v3061_v20, %v3060_v44  ;;  %v3069_v49 = vrot.slane %v3068_v30, 4  ;;  %3990 = vset.pattern.permute.xlu2 %v7506_v45 }
 0x52e   :  { %3197 = vperm.xlu2 %3990, %v3149_v37  }
 0x52f   :  { %v3063_v41 = vrot.slane %v3062_v5, 2  ;;  %v3070_v43 = vadd.f32 %v3069_v49, %v3068_v30 }
 0x531   :  { %v3064_v23 = vadd.f32 %v3063_v41, %v3062_v5  ;;  %v3071_v1 = vrot.slane %v3070_v43, 2 }
 0x533   :  { %v3065_v33 = vrot.slane %v3064_v23, 1  ;;  %v3072_v39 = vadd.f32 %v3071_v1, %v3070_v43 }
 0x534   :  { %3994 = vset.pattern.permute.xlu1 %v7505_v14 }
 0x535   :  { %v3066_v63 = vadd.f32 %v3065_v33, %v3064_v23  ;;  %v3073_v36 = vrot.slane %v3072_v39, 1 }
 0x536   :  { %3993 = vset.pattern.permute.xlu2 %v7505_v14 }
 0x537   :  { %v3074_v59 = vadd.f32 %v3073_v36, %v3072_v39  ;;  %v3075_v34 = vmul.f32 0.125, %v3066_v63  ;;  %3157 = vperm.xlu2 %3993, %v3149_v37  }
 0x539   :  { %v3076_v9 = vmul.f32 0.125, %v3074_v59  ;;  %v3077_v6 = vmul.f32 %v3075_v34, %v3075_v34  ;;  %v3080_v8 = vsub.f32 %v6752_v7, %v3075_v34 }
 0x53b   :  { %v3078_v17 = vsub.f32 %v3076_v9, %v3077_v6 }
 0x53d   :  { %v3079_v46 = vmax.f32 %v3078_v17, 0.0 }
 0x53f   :  { %v3081_v18 = vadd.f32 1e-05, %v3079_v46 }
 0x541   :  { %4014 = vrsqrt.f32 %v3081_v18  ;;  %vm3088_vm12 = vweird.f32 %v3081_v18 }
 0x547   :  { %v4015_v60 = vpop.eup %4014 }
 0x548   :  { %v3083_v31 = vmul.f32 %v4015_v60, %v3081_v18  ;;  %vm3089_vm11 = vweird.f32 %v4015_v60 }
 0x549   :  { %vm3090_vm13 = vmor %vm3088_vm12, %vm3089_vm11  ;;  %vm7507_vm12 = vcmask 392192  }
 0x54a   :  { %v3084_v26 = vmul.f32 %v4015_v60, %v3083_v31 }
 0x54c   :  { %v3085_v13 = vmul.f32 0.5, %v3084_v26 }
 0x54e   :  { %v3086_v27 = vsub.f32 1.5, %v3085_v13 }
 0x550   :  { %v3087_v51 = vmul.f32 %v4015_v60, %v3086_v27 }
 0x552   :  { %v3091_v24 = vsel %vm3090_vm13, %v4015_v60, %v3087_v51  ;;  %vm7508_vm13 = vcmask 457728  }
 0x553   :  { %v3092_v2 = vmul.f32 %v3091_v24, %v3080_v8 }
 0x555   :  { %v3093_v38 = vmax.f32 %v3092_v2, 0.0 }
 0x557   :  { %v3095_v61 = vpack.c.bf16 %v3093_v38, %v3093_v38 }
 0x559   :  { %3723 = vmatmul.msk.bf16.vlgmr.msra.gmra.mxu3 %vm1963_vm10, %v3095_v61 }
 0x575   :  { %v3163_v56 = vpop.permute.xlu2 %3162 }
 0x576   :  { %v6782_v46 = vrot.slane %v3163_v56, 7 }
 0x57f   :  { %v3184_v41 = vpop.permute.xlu2 %3183 }
 0x580   :  { %v6793_v31 = vrot.slane %v3184_v41, 5 }
 0x588   :  { %v3198_v6 = vpop.permute.xlu2 %3197 }
 0x589   :  { %v6784_v18 = vrot.slane %v3198_v6, 4 }
 0x58c   :  { %v3177_v30 = vpop.permute.xlu1 %3176  ;;  %v3170_v36 = vpop.permute.xlu0 %3169 }
 0x58d   :  { %v6774_v59 = vrot.slane %v3177_v30, 6  ;;  %v6776_v34 = vrot.slane %v3170_v36, 6  ;;  %v3776_v36 = vld [vmem:[%s7021_s10 + $0x8] sm:$0xff] }
 0x591   :  { %v6850_v6 = vpop.permute.xlu2 %3157 }
 0x595   :  { %v3191_v63 = vpop.permute.xlu1 %3190 }
 0x596   :  { %v6786_v10 = vrot.slane %v3191_v63, 4  ;;  %v3777_v63 = vld [vmem:[%s7021_s10 + $0x10] sm:$0xff] }
 0x5dc   :  { %v3111_v11 = vpop.f32.mrf.mxu3 }
 0x5dd   :  { %v3115_v54 = vsel %vm1963_vm10, %v3111_v11, 0.0  ;;  %v3122_v12 = vmul.f32 %v3111_v11, %v3111_v11 }
 0x5de   :  { %v3116_v19 = vrot.slane %v3115_v54, 4 }
 0x5df   :  { %v3123_v0 = vsel %vm1963_vm10, %v3122_v12, 0.0 }
 0x5e0   :  { %v3117_v35 = vadd.f32 %v3116_v19, %v3115_v54  ;;  %v3124_v28 = vrot.slane %v3123_v0, 4 }
 0x5e2   :  { %v3118_v15 = vrot.slane %v3117_v35, 2  ;;  %v3125_v16 = vadd.f32 %v3124_v28, %v3123_v0  ;;  %v3212_v0 = vpop.permute.xlu1 %3211 }
 0x5e4   :  { %v3119_v3 = vadd.f32 %v3118_v15, %v3117_v35  ;;  %v3126_v40 = vrot.slane %v3125_v16, 2  ;;  %v3113_v58 = vpop.f32.mrf.mxu3  ;;  %v3205_v35 = vpop.permute.xlu0 %3204 }
 0x5e5   :  { %v6816_v58 = vrot.slane %v3205_v35, 3 }
 0x5e6   :  { %v3120_v4 = vrot.slane %v3119_v3, 1  ;;  %v3127_v53 = vadd.f32 %v3126_v40, %v3125_v16  ;;  %v6814_v40 = vrot.slane %v3212_v0, 2 }
 0x5e8   :  { %v3121_v55 = vadd.f32 %v3120_v4, %v3119_v3  ;;  %v3128_v52 = vrot.slane %v3127_v53, 1 }
 0x5ea   :  { %v3129_v47 = vadd.f32 %v3128_v52, %v3127_v53  ;;  %v3130_v42 = vmul.f32 0.125, %v3121_v55 }
 0x5ec   :  { %v3131_v50 = vmul.f32 0.125, %v3129_v47  ;;  %v3132_v32 = vmul.f32 %v3130_v42, %v3130_v42  ;;  %v3135_v23 = vsub.f32 %v3111_v11, %v3130_v42 }
 0x5ee   :  { %v3133_v22 = vsub.f32 %v3131_v50, %v3132_v32 }
 0x5f0   :  { %v3134_v21 = vmax.f32 %v3133_v22, 0.0 }
 0x5f2   :  { %v3136_v25 = vadd.f32 1e-05, %v3134_v21 }
 0x5f4   :  { %4016 = vrsqrt.f32 %v3136_v25  ;;  %vm3143_vm0 = vweird.f32 %v3136_v25 }
 0x5fa   :  { %v4017_v44 = vpop.eup %4016 }
 0x5fb   :  { %v3138_v48 = vmul.f32 %v4017_v44, %v3136_v25  ;;  %vm3144_vm2 = vweird.f32 %v4017_v44 }
 0x5fc   :  { %vm3145_vm11 = vmor %vm3143_vm0, %vm3144_vm2  ;;  %vm7509_vm2 = vcmask 523264   ;;  %vm7510_vm0 = vcmask 588800  }
 0x5fd   :  { %v3139_v20 = vmul.f32 %v4017_v44, %v3138_v48 }
 0x5ff   :  { %v3140_v5 = vmul.f32 0.5, %v3139_v20 }
 0x601   :  { %v3141_v49 = vsub.f32 1.5, %v3140_v5 }
 0x603   :  { %v3142_v43 = vmul.f32 %v4017_v44, %v3141_v49 }
 0x605   :  { %v3146_v1 = vsel %vm3145_vm11, %v4017_v44, %v3142_v43  ;;  %v3297_v43 = vld [vmem:[%s7021_s10 + $0x20] sm:$0xf]  ;;  %vm3350_vm11 = vcmask 80896  }
 0x606   :  { %v3147_v33 = vmul.f32 %v3146_v1, %v3135_v23  ;;  %v3316_v23 = vunpack.c.l.b16 %v3297_v43 }
 0x608   :  { %v3148_v39 = vmax.f32 %v3147_v33, 0.0  ;;  %v3321_v1 = vpack.c.b16 %v3316_v23, %v3316_v23 }
 0x60a   :  { %v3151_v9 = vrot.slane %v3148_v39, 5  ;;  %v3330_v33 = vsel %vm1925_vm9, %v3321_v1, 0  ;;  %v3778_v39 = vld [vmem:[%s7021_s10 + $0x18] sm:$0xff] }
 0x60b   :  { %3335 = vmatpush.bf16.msrb.mxu2 %v3330_v33 }
 0x60c   :  { %v6779_v37 = vsel %vm2375_vm15, 0.0, %v3151_v9  ;;  %v3154_v17 = vsel %vm2375_vm15, %v3151_v9, 0.0  ;;  %v3775_v9 = vld [vmem:[%s7021_s10] sm:$0xff] }
 0x60d   :  { %v3180_v29 = vmul.f32 %v6774_v59, %v6779_v37  ;;  %v3181_v62 = vmul.f32 %v6774_v59, %v3154_v17  ;;  %v3173_v60 = vmul.f32 %v6776_v34, %v6779_v37  ;;  %v3174_v26 = vmul.f32 %v6776_v34, %v3154_v17 }
 0x60e   :  { %v3166_v14 = vmul.f32 %v6782_v46, %v6779_v37  ;;  %v3167_v13 = vmul.f32 %v6782_v46, %v3154_v17  ;;  %v3201_v61 = vmul.f32 %v6784_v18, %v6779_v37  ;;  %v3202_v54 = vmul.f32 %v6784_v18, %v3154_v17 }
 0x60f   :  { %v3235_v27 = vrot.slane %v3180_v29, 2  ;;  %v3236_v51 = vrot.slane %v3181_v62, 2  ;;  %v3227_v8 = vrot.slane %v3173_v60, 2  ;;  %v3228_v24 = vrot.slane %v3174_v26, 2  ;;  %3336 = vmatpush.bf16.msrb.mxu2 %v3778_v39 }
 0x610   :  { %v3219_v2 = vrot.slane %v3166_v14, 1  ;;  %v3220_v38 = vrot.slane %v3167_v13, 1  ;;  %v3194_v12 = vmul.f32 %v6786_v10, %v6779_v37  ;;  %v3195_v19 = vmul.f32 %v6786_v10, %v3154_v17 }
 0x611   :  { %v3237_v11 = vsel %vm844_vm8, %v3235_v27, %v3236_v51  ;;  %v3229_v28 = vsel %vm844_vm8, %v3227_v8, %v3228_v24  ;;  %v3187_v16 = vmul.f32 %v6793_v31, %v6779_v37  ;;  %v3188_v3 = vmul.f32 %v6793_v31, %v3154_v17 }
 0x612   :  { %3238 = vrot.lane.b32.xlu0 %v3237_v11, %s4077_s17  ;;  %v3221_v15 = vsel %vm647_vm7, %v3219_v2, %v3220_v38  ;;  %3230 = vrot.lane.b32.xlu2 %v3229_v28, %s4075_s1  ;;  %v3259_v4 = vrot.slane %v3201_v61, 4  ;;  %v3260_v53 = vrot.slane %v3202_v54, 4  ;;  %v3251_v55 = vrot.slane %v3194_v12, 4 }
 0x613   :  { %3222 = vrot.lane.b32.xlu1 %v3221_v15, %s4076_s16  ;;  %v3252_v52 = vrot.slane %v3195_v19, 4  ;;  %v3243_v47 = vrot.slane %v3187_v16, 3  ;;  %v3244_v42 = vrot.slane %v3188_v3, 3  ;;  %v3215_v32 = vmul.f32 %v6814_v40, %v6779_v37  ;;  %3337 = vmatpush.bf16.msrb.mxu2 %v3777_v63 }
 0x614   :  { %v3261_v50 = vsel %vm1925_vm9, %v3259_v4, %v3260_v53  ;;  %v3216_v22 = vmul.f32 %v6814_v40, %v3154_v17  ;;  %v3208_v56 = vmul.f32 %v6816_v58, %v6779_v37  ;;  %v3209_v44 = vmul.f32 %v6816_v58, %v3154_v17 }
 0x615   :  { %v3253_v21 = vsel %vm1925_vm9, %v3251_v55, %v3252_v52  ;;  %v3245_v25 = vsel %vm2030_vm14, %v3243_v47, %v3244_v42  ;;  %v3275_v48 = vrot.slane %v3215_v32, 6  ;;  %v3160_v62 = vmul.f32 %v6850_v6, %v6779_v37 }
 0x616   :  { %v3276_v20 = vrot.slane %v3216_v22, 6  ;;  %v3267_v30 = vrot.slane %v3208_v56, 5  ;;  %v3268_v5 = vrot.slane %v3209_v44, 5  ;;  %v3743_v44 = vld [vmem:[%s7022_s11] sm:$0xf] }
 0x617   :  { %3338 = vmatpush.bf16.msrb.mxu2 %v3776_v36 }
 0x618   :  { %v3277_v49 = vsel %vm761_vm3, %v3275_v48, %v3276_v20  ;;  %v3269_v41 = vsel %vm2375_vm15, %v3267_v30, %v3268_v5  ;;  %v3779_v48 = vld [vmem:[%s7022_s11] sm:$0x10]  ;;  %s4084_s11 = smov [#allocation3]  }
 0x619   :  { %v3744_v20 = vor.u32 %v3779_v48, %v3743_v44 }
 0x61a   :  { %3262 = vrot.lane.b32.xlu0 %v3261_v50, %s4074_s4  ;;  %3254 = vrot.lane.b32.xlu2 %v3253_v21, %s4078_s18 }
 0x61b   :  { %3246 = vrot.lane.b32.xlu1 %v3245_v25, %s4079_s19  ;;  %3339 = vmatpush.bf16.msrb.mxu2 %v3775_v9 }
 0x622   :  { %3278 = vrot.lane.b32.xlu2 %v3277_v49, %s4080_s20  ;;  %v3397_v49 = vsel %vm2030_vm14, %v3744_v20, 0 }
 0x623   :  { %3270 = vrot.lane.b32.xlu1 %v3269_v41, %s4081_s0  ;;  %3406 = vmatpush.bf16.msrb.mxu3 %v3397_v49 }
 0x66c   :  { %v3231_v17 = vpop.permute.xlu2 %3230 }
 0x674   :  { %v3255_v13 = vpop.permute.xlu2 %3254 }
 0x67c   :  { %v3279_v11 = vpop.permute.xlu2 %3278 }
 0x684   :  { %v3239_v26 = vpop.permute.xlu0 %3238 }
 0x685   :  { %v3223_v29 = vpop.permute.xlu1 %3222 }
 0x686   :  { %v3281_v60 = vsel %vm1963_vm10, %v3160_v62, %v3223_v29 }
 0x687   :  { %v3282_v14 = vsel %vm2495_vm1, %v3281_v60, %v3231_v17 }
 0x688   :  { %v3283_v51 = vsel %vm2500_vm4, %v3282_v14, %v3239_v26 }
 0x68c   :  { %v3263_v2 = vpop.permute.xlu0 %3262 }
 0x68d   :  { %v3247_v27 = vpop.permute.xlu1 %3246 }
 0x68e   :  { %v3284_v8 = vsel %vm2505_vm5, %v3283_v51, %v3247_v27 }
 0x68f   :  { %v3285_v24 = vsel %vm2510_vm6, %v3284_v8, %v3255_v13 }
 0x690   :  { %v3286_v61 = vsel %vm7507_vm12, %v3285_v24, %v3263_v2 }
 0x695   :  { %v3271_v38 = vpop.permute.xlu1 %3270 }
 0x696   :  { %v3287_v37 = vsel %vm7508_vm13, %v3286_v61, %v3271_v38 }
 0x697   :  { %v3288_v54 = vsel %vm7509_vm2, %v3287_v37, %v3279_v11 }
 0x698   :  { %v3298_v12 = vpack.c.bf16 %v3288_v54, %v3288_v54 }
 0x69a   :  { %3740 = vmatmul.msk.bf16.vlgmr.msrb.gmra.mxu2 %vm7510_vm0, %v3298_v12 }
 0x71d   :  { %v3341_v19 = vpop.f32.mrf.mxu2 }
 0x71e   :  { %3346 = vrot.lane.b32.xlu0 %v3341_v19, %s4076_s16 }
 0x725   :  { %v3343_v0 = vpop.f32.mrf.mxu2 }
 0x790   :  { %v3347_v35 = vpop.permute.xlu0 %3346 }
 0x791   :  { %v6866_v28 = vsel %vm1963_vm10, %v6752_v7, %v3347_v35 }
 0x792   :  { %v3351_v15 = vsel %vm3350_vm11, %v6866_v28, 0.0  ;;  %v3358_v16 = vmul.f32 %v6866_v28, %v6866_v28 }
 0x793   :  { %v3352_v3 = vrot.slane %v3351_v15, 4 }
 0x794   :  { %v3359_v4 = vsel %vm3350_vm11, %v3358_v16, 0.0 }
 0x795   :  { %v3353_v53 = vadd.f32 %v3352_v3, %v3351_v15  ;;  %v3360_v55 = vrot.slane %v3359_v4, 4 }
 0x797   :  { %v3354_v52 = vrot.slane %v3353_v53, 2  ;;  %v3361_v47 = vadd.f32 %v3360_v55, %v3359_v4 }
 0x799   :  { %v3355_v42 = vadd.f32 %v3354_v52, %v3353_v53  ;;  %v3362_v50 = vrot.slane %v3361_v47, 2 }
 0x79b   :  { %v3356_v32 = vrot.slane %v3355_v42, 1  ;;  %v3363_v22 = vadd.f32 %v3362_v50, %v3361_v47 }
 0x79d   :  { %v3357_v21 = vadd.f32 %v3356_v32, %v3355_v42  ;;  %v3364_v7 = vrot.slane %v3363_v22, 1 }
 0x79f   :  { %v3365_v25 = vadd.f32 %v3364_v7, %v3363_v22  ;;  %v3366_v56 = vmul.f32 0.125, %v3357_v21 }
 0x7a1   :  { %v3367_v30 = vmul.f32 0.125, %v3365_v25  ;;  %v3368_v5 = vmul.f32 %v3366_v56, %v3366_v56  ;;  %v3371_v17 = vsub.f32 %v6866_v28, %v3366_v56 }
 0x7a3   :  { %v3369_v41 = vsub.f32 %v3367_v30, %v3368_v5 }
 0x7a5   :  { %v3370_v43 = vmax.f32 %v3369_v41, 0.0 }
 0x7a7   :  { %v3372_v23 = vadd.f32 1e-05, %v3370_v43 }
 0x7a9   :  { %4018 = vrsqrt.f32 %v3372_v23  ;;  %vm3379_vm13 = vweird.f32 %v3372_v23 }
 0x7af   :  { %v4019_v1 = vpop.eup %4018 }
 0x7b0   :  { %v3374_v33 = vmul.f32 %v4019_v1, %v3372_v23  ;;  %vm3380_vm12 = vweird.f32 %v4019_v1 }
 0x7b1   :  { %vm3381_vm2 = vmor %vm3379_vm13, %vm3380_vm12 }
 0x7b2   :  { %v3375_v39 = vmul.f32 %v4019_v1, %v3374_v33 }
 0x7b4   :  { %v3376_v63 = vmul.f32 0.5, %v3375_v39 }
 0x7b6   :  { %v3377_v36 = vsub.f32 1.5, %v3376_v63 }
 0x7b8   :  { %v3378_v9 = vmul.f32 %v4019_v1, %v3377_v36 }
 0x7ba   :  { %v3382_v29 = vsel %vm3381_vm2, %v4019_v1, %v3378_v9 }
 0x7bb   :  { %v3383_v62 = vmul.f32 %v3382_v29, %v3371_v17 }
 0x7bd   :  { %v3384_v60 = vmax.f32 %v3383_v62, 0.0 }
 0x7bf   :  { %v3387_v26 = vpack.c.bf16 %v3384_v60, %v3384_v60 }
 0x7c1   :  { %3745 = vmatmul.msk.bf16.vlgmr.msrb.gmra.mxu3 %vm3350_vm11, %v3387_v26 }
 0x844   :  { %v3408_v14 = vpop.f32.mrf.mxu3 }
 0x845   :  { %v3412_v13 = vsel %vm1963_vm10, %v3408_v14, 0.0  ;;  %v3419_v27 = vmul.f32 %v3408_v14, %v3408_v14 }
 0x846   :  { %v3413_v51 = vrot.slane %v3412_v13, 4 }
 0x847   :  { %v3420_v8 = vsel %vm1963_vm10, %v3419_v27, 0.0 }
 0x848   :  { %v3414_v24 = vadd.f32 %v3413_v51, %v3412_v13  ;;  %v3421_v2 = vrot.slane %v3420_v8, 4 }
 0x84a   :  { %v3415_v38 = vrot.slane %v3414_v24, 2  ;;  %v3422_v61 = vadd.f32 %v3421_v2, %v3420_v8 }
 0x84c   :  { %v3416_v11 = vadd.f32 %v3415_v38, %v3414_v24  ;;  %v3423_v37 = vrot.slane %v3422_v61, 2  ;;  %v3410_v54 = vpop.f32.mrf.mxu3 }
 0x84e   :  { %v3417_v12 = vrot.slane %v3416_v11, 1  ;;  %v3424_v19 = vadd.f32 %v3423_v37, %v3422_v61 }
 0x850   :  { %v3418_v0 = vadd.f32 %v3417_v12, %v3416_v11  ;;  %v3425_v35 = vrot.slane %v3424_v19, 1 }
 0x852   :  { %v3426_v15 = vadd.f32 %v3425_v35, %v3424_v19  ;;  %v3427_v16 = vmul.f32 0.125, %v3418_v0 }
 0x854   :  { %v3428_v3 = vmul.f32 0.125, %v3426_v15  ;;  %v3429_v4 = vmul.f32 %v3427_v16, %v3427_v16  ;;  %v3432_v7 = vsub.f32 %v3408_v14, %v3427_v16  ;;  %v6931_v16 = vld [vmem:[%s7013_s2 + $0x38] sm:$0xff] }
 0x856   :  { %v3430_v53 = vsub.f32 %v3428_v3, %v3429_v4  ;;  %v4034_v3 = vld [vmem:[%s7013_s2 + $0x68] sm:$0xff]  ;;  %v4035_v4 = vld [vmem:[%s7013_s2 + $0x58] sm:$0xff] }
 0x858   :  { %v3431_v55 = vmax.f32 %v3430_v53, 0.0  ;;  %v7511_v53 = vmov 3  }
 0x85a   :  { %v3433_v52 = vadd.f32 1e-05, %v3431_v55  ;;  %v6950_v55 = vld [vmem:[%s7013_s2 + $0x78] sm:$0xff] }
 0x85c   :  { %4020 = vrsqrt.f32 %v3433_v52  ;;  %vm3440_vm12 = vweird.f32 %v3433_v52 }
 0x862   :  { %v4021_v47 = vpop.eup %4020 }
 0x863   :  { %v3435_v42 = vmul.f32 %v4021_v47, %v3433_v52  ;;  %vm3441_vm0 = vweird.f32 %v4021_v47  ;;  %v4037_v52 = vld [vmem:[%s7013_s2 + $0x48] sm:$0xff] }
 0x864   :  { %vm3442_vm13 = vmor %vm3440_vm12, %vm3441_vm0 }
 0x865   :  { %v3436_v50 = vmul.f32 %v4021_v47, %v3435_v42 }
 0x867   :  { %v3437_v32 = vmul.f32 0.5, %v3436_v50 }
 0x869   :  { %v3438_v22 = vsub.f32 1.5, %v3437_v32 }
 0x86b   :  { %v3439_v21 = vmul.f32 %v4021_v47, %v3438_v22  ;;  %v3783_v22 = vld [vmem:[%s7023_s12 + $0x18] sm:$0xff] }
 0x86d   :  { %v3443_v25 = vsel %vm3442_vm13, %v4021_v47, %v3439_v21  ;;  %v3548_v47 = vld [vmem:[%s7023_s12 + $0x20] sm:$0xf]  ;;  %v3782_v21 = vld [vmem:[%s7023_s12 + $0x10] sm:$0xff] }
 0x86e   :  { %v3444_v56 = vmul.f32 %v3443_v25, %v3432_v7  ;;  %v3567_v42 = vunpack.c.l.b16 %v3548_v47  ;;  %v3781_v25 = vld [vmem:[%s7023_s12 + $0x8] sm:$0xff] }
 0x870   :  { %v3445_v44 = vmax.f32 %v3444_v56, 0.0  ;;  %v3572_v50 = vpack.c.b16 %v3567_v42, %v3567_v42  ;;  %v3780_v56 = vld [vmem:[%s7023_s12] sm:$0xff]  ;;  %s4082_s12 = smov 10  }
 0x872   :  { %v3447_v48 = vrot.slane %v3445_v44, 5  ;;  %v3581_v32 = vsel %vm1925_vm9, %v3572_v50, 0 }
 0x873   :  { %3586 = vmatpush.bf16.msra.mxu1 %v3581_v32 }
 0x874   :  { %v6885_v20 = vsel %vm2375_vm15, 0.0, %v3447_v48  ;;  %v3450_v30 = vsel %vm2375_vm15, %v3447_v48, 0.0 }
 0x875   :  { %v3456_v5 = vmul.f32 %v6885_v20, %v6774_v59  ;;  %v3457_v49 = vmul.f32 %v3450_v30, %v6774_v59  ;;  %v3454_v41 = vmul.f32 %v6885_v20, %v6776_v34  ;;  %v3455_v43 = vmul.f32 %v3450_v30, %v6776_v34 }
 0x876   :  { %v3452_v23 = vmul.f32 %v6885_v20, %v6782_v46  ;;  %v3453_v1 = vmul.f32 %v3450_v30, %v6782_v46  ;;  %v3462_v29 = vmul.f32 %v6885_v20, %v6784_v18  ;;  %v3463_v59 = vmul.f32 %v3450_v30, %v6784_v18 }
 0x877   :  { %v3486_v33 = vrot.slane %v3456_v5, 2  ;;  %v3487_v39 = vrot.slane %v3457_v49, 2  ;;  %v3478_v63 = vrot.slane %v3454_v41, 2  ;;  %v3479_v36 = vrot.slane %v3455_v43, 2  ;;  %3587 = vmatpush.bf16.msra.mxu1 %v3783_v22 }
 0x878   :  { %v3470_v9 = vrot.slane %v3452_v23, 1  ;;  %v3471_v17 = vrot.slane %v3453_v1, 1  ;;  %v3460_v60 = vmul.f32 %v6885_v20, %v6786_v10  ;;  %v3461_v46 = vmul.f32 %v3450_v30, %v6786_v10 }
 0x879   :  { %v3488_v62 = vsel %vm844_vm8, %v3486_v33, %v3487_v39  ;;  %v3480_v34 = vsel %vm844_vm8, %v3478_v63, %v3479_v36  ;;  %v3458_v14 = vmul.f32 %v6885_v20, %v6793_v31  ;;  %v3459_v18 = vmul.f32 %v3450_v30, %v6793_v31 }
 0x87a   :  { %3489 = vrot.lane.b32.xlu0 %v3488_v62, %s4077_s17  ;;  %3481 = vrot.lane.b32.xlu2 %v3480_v34, %s4075_s1  ;;  %v3472_v26 = vsel %vm647_vm7, %v3470_v9, %v3471_v17  ;;  %v3510_v13 = vrot.slane %v3462_v29, 4  ;;  %v3511_v27 = vrot.slane %v3463_v59, 4  ;;  %v3502_v51 = vrot.slane %v3460_v60, 4  ;;  %s3670_s17 = sshll.u32 %s7026_s15, 4  ;;  %s3671_s17 = int_to_ptr.hbm [resolvable:$true] %s3670_s17 }
 0x87b   :  { %3473 = vrot.lane.b32.xlu1 %v3472_v26, %s4076_s16  ;;  %v3503_v8 = vrot.slane %v3461_v46, 4  ;;  %v3494_v24 = vrot.slane %v3458_v14, 3  ;;  %v3495_v2 = vrot.slane %v3459_v18, 3  ;;  %v3466_v61 = vmul.f32 %v6885_v20, %v6814_v40  ;;  %3588 = vmatpush.bf16.msra.mxu1 %v3782_v21 }
 0x87c   :  { %v3512_v10 = vsel %vm1925_vm9, %v3510_v13, %v3511_v27  ;;  %v3467_v11 = vmul.f32 %v3450_v30, %v6814_v40  ;;  %v3464_v37 = vmul.f32 %v6885_v20, %v6816_v58  ;;  %v3465_v54 = vmul.f32 %v3450_v30, %v6816_v58  ;;  %v6937_v58 = vld [vmem:[%s7013_s2 + $0x28] sm:$0xff] }
 0x87d   :  { %v3504_v38 = vsel %vm1925_vm9, %v3502_v51, %v3503_v8  ;;  %v3496_v31 = vsel %vm2030_vm14, %v3494_v24, %v3495_v2  ;;  %v3526_v12 = vrot.slane %v3466_v61, 6  ;;  %v3451_v49 = vmul.f32 %v6885_v20, %v6850_v6  ;;  %v3784_v61 = vld [vmem:[%s7024_s13] sm:$0x30] }
 0x87e   :  { %v3527_v19 = vrot.slane %v3467_v11, 6  ;;  %v3518_v0 = vrot.slane %v3464_v37, 5  ;;  %v3519_v35 = vrot.slane %v3465_v54, 5  ;;  %vm7513_vm7 = vcmask 457728  }
 0x87f   :  { %3589 = vmatpush.bf16.msra.mxu1 %v3781_v25  ;;  %vm7514_vm9 = vcmask 523264   ;;  %v4083_v37 = vmov 4.0   ;;  %vm3601_vm14 = vcmask 93184  }
 0x880   :  { %v3528_v15 = vsel %vm761_vm3, %v3526_v12, %v3527_v19  ;;  %v3520_v40 = vsel %vm2375_vm15, %v3518_v0, %v3519_v35  ;;  %vm7512_vm3 = vcmask 392192   ;;  %4022 = vrcp.f32 %v4083_v37 }
 0x881   :  { %vm7516_vm15 = vcmask 1040384  }
 0x882   :  { %3513 = vrot.lane.b32.xlu0 %v3512_v10, %s4074_s4  ;;  %3505 = vrot.lane.b32.xlu2 %v3504_v38, %s4078_s18  ;;  %v3765_v38 = vld [vmem:[%s7024_s13] sm:$0xf]  ;;  %s3668_s4 = sshll.u32 %s4084_s11, 4  ;;  %s3669_s4 = int_to_ptr.vmem [resolvable:$true] %s3668_s4 }
 0x883   :  { %3497 = vrot.lane.b32.xlu1 %v3496_v31, %s4079_s19  ;;  %3590 = vmatpush.bf16.msra.mxu1 %v3780_v56  ;;  %v3766_v11 = vor.u32 %v3784_v61, %v3765_v38 }
 0x885   :  { %v3646_v31 = vsel %vm844_vm8, %v3766_v11, 0 }
 0x886   :  { %3655 = vmatpush.bf16.msra.mxu2 %v3646_v31 }
 0x88a   :  { %3529 = vrot.lane.b32.xlu2 %v3528_v15, %s4080_s20 }
 0x88b   :  { %3521 = vrot.lane.b32.xlu1 %v3520_v40, %s4081_s0 }
 0x892   :  { %458 = vperm.xlu2 %3993, %v6931_v16  }
 0x893   :  { %448 = vperm.xlu1 %3994, %v6937_v58  }
 0x89a   :  { %488 = vperm.xlu2 %3993, %v4034_v3  }
 0x89b   :  { %478 = vperm.xlu1 %3994, %v4035_v4  }
 0x8a2   :  { %3996 = vset.pattern.permute.xlu2 %v7511_v53 }
 0x8a3   :  { %498 = vperm.xlu1 %3994, %v6950_v55   ;;  %931 = vperm.xlu2 %3996, %v6937_v58  }
 0x8ab   :  { %3998 = vset.pattern.permute.xlu1 %v7511_v53  ;;  %955 = vperm.xlu2 %3996, %v4035_v4  }
 0x8ac   :  { %947 = vperm.xlu1 %3998, %v4037_v52  }
 0x8b3   :  { %971 = vperm.xlu2 %3996, %v6950_v55  }
 0x8b4   :  { %963 = vperm.xlu1 %3998, %v4034_v3  }
 0x8bb   :  { %4001 = vset.pattern.permute.xlu2 %v7506_v45 }
 0x8bc   :  { %4000 = vset.pattern.permute.xlu1 %v7506_v45  ;;  %1433 = vperm.xlu2 %4001, %v4037_v52  }
 0x8bd   :  { %1425 = vperm.xlu1 %4000, %v6931_v16  }
 0x8c4   :  { %1449 = vperm.xlu2 %4001, %v4034_v3  }
 0x8c5   :  { %1441 = vperm.xlu1 %4000, %v4035_v4  }
 0x8d4   :  { %v3482_v7 = vpop.permute.xlu2 %3481 }
 0x8dc   :  { %v3506_v44 = vpop.permute.xlu2 %3505 }
 0x8e4   :  { %v3530_v48 = vpop.permute.xlu2 %3529 }
 0x8ec   :  { %v459_v30 = vpop.permute.xlu2 %458  ;;  %v3490_v43 = vpop.permute.xlu0 %3489 }
 0x8ed   :  { %v3474_v5 = vpop.permute.xlu1 %3473 }
 0x8ee   :  { %v3532_v41 = vsel %vm1963_vm10, %v3451_v49, %v3474_v5  ;;  %vm7515_vm10 = vcmask 588800  }
 0x8ef   :  { %v3533_v23 = vsel %vm2495_vm1, %v3532_v41, %v3482_v7  ;;  %vm3641_vm1 = vcmask 97280   ;;  %v4003_v41 = vld [vmem:[%s7025_s14] ss:$0 sm:$0xff] }
 0x8f0   :  { %v3534_v39 = vsel %vm2500_vm4, %v3533_v23, %v3490_v43  ;;  %vm3661_vm4 = vcmask 74752  }
 0x8f4   :  { %v489_v1 = vpop.permute.xlu2 %488  ;;  %v3514_v9 = vpop.permute.xlu0 %3513 }
 0x8f5   :  { %v3498_v33 = vpop.permute.xlu1 %3497 }
 0x8f6   :  { %v3535_v63 = vsel %vm2505_vm5, %v3534_v39, %v3498_v33 }
 0x8f7   :  { %v3536_v36 = vsel %vm2510_vm6, %v3535_v63, %v3506_v44 }
 0x8f8   :  { %v3537_v29 = vsel %vm7512_vm3, %v3536_v36, %v3514_v9 }
 0x8fd   :  { %v3522_v17 = vpop.permute.xlu1 %3521  ;;  %v932_v62 = vpop.permute.xlu2 %931 }
 0x8fe   :  { %v3538_v59 = vsel %vm7513_vm7, %v3537_v29, %v3522_v17 }
 0x8ff   :  { %v3539_v6 = vsel %vm7514_vm9, %v3538_v59, %v3530_v48 }
 0x900   :  { %v3549_v20 = vpack.c.bf16 %v3539_v6, %v3539_v6 }
 0x902   :  { %3762 = vmatmul.msk.bf16.vlgmr.msra.gmra.mxu1 %vm7515_vm10, %v3549_v20 }
 0x905   :  { %v449_v34 = vpop.permute.xlu1 %448  ;;  %v956_v60 = vpop.permute.xlu2 %955 }
 0x90d   :  { %v479_v46 = vpop.permute.xlu1 %478  ;;  %v972_v14 = vpop.permute.xlu2 %971 }
 0x915   :  { %v499_v26 = vpop.permute.xlu1 %498 }
 0x916   :  { %v1434_v13 = vpop.permute.xlu2 %1433 }
 0x91e   :  { %v948_v18 = vpop.permute.xlu1 %947  ;;  %v1450_v51 = vpop.permute.xlu2 %1449 }
 0x926   :  { %v964_v27 = vpop.permute.xlu1 %963 }
 0x92f   :  { %v1426_v8 = vpop.permute.xlu1 %1425 }
 0x937   :  { %v1442_v24 = vpop.permute.xlu1 %1441 }
 0x97f   :  { %v3592_v2 = vpop.f32.mrf.mxu1 }
 0x980   :  { %3597 = vrot.lane.b32.xlu0 %v3592_v2, %s4082_s12 }
 0x987   :  { %v3594_v10 = vpop.f32.mrf.mxu1 }
 0x988   :  { %468 = vperm.xlu0 %3995, %v4037_v52  }
 0x990   :  { %3997 = vset.pattern.permute.xlu0 %v7511_v53 }
 0x991   :  { %939 = vperm.xlu0 %3997, %v6931_v16  }
 0x999   :  { %3999 = vset.pattern.permute.xlu0 %v7506_v45  ;;  %v4023_v45 = vpop.eup %4022 }
 0x99a   :  { %1417 = vperm.xlu0 %3999, %v6937_v58   ;;  %v3610_v54 = vmul.f32 4.0, %v4023_v45  ;;  %vm3614_vm8 = vweird.f32 %v4023_v45 }
 0x99c   :  { %v3611_v19 = vsub.f32 1.0, %v3610_v54 }
 0x99e   :  { %v3612_v3 = vmul.f32 %v4023_v45, %v3611_v19 }
 0x9a0   :  { %v3613_v42 = vadd.f32 %v4023_v45, %v3612_v3 }
 0x9a2   :  { %1457 = vperm.xlu0 %3999, %v6950_v55  }
 0x9aa   :  { %4002 = vset.pattern.permute.xlu0 %v7504_v57 }
 0x9f2   :  { %v3598_v12 = vpop.permute.xlu0 %3597 }
 0x9f3   :  { %v3600_v57 = vsel %vm3350_vm11, %v6866_v28, %v3598_v12  ;;  %v3615_v28 = vsel %vm3614_vm8, %v4023_v45, %v3613_v42 }
 0x9f4   :  { %v3602_v0 = vsel %vm3601_vm14, %v3600_v57, 0.0  ;;  %v3618_v35 = vrot.slane %v3600_v57, 4 }
 0x9f5   :  { %v3603_v15 = vrot.slane %v3602_v0, 4 }
 0x9f6   :  { %v3620_v40 = vsel %vm3601_vm14, %v3618_v35, 0.0 }
 0x9f7   :  { %v3604_v16 = vadd.f32 %v3603_v15, %v3602_v0  ;;  %v3621_v58 = vrot.slane %v3620_v40, 4 }
 0x9f9   :  { %v3605_v4 = vrot.slane %v3604_v16, 2  ;;  %v3622_v53 = vadd.f32 %v3621_v58, %v3620_v40 }
 0x9fa   :  { %v469_v55 = vpop.permute.xlu0 %468 }
 0x9fb   :  { %v3606_v52 = vadd.f32 %v3605_v4, %v3604_v16  ;;  %v3623_v47 = vrot.slane %v3622_v53, 2 }
 0x9fd   :  { %v3607_v50 = vrot.slane %v3606_v52, 1  ;;  %v3624_v32 = vadd.f32 %v3623_v47, %v3622_v53 }
 0x9ff   :  { %v3608_v22 = vadd.f32 %v3607_v50, %v3606_v52  ;;  %v3625_v21 = vrot.slane %v3624_v32, 1 }
 0xa01   :  { %v3626_v7 = vadd.f32 %v3625_v21, %v3624_v32  ;;  %v3616_v25 = vmul.f32 %v3615_v28, %v3608_v22 }
 0xa03   :  { %v3627_v56 = vmul.f32 %v3626_v7, %v3615_v28  ;;  %v940_v44 = vpop.permute.xlu0 %939 }
 0xa05   :  { %v3628_v48 = vsel %vm7516_vm15, %v3616_v25, %v3627_v56 }
 0xa06   :  { %v3631_v30 = vpack.c.bf16 %v3628_v48, %v3628_v48 }
 0xa08   :  { %3767 = vmatmul.msk.bf16.vlgmr.msra.gmra.mxu2 %vm3641_vm1, %v3631_v30 }
 0xa0c   :  { %v1418_v5 = vpop.permute.xlu0 %1417 }
 0xa14   :  { %v1458_v49 = vpop.permute.xlu0 %1457 }
 0xa8b   :  { %v3657_v43 = vpop.f32.mrf.mxu2 }
 0xa8c   :  { %v3658_v23 = vadd.f32 %v4003_v41, %v3657_v43 }
 0xa8e   :  { %3662 = vst.msk [vmem:[#allocation3] sm:$0x3] %vm3661_vm4, %v3658_v23 }
 0xa8f   :  { %3673 = dma.vmem_to_hbm [thread:$0]  %s3669_s4, 32, %s3671_s17, [#allocation4]  }
 0xa93   :  { %v3659_v1 = vpop.f32.mrf.mxu2 }
 0xa94   :  { %4062 = dma.done.wait [#allocation4], 32  }
 0xa95   :  { %4063 = vsyncadd [#allocation4], 4294967264 }
 0xa96   :  { %3678 = vsyncpa [#allocation4], 1 }

</bundles_post_ra>
